<compile_context>
chip_gen: v7x
topology: tpu7x:2x2x1
jax: 0.10.0
libtpu: 0.0.40
codegen_flags: <defaults>
</compile_context>

<pallas_src>
import functools

import jax
import jax.numpy as jnp
from jax.experimental import pallas as pl
from jax.experimental.pallas import tpu as pltpu

_BN_EPS = 1e-5


def _dot(a, b):
    return jnp.dot(a, b, preferred_element_type=jnp.float32)


# ------------------------------ fused kernel --------------------------------


def _fno_kernel(x_ref, win_ref, bin_ref, wout_ref, bout_ref,
                sop_ref, wld_ref, bl_ref,
                tile_ref, bmask_ref, agg2_ref, chmask_ref, aggch_ref,
                o_ref, h_ref, *, n_ch, t_size, l_size, batch):
    # x:      [B*Cin, T*L]   bf16   rows (b,c), cols (t,l)         (const block)
    # win:    [B*F, B*Cin]   bf16   kron(I_B, W_in)   bin: [B*F, 1] f32
    # wout:   [B*Cout, B*F]  bf16   kron(I_B, W_out)  bout:[B*Cout,1] f32
    # sop:    [1, F*L, F*T*L] bf16  folded spectral operator (this layer)
    # wld:    [1, B*F, B*F]  bf16   kron(I_B, W_local)   bl: [1, B*F, 1] f32
    # tile:   [L, F*L]       bf16   lane tiling of I_L
    # bmask:  [B*F, F*L]     bf16   block-diagonal channel mask
    # agg2:   [B*F, B*F]     bf16   kron(I_B, ones(F,F)) (sum channels / batch)
    # chmask: [F, B*F, T*L]  bf16   precomputed per-output-channel row masks
    # aggch:  [B*F, B*F]     f32    kron(ones(B,B), I_F) (BN cross-batch sum)
    # h_ref:  [B*F, T*L]     f32    activation carried across grid steps
    layer = pl.program_id(0)
    n_layers = pl.num_programs(0)
    tl = t_size * l_size
    inv_n = 1.0 / float(batch * tl)

    # ---- read_in (first grid step): per-pixel Linear(Cin -> F), block-diag
    @pl.when(layer == 0)
    def _():
        h_ref[...] = _dot(win_ref[...], x_ref[...]) + bin_ref[...]

    h = h_ref[...]                               # f32 [B*F, T*L]
    h_b = h.astype(jnp.bfloat16)                 # bf16 operand for the MXU

    # ---- local path: x2[(b,o),:] = sum_i Wl[o,i] h[(b,i),:] + bl[o]
    x2 = _dot(wld_ref[0], h_b) + bl_ref[0]       # f32 [B*F, T*L]

    # ---- spectral path (only the t=0 slice feeds it, as in the module)
    x0_b = h_b[:, 0:l_size]                      # bf16 [B*F, L]
    # place channel i's t=0 row into column block i, then sum channel rows per
    # batch -> every row of x0r holds the flattened x0 of its batch (exact:
    # all mixing matrices are 0/1).
    x0e_b = (_dot(x0_b, tile_ref[...])).astype(jnp.bfloat16) * bmask_ref[...]
    x0r_b = _dot(agg2_ref[...], x0e_b).astype(jnp.bfloat16)   # bf16 [B*F, F*L]
    z = _dot(x0r_b, sop_ref[0])                  # f32 [B*F, F*T*L]
    # TODO(synk): z recomputes F identical rows per batch; once B*F exceeds the
    #             MXU row count, restructure to B distinct rows to reclaim the
    #             F x MACs on this (dominant) matmul.

    # per-row output-channel selection with precomputed lane-wide masks
    x1 = chmask_ref[0] * z[:, 0:tl]
    for oc in range(1, n_ch):
        x1 = x1 + chmask_ref[oc] * z[:, oc * tl:(oc + 1) * tl]

    # ---- add + BatchNorm (training stats, biased var) + ReLU
    # lane-reduce first (XLU), then tiny f32 cross-batch matmuls on [B*F,1]
    s = x1 + x2
    r = jnp.sum(s, axis=1, keepdims=True)                     # [B*F, 1]
    rsq = jnp.sum(s * s, axis=1, keepdims=True)
    mean = _dot(aggch_ref[...], r) * inv_n                    # [B*F, 1]
    msq = _dot(aggch_ref[...], rsq) * inv_n
    var = msq - mean * mean
    hn = jnp.maximum((s - mean) * jax.lax.rsqrt(var + _BN_EPS), 0.0)
    h_ref[...] = hn

    # ---- read_out (last grid step): Linear(F -> Cout)
    @pl.when(layer == n_layers - 1)
    def _():
        o_ref[...] = _dot(wout_ref[...], hn.astype(jnp.bfloat16)) + bout_ref[...]


# ------------------------ setup: folded spectral operator -------------------


def build_sop(wpr, wpi, wnr, wni, t_size, l_size, m0, m1):
    """Fold rfft(L) -> complex mode weights -> ifft(T)/irfft(L) into one real
    matrix SOP[(i,l'), (o,t,l)] of shape [F_in*L, F_out*T*L]."""
    assert m1 <= l_size // 2 + 1 and m0 <= t_size
    f_in, f_out = wpr.shape[0], wpr.shape[1]
    two_pi = 2.0 * jnp.pi
    t_idx = jnp.arange(t_size, dtype=jnp.float32)
    l_idx = jnp.arange(l_size, dtype=jnp.float32)
    h_idx = jnp.arange(m0, dtype=jnp.float32)
    w_idx = jnp.arange(m1, dtype=jnp.float32)

    # irfft half-spectrum weights (DC / Nyquist = 1, else 2)
    nyq = l_size // 2 if l_size % 2 == 0 else -1
    c_w = jnp.where((w_idx == 0) | (w_idx == nyq), 1.0, 2.0)
    # positive rows overwritten by the negative block when T < 2*m0
    keep_pos = (h_idx < (t_size - m0)).astype(jnp.float32)

    phi_pos = two_pi * jnp.outer(h_idx, t_idx) / t_size                 # [m0,T]
    phi_neg = two_pi * jnp.outer(t_size - m0 + h_idx, t_idx) / t_size   # [m0,T]
    theta = two_pi * jnp.outer(w_idx, l_idx) / l_size                   # [m1,L]

    scale = (c_w / (t_size * l_size))[None, :, None, None]
    kp = keep_pos[:, None, None, None]
    ang_pos = phi_pos[:, None, :, None] + theta[None, :, None, :]       # [m0,m1,T,L]
    ang_neg = phi_neg[:, None, :, None] + theta[None, :, None, :]
    a_pos = kp * scale * jnp.cos(ang_pos)
    b_pos = -kp * scale * jnp.sin(ang_pos)
    a_neg = scale * jnp.cos(ang_neg)
    b_neg = -scale * jnp.sin(ang_neg)

    def con(w4, basis):
        return jnp.einsum('iohw,hwtl->iwotl', w4, basis)

    # contribution of Xr / Xi (rfft of x0) to the real output
    k_r = con(wpr, a_pos) + con(wpi, b_pos) + con(wnr, a_neg) + con(wni, b_neg)
    k_i = con(wpr, b_pos) - con(wpi, a_pos) + con(wnr, b_neg) - con(wni, a_neg)

    # fold the forward rfft along L:  Xr = x0 @ cos,  Xi = -x0 @ sin
    ang_f = two_pi * jnp.outer(l_idx, w_idx) / l_size                   # [L, m1]
    g = (jnp.einsum('pw,iwotl->ipotl', jnp.cos(ang_f), k_r)
         - jnp.einsum('pw,iwotl->ipotl', jnp.sin(ang_f), k_i))          # [F,L,F,T,L]
    return g.reshape(f_in * l_size, f_out * t_size * l_size)


def init_params(key, c_in, c_out, fno_ch, m0, m1, n_layers):
    def linear_init(k, fan_in, fan_out):
        k1, k2 = jax.random.split(k)
        bound = 1.0 / (fan_in ** 0.5)
        w = jax.random.uniform(k1, (fan_out, fan_in), jnp.float32, -bound, bound)
        b = jax.random.uniform(k2, (fan_out,), jnp.float32, -bound, bound)
        return w, b

    def spectral_init(k):
        fan = fno_ch * m0 * m1                       # xavier on [F,F,m0,m1]
        bound = (6.0 / (2.0 * fan)) ** 0.5
        kr, ki = jax.random.split(k)
        wr = jax.random.uniform(kr, (fno_ch, fno_ch, m0, m1), jnp.float32, -bound, bound)
        wi = jax.random.uniform(ki, (fno_ch, fno_ch, m0, m1), jnp.float32, -bound, bound)
        return wr, wi

    keys = jax.random.split(key, 2 + 2 * n_layers)
    w_in, b_in = linear_init(keys[0], c_in, fno_ch)
    w_out, b_out = linear_init(keys[1], fno_ch, c_out)
    blocks = []
    for i in range(n_layers):
        kpz, knz = jax.random.split(keys[2 + 2 * i])
        wpr, wpi = spectral_init(kpz)
        wnr, wni = spectral_init(knz)
        wl, bl = linear_init(keys[3 + 2 * i], fno_ch, fno_ch)
        blocks.append(dict(wpr=wpr, wpi=wpi, wnr=wnr, wni=wni, wl=wl, bl=bl))
    return dict(w_in=w_in, b_in=b_in, w_out=w_out, b_out=b_out, blocks=blocks)


def prepare_params(params, batch, t_size, l_size, m0, m1):
    """Pre-pack all weights / layout constants consumed by the fused kernel.
    MXU matmul operands are packed in bf16; bias columns and BN aggregation
    stay f32."""
    f32, bf16 = jnp.float32, jnp.bfloat16
    fno_ch = params["w_in"].shape[0]
    c_out = params["w_out"].shape[0]
    tl = t_size * l_size
    eye_b = jnp.eye(batch, dtype=f32)
    eye_f = jnp.eye(fno_ch, dtype=f32)
    onehot = jnp.tile(eye_f, (batch, 1))                       # [B*F, F]
    chmask = jnp.broadcast_to(onehot.T[:, :, None],
                              (fno_ch, batch * fno_ch, tl))    # [F, B*F, T*L]
    # TODO(synk): for large B, replace the kron(I_B, W) packing with a
    #             per-batch row-tiled ("parallel") grid dimension to avoid the
    #             O(B^2) blow-up and to use v7x's second TensorCore (needs a
    #             cross-tile reduction for the BatchNorm statistics).
    return dict(
        win=jnp.kron(eye_b, params["w_in"]).astype(bf16),
        bin=jnp.tile(params["b_in"], batch).reshape(batch * fno_ch, 1).astype(f32),
        wout=jnp.kron(eye_b, params["w_out"]).astype(bf16),
        bout=jnp.tile(params["b_out"], batch).reshape(batch * c_out, 1).astype(f32),
        sop=jnp.stack([build_sop(b["wpr"], b["wpi"], b["wnr"], b["wni"],
                                 t_size, l_size, m0, m1)
                       for b in params["blocks"]]).astype(bf16),
        wld=jnp.stack([jnp.kron(eye_b, b["wl"])
                       for b in params["blocks"]]).astype(bf16),
        bl=jnp.stack([jnp.tile(b["bl"], batch).reshape(batch * fno_ch, 1)
                      for b in params["blocks"]]).astype(f32),
        tile=jnp.tile(jnp.eye(l_size, dtype=f32), (1, fno_ch)).astype(bf16),
        bmask=jnp.tile(jnp.repeat(eye_f, l_size, axis=1), (batch, 1)).astype(bf16),
        agg2=jnp.kron(eye_b, jnp.ones((fno_ch, fno_ch), f32)).astype(bf16),
        chmask=chmask.astype(bf16),
        aggch=jnp.kron(jnp.ones((batch, batch), f32), eye_f).astype(f32),
    )


# ------------------------------- forward ------------------------------------


def make_forward(batch, c_in, c_out, fno_ch, t_size, l_size, n_layers):
    tl = t_size * l_size
    bf = batch * fno_ch
    kernel = functools.partial(_fno_kernel, n_ch=fno_ch, t_size=t_size,
                               l_size=l_size, batch=batch)

    const2 = lambda l: (0, 0)
    const3 = lambda l: (0, 0, 0)
    per_layer = lambda l: (l, 0, 0)

    in_specs = [
        pl.BlockSpec((batch * c_in, tl), const2),                     # x
        pl.BlockSpec((bf, batch * c_in), const2),                     # win
        pl.BlockSpec((bf, 1), const2),                                # bin
        pl.BlockSpec((batch * c_out, bf), const2),                    # wout
        pl.BlockSpec((batch * c_out, 1), const2),                     # bout
        pl.BlockSpec((1, fno_ch * l_size, fno_ch * tl), per_layer),   # sop
        pl.BlockSpec((1, bf, bf), per_layer),                         # wld
        pl.BlockSpec((1, bf, 1), per_layer),                          # bl
        pl.BlockSpec((l_size, fno_ch * l_size), const2),              # tile
        pl.BlockSpec((bf, fno_ch * l_size), const2),                  # bmask
        pl.BlockSpec((bf, bf), const2),                               # agg2
        pl.BlockSpec((fno_ch, bf, tl), const3),                       # chmask
        pl.BlockSpec((bf, bf), const2),                               # aggch
    ]

    # TODO(synk): fno_pad > 0 (domain padding) not implemented; module default is 0.
    @jax.jit
    def forward(x_nchw, prep):
        x_rows = x_nchw.reshape(batch * c_in, tl).astype(jnp.bfloat16)  # NCHW rows
        out_rows = pl.pallas_call(
            kernel,
            out_shape=jax.ShapeDtypeStruct((batch * c_out, tl), jnp.float32),
            grid=(n_layers,),
            in_specs=in_specs,
            out_specs=pl.BlockSpec((batch * c_out, tl), const2),
            scratch_shapes=[pltpu.VMEM((bf, tl), jnp.float32)],          # carried h
            compiler_params=pltpu.CompilerParams(
                dimension_semantics=("arbitrary",),
                vmem_limit_bytes=32 * 1024 * 1024),
        )(x_rows, prep["win"], prep["bin"], prep["wout"], prep["bout"],
          prep["sop"], prep["wld"], prep["bl"],
          prep["tile"], prep["bmask"], prep["agg2"], prep["chmask"],
          prep["aggch"])
        return out_rows.reshape(batch, c_out, t_size, l_size)

    return forward


# --------------------------------- main --------------------------------------


if __name__ == "__main__":
    B, C_IN, C_OUT = 8, 2, 1
    T, L = 8, 16                # T*L = 128 -> lane-dense layout
    FNO_CH = 16                 # B*F = 128 MXU rows, F*L = 256 contraction depth
    MODES = (4, 4)
    N_LAYERS = 2

    key = jax.random.PRNGKey(0)
    kx, kp = jax.random.split(key)
    x = jax.random.normal(kx, (B, C_IN, T, L), jnp.float32)      # PyTorch NCHW input
    params = init_params(kp, C_IN, C_OUT, FNO_CH, MODES[0], MODES[1], N_LAYERS)
    prep = prepare_params(params, B, T, L, MODES[0], MODES[1])

    forward = make_forward(B, C_IN, C_OUT, FNO_CH, T, L, N_LAYERS)
    y = jax.block_until_ready(forward(x, prep))

    assert y.shape == (B, C_OUT, T, L) and y.dtype == jnp.float32
    assert bool(jnp.all(jnp.isfinite(y)))
    print("KERNEL_OK")
</pallas_src>

<mosaic_0001>
module attributes {stable_mosaic.version = 11 : i64} {
  func.func @_fno_kernel(%arg0: i32, %arg1: memref<16x128xbf16, #tpu.memory_space<vmem>>, %arg2: memref<128x16xbf16, #tpu.memory_space<vmem>>, %arg3: memref<128x1xf32, #tpu.memory_space<vmem>>, %arg4: memref<8x128xbf16, #tpu.memory_space<vmem>>, %arg5: memref<8x1xf32, #tpu.memory_space<vmem>>, %arg6: memref<1x256x2048xbf16, #tpu.memory_space<vmem>>, %arg7: memref<1x128x128xbf16, #tpu.memory_space<vmem>>, %arg8: memref<1x128x1xf32, #tpu.memory_space<vmem>>, %arg9: memref<16x256xbf16, #tpu.memory_space<vmem>>, %arg10: memref<128x256xbf16, #tpu.memory_space<vmem>>, %arg11: memref<128x128xbf16, #tpu.memory_space<vmem>>, %arg12: memref<16x128x128xbf16, #tpu.memory_space<vmem>>, %arg13: memref<128x128xf32, #tpu.memory_space<vmem>>, %arg14: memref<8x128xf32, #tpu.memory_space<vmem>>, %arg15: memref<128x128xf32, #tpu.memory_space<vmem>>) attributes {dimension_semantics = [#tpu.dimension_semantics<arbitrary>], iteration_bounds = array<i64: 2>, scalar_prefetch = 0 : i64, scratch_operands = 1 : i64, tpu.core_type = #tpu.core_type<tc>, window_params = [{pipeline_mode = #tpu.pipeline_mode<synchronous>, transform_indices = @transform_0, window_bounds = array<i64: 16, 128>}, {pipeline_mode = #tpu.pipeline_mode<synchronous>, transform_indices = @transform_1, window_bounds = array<i64: 128, 16>}, {pipeline_mode = #tpu.pipeline_mode<synchronous>, transform_indices = @transform_2, window_bounds = array<i64: 128, 1>}, {pipeline_mode = #tpu.pipeline_mode<synchronous>, transform_indices = @transform_3, window_bounds = array<i64: 8, 128>}, {pipeline_mode = #tpu.pipeline_mode<synchronous>, transform_indices = @transform_4, window_bounds = array<i64: 8, 1>}, {transform_indices = @transform_5, window_bounds = array<i64: 1, 256, 2048>}, {transform_indices = @transform_6, window_bounds = array<i64: 1, 128, 128>}, {transform_indices = @transform_7, window_bounds = array<i64: 1, 128, 1>}, {pipeline_mode = #tpu.pipeline_mode<synchronous>, transform_indices = @transform_8, window_bounds = array<i64: 16, 256>}, {pipeline_mode = #tpu.pipeline_mode<synchronous>, transform_indices = @transform_9, window_bounds = array<i64: 128, 256>}, {pipeline_mode = #tpu.pipeline_mode<synchronous>, transform_indices = @transform_10, window_bounds = array<i64: 128, 128>}, {pipeline_mode = #tpu.pipeline_mode<synchronous>, transform_indices = @transform_11, window_bounds = array<i64: 16, 128, 128>}, {pipeline_mode = #tpu.pipeline_mode<synchronous>, transform_indices = @transform_12, window_bounds = array<i64: 128, 128>}, {pipeline_mode = #tpu.pipeline_mode<synchronous>, transform_indices = @transform_13, window_bounds = array<i64: 8, 128>}]} {
    %c0_i32 = arith.constant 0 : i32
    %0 = arith.cmpi eq, %arg0, %c0_i32 : i32
    %1 = arith.extui %0 : i1 to i32
    %c0_i32_0 = arith.constant 0 : i32
    %2 = arith.cmpi ne, %1, %c0_i32_0 : i32
    scf.if %2 {
      %c0_68 = arith.constant 0 : index
      %c0_69 = arith.constant 0 : index
      %148 = vector.load %arg2[%c0_68, %c0_69] : memref<128x16xbf16, #tpu.memory_space<vmem>>, vector<128x16xbf16>
      %c0_70 = arith.constant 0 : index
      %c0_71 = arith.constant 0 : index
      %149 = vector.load %arg1[%c0_70, %c0_71] : memref<16x128xbf16, #tpu.memory_space<vmem>>, vector<16x128xbf16>
      %cst_72 = arith.constant dense<0.000000e+00> : vector<128x128xf32>
      %150 = tpu.matmul %148, %149, %cst_72 {dimension_numbers = #tpu.dot_dimension_numbers<[1], [0], [0], [1], [0, 0, 1, 1], [], []>} : vector<128x16xbf16>, vector<16x128xbf16>, vector<128x128xf32> -> vector<128x128xf32>
      %c0_73 = arith.constant 0 : index
      %c0_74 = arith.constant 0 : index
      %151 = vector.load %arg3[%c0_73, %c0_74] : memref<128x1xf32, #tpu.memory_space<vmem>>, vector<128x1xf32>
      %152 = vector.broadcast %151 : vector<128x1xf32> to vector<128x128xf32>
      %153 = arith.addf %150, %152 : vector<128x128xf32>
      %c0_75 = arith.constant 0 : index
      %c0_76 = arith.constant 0 : index
      %154 = vector.load %arg15[%c0_75, %c0_76] : memref<128x128xf32, #tpu.memory_space<vmem>>, vector<128x128xf32>
      tpu.vector_store %arg15[%c0_75, %c0_76], %153 {strides = array<i32>} : memref<128x128xf32, #tpu.memory_space<vmem>>, vector<128x128xf32>,
    } else {
    }
    %c0 = arith.constant 0 : index
    %c0_1 = arith.constant 0 : index
    %3 = vector.load %arg15[%c0, %c0_1] : memref<128x128xf32, #tpu.memory_space<vmem>>, vector<128x128xf32>
    %4 = arith.truncf %3 : vector<128x128xf32> to vector<128x128xbf16>
    %c0_2 = arith.constant 0 : index
    %c0_3 = arith.constant 0 : index
    %c0_4 = arith.constant 0 : index
    %5 = vector.load %arg7[%c0_2, %c0_3, %c0_4] : memref<1x128x128xbf16, #tpu.memory_space<vmem>>, vector<1x128x128xbf16>
    %6 = vector.shape_cast %5 : vector<1x128x128xbf16> to vector<128x128xbf16>
    %cst = arith.constant dense<0.000000e+00> : vector<128x128xf32>
    %7 = tpu.matmul %6, %4, %cst {dimension_numbers = #tpu.dot_dimension_numbers<[1], [0], [0], [1], [0, 0, 1, 1], [], []>} : vector<128x128xbf16>, vector<128x128xbf16>, vector<128x128xf32> -> vector<128x128xf32>
    %c0_5 = arith.constant 0 : index
    %c0_6 = arith.constant 0 : index
    %c0_7 = arith.constant 0 : index
    %8 = vector.load %arg8[%c0_5, %c0_6, %c0_7] : memref<1x128x1xf32, #tpu.memory_space<vmem>>, vector<1x128x1xf32>
    %9 = vector.shape_cast %8 : vector<1x128x1xf32> to vector<128x1xf32>
    %10 = vector.broadcast %9 : vector<128x1xf32> to vector<128x128xf32>
    %11 = arith.addf %7, %10 : vector<128x128xf32>
    %12 = vector.extract_strided_slice %4 {offsets = [0, 0], sizes = [128, 16], strides = [1, 1]} : vector<128x128xbf16> to vector<128x16xbf16>
    %c0_8 = arith.constant 0 : index
    %c0_9 = arith.constant 0 : index
    %13 = vector.load %arg9[%c0_8, %c0_9] : memref<16x256xbf16, #tpu.memory_space<vmem>>, vector<16x256xbf16>
    %cst_10 = arith.constant dense<0.000000e+00> : vector<128x256xf32>
    %14 = tpu.matmul %12, %13, %cst_10 {dimension_numbers = #tpu.dot_dimension_numbers<[1], [0], [0], [1], [0, 0, 1, 1], [], []>} : vector<128x16xbf16>, vector<16x256xbf16>, vector<128x256xf32> -> vector<128x256xf32>
    %15 = arith.truncf %14 : vector<128x256xf32> to vector<128x256xbf16>
    %c0_11 = arith.constant 0 : index
    %c0_12 = arith.constant 0 : index
    %16 = vector.load %arg10[%c0_11, %c0_12] : memref<128x256xbf16, #tpu.memory_space<vmem>>, vector<128x256xbf16>
    %17 = arith.mulf %15, %16 : vector<128x256xbf16>
    %c0_13 = arith.constant 0 : index
    %c0_14 = arith.constant 0 : index
    %18 = vector.load %arg11[%c0_13, %c0_14] : memref<128x128xbf16, #tpu.memory_space<vmem>>, vector<128x128xbf16>
    %cst_15 = arith.constant dense<0.000000e+00> : vector<128x256xf32>
    %19 = tpu.matmul %18, %17, %cst_15 {dimension_numbers = #tpu.dot_dimension_numbers<[1], [0], [0], [1], [0, 0, 1, 1], [], []>} : vector<128x128xbf16>, vector<128x256xbf16>, vector<128x256xf32> -> vector<128x256xf32>
    %20 = arith.truncf %19 : vector<128x256xf32> to vector<128x256xbf16>
    %c0_16 = arith.constant 0 : index
    %c0_17 = arith.constant 0 : index
    %c0_18 = arith.constant 0 : index
    %21 = vector.load %arg6[%c0_16, %c0_17, %c0_18] : memref<1x256x2048xbf16, #tpu.memory_space<vmem>>, vector<1x256x2048xbf16>
    %22 = vector.shape_cast %21 : vector<1x256x2048xbf16> to vector<256x2048xbf16>
    %cst_19 = arith.constant dense<0.000000e+00> : vector<128x2048xf32>
    %23 = tpu.matmul %20, %22, %cst_19 {dimension_numbers = #tpu.dot_dimension_numbers<[1], [0], [0], [1], [0, 0, 1, 1], [], []>} : vector<128x256xbf16>, vector<256x2048xbf16>, vector<128x2048xf32> -> vector<128x2048xf32>
    %c0_20 = arith.constant 0 : index
    %c0_21 = arith.constant 0 : index
    %c0_22 = arith.constant 0 : index
    %24 = vector.load %arg12[%c0_20, %c0_21, %c0_22] : memref<16x128x128xbf16, #tpu.memory_space<vmem>>, vector<1x128x128xbf16>
    %25 = vector.shape_cast %24 : vector<1x128x128xbf16> to vector<128x128xbf16>
    %26 = vector.extract_strided_slice %23 {offsets = [0, 0], sizes = [128, 128], strides = [1, 1]} : vector<128x2048xf32> to vector<128x128xf32>
    %27 = arith.extf %25 : vector<128x128xbf16> to vector<128x128xf32>
    %28 = arith.mulf %27, %26 : vector<128x128xf32>
    %c1 = arith.constant 1 : index
    %c0_23 = arith.constant 0 : index
    %c0_24 = arith.constant 0 : index
    %29 = vector.load %arg12[%c1, %c0_23, %c0_24] : memref<16x128x128xbf16, #tpu.memory_space<vmem>>, vector<1x128x128xbf16>
    %30 = vector.shape_cast %29 : vector<1x128x128xbf16> to vector<128x128xbf16>
    %31 = vector.extract_strided_slice %23 {offsets = [0, 128], sizes = [128, 128], strides = [1, 1]} : vector<128x2048xf32> to vector<128x128xf32>
    %32 = arith.extf %30 : vector<128x128xbf16> to vector<128x128xf32>
    %33 = arith.mulf %32, %31 : vector<128x128xf32>
    %34 = arith.addf %28, %33 : vector<128x128xf32>
    %c2 = arith.constant 2 : index
    %c0_25 = arith.constant 0 : index
    %c0_26 = arith.constant 0 : index
    %35 = vector.load %arg12[%c2, %c0_25, %c0_26] : memref<16x128x128xbf16, #tpu.memory_space<vmem>>, vector<1x128x128xbf16>
    %36 = vector.shape_cast %35 : vector<1x128x128xbf16> to vector<128x128xbf16>
    %37 = vector.extract_strided_slice %23 {offsets = [0, 256], sizes = [128, 128], strides = [1, 1]} : vector<128x2048xf32> to vector<128x128xf32>
    %38 = arith.extf %36 : vector<128x128xbf16> to vector<128x128xf32>
    %39 = arith.mulf %38, %37 : vector<128x128xf32>
    %40 = arith.addf %34, %39 : vector<128x128xf32>
    %c3 = arith.constant 3 : index
    %c0_27 = arith.constant 0 : index
    %c0_28 = arith.constant 0 : index
    %41 = vector.load %arg12[%c3, %c0_27, %c0_28] : memref<16x128x128xbf16, #tpu.memory_space<vmem>>, vector<1x128x128xbf16>
    %42 = vector.shape_cast %41 : vector<1x128x128xbf16> to vector<128x128xbf16>
    %43 = vector.extract_strided_slice %23 {offsets = [0, 384], sizes = [128, 128], strides = [1, 1]} : vector<128x2048xf32> to vector<128x128xf32>
    %44 = arith.extf %42 : vector<128x128xbf16> to vector<128x128xf32>
    %45 = arith.mulf %44, %43 : vector<128x128xf32>
    %46 = arith.addf %40, %45 : vector<128x128xf32>
    %c4 = arith.constant 4 : index
    %c0_29 = arith.constant 0 : index
    %c0_30 = arith.constant 0 : index
    %47 = vector.load %arg12[%c4, %c0_29, %c0_30] : memref<16x128x128xbf16, #tpu.memory_space<vmem>>, vector<1x128x128xbf16>
    %48 = vector.shape_cast %47 : vector<1x128x128xbf16> to vector<128x128xbf16>
    %49 = vector.extract_strided_slice %23 {offsets = [0, 512], sizes = [128, 128], strides = [1, 1]} : vector<128x2048xf32> to vector<128x128xf32>
    %50 = arith.extf %48 : vector<128x128xbf16> to vector<128x128xf32>
    %51 = arith.mulf %50, %49 : vector<128x128xf32>
    %52 = arith.addf %46, %51 : vector<128x128xf32>
    %c5 = arith.constant 5 : index
    %c0_31 = arith.constant 0 : index
    %c0_32 = arith.constant 0 : index
    %53 = vector.load %arg12[%c5, %c0_31, %c0_32] : memref<16x128x128xbf16, #tpu.memory_space<vmem>>, vector<1x128x128xbf16>
    %54 = vector.shape_cast %53 : vector<1x128x128xbf16> to vector<128x128xbf16>
    %55 = vector.extract_strided_slice %23 {offsets = [0, 640], sizes = [128, 128], strides = [1, 1]} : vector<128x2048xf32> to vector<128x128xf32>
    %56 = arith.extf %54 : vector<128x128xbf16> to vector<128x128xf32>
    %57 = arith.mulf %56, %55 : vector<128x128xf32>
    %58 = arith.addf %52, %57 : vector<128x128xf32>
    %c6 = arith.constant 6 : index
    %c0_33 = arith.constant 0 : index
    %c0_34 = arith.constant 0 : index
    %59 = vector.load %arg12[%c6, %c0_33, %c0_34] : memref<16x128x128xbf16, #tpu.memory_space<vmem>>, vector<1x128x128xbf16>
    %60 = vector.shape_cast %59 : vector<1x128x128xbf16> to vector<128x128xbf16>
    %61 = vector.extract_strided_slice %23 {offsets = [0, 768], sizes = [128, 128], strides = [1, 1]} : vector<128x2048xf32> to vector<128x128xf32>
    %62 = arith.extf %60 : vector<128x128xbf16> to vector<128x128xf32>
    %63 = arith.mulf %62, %61 : vector<128x128xf32>
    %64 = arith.addf %58, %63 : vector<128x128xf32>
    %c7 = arith.constant 7 : index
    %c0_35 = arith.constant 0 : index
    %c0_36 = arith.constant 0 : index
    %65 = vector.load %arg12[%c7, %c0_35, %c0_36] : memref<16x128x128xbf16, #tpu.memory_space<vmem>>, vector<1x128x128xbf16>
    %66 = vector.shape_cast %65 : vector<1x128x128xbf16> to vector<128x128xbf16>
    %67 = vector.extract_strided_slice %23 {offsets = [0, 896], sizes = [128, 128], strides = [1, 1]} : vector<128x2048xf32> to vector<128x128xf32>
    %68 = arith.extf %66 : vector<128x128xbf16> to vector<128x128xf32>
    %69 = arith.mulf %68, %67 : vector<128x128xf32>
    %70 = arith.addf %64, %69 : vector<128x128xf32>
    %c8 = arith.constant 8 : index
    %c0_37 = arith.constant 0 : index
    %c0_38 = arith.constant 0 : index
    %71 = vector.load %arg12[%c8, %c0_37, %c0_38] : memref<16x128x128xbf16, #tpu.memory_space<vmem>>, vector<1x128x128xbf16>
    %72 = vector.shape_cast %71 : vector<1x128x128xbf16> to vector<128x128xbf16>
    %73 = vector.extract_strided_slice %23 {offsets = [0, 1024], sizes = [128, 128], strides = [1, 1]} : vector<128x2048xf32> to vector<128x128xf32>
    %74 = arith.extf %72 : vector<128x128xbf16> to vector<128x128xf32>
    %75 = arith.mulf %74, %73 : vector<128x128xf32>
    %76 = arith.addf %70, %75 : vector<128x128xf32>
    %c9 = arith.constant 9 : index
    %c0_39 = arith.constant 0 : index
    %c0_40 = arith.constant 0 : index
    %77 = vector.load %arg12[%c9, %c0_39, %c0_40] : memref<16x128x128xbf16, #tpu.memory_space<vmem>>, vector<1x128x128xbf16>
    %78 = vector.shape_cast %77 : vector<1x128x128xbf16> to vector<128x128xbf16>
    %79 = vector.extract_strided_slice %23 {offsets = [0, 1152], sizes = [128, 128], strides = [1, 1]} : vector<128x2048xf32> to vector<128x128xf32>
    %80 = arith.extf %78 : vector<128x128xbf16> to vector<128x128xf32>
    %81 = arith.mulf %80, %79 : vector<128x128xf32>
    %82 = arith.addf %76, %81 : vector<128x128xf32>
    %c10 = arith.constant 10 : index
    %c0_41 = arith.constant 0 : index
    %c0_42 = arith.constant 0 : index
    %83 = vector.load %arg12[%c10, %c0_41, %c0_42] : memref<16x128x128xbf16, #tpu.memory_space<vmem>>, vector<1x128x128xbf16>
    %84 = vector.shape_cast %83 : vector<1x128x128xbf16> to vector<128x128xbf16>
    %85 = vector.extract_strided_slice %23 {offsets = [0, 1280], sizes = [128, 128], strides = [1, 1]} : vector<128x2048xf32> to vector<128x128xf32>
    %86 = arith.extf %84 : vector<128x128xbf16> to vector<128x128xf32>
    %87 = arith.mulf %86, %85 : vector<128x128xf32>
    %88 = arith.addf %82, %87 : vector<128x128xf32>
    %c11 = arith.constant 11 : index
    %c0_43 = arith.constant 0 : index
    %c0_44 = arith.constant 0 : index
    %89 = vector.load %arg12[%c11, %c0_43, %c0_44] : memref<16x128x128xbf16, #tpu.memory_space<vmem>>, vector<1x128x128xbf16>
    %90 = vector.shape_cast %89 : vector<1x128x128xbf16> to vector<128x128xbf16>
    %91 = vector.extract_strided_slice %23 {offsets = [0, 1408], sizes = [128, 128], strides = [1, 1]} : vector<128x2048xf32> to vector<128x128xf32>
    %92 = arith.extf %90 : vector<128x128xbf16> to vector<128x128xf32>
    %93 = arith.mulf %92, %91 : vector<128x128xf32>
    %94 = arith.addf %88, %93 : vector<128x128xf32>
    %c12 = arith.constant 12 : index
    %c0_45 = arith.constant 0 : index
    %c0_46 = arith.constant 0 : index
    %95 = vector.load %arg12[%c12, %c0_45, %c0_46] : memref<16x128x128xbf16, #tpu.memory_space<vmem>>, vector<1x128x128xbf16>
    %96 = vector.shape_cast %95 : vector<1x128x128xbf16> to vector<128x128xbf16>
    %97 = vector.extract_strided_slice %23 {offsets = [0, 1536], sizes = [128, 128], strides = [1, 1]} : vector<128x2048xf32> to vector<128x128xf32>
    %98 = arith.extf %96 : vector<128x128xbf16> to vector<128x128xf32>
    %99 = arith.mulf %98, %97 : vector<128x128xf32>
    %100 = arith.addf %94, %99 : vector<128x128xf32>
    %c13 = arith.constant 13 : index
    %c0_47 = arith.constant 0 : index
    %c0_48 = arith.constant 0 : index
    %101 = vector.load %arg12[%c13, %c0_47, %c0_48] : memref<16x128x128xbf16, #tpu.memory_space<vmem>>, vector<1x128x128xbf16>
    %102 = vector.shape_cast %101 : vector<1x128x128xbf16> to vector<128x128xbf16>
    %103 = vector.extract_strided_slice %23 {offsets = [0, 1664], sizes = [128, 128], strides = [1, 1]} : vector<128x2048xf32> to vector<128x128xf32>
    %104 = arith.extf %102 : vector<128x128xbf16> to vector<128x128xf32>
    %105 = arith.mulf %104, %103 : vector<128x128xf32>
    %106 = arith.addf %100, %105 : vector<128x128xf32>
    %c14 = arith.constant 14 : index
    %c0_49 = arith.constant 0 : index
    %c0_50 = arith.constant 0 : index
    %107 = vector.load %arg12[%c14, %c0_49, %c0_50] : memref<16x128x128xbf16, #tpu.memory_space<vmem>>, vector<1x128x128xbf16>
    %108 = vector.shape_cast %107 : vector<1x128x128xbf16> to vector<128x128xbf16>
    %109 = vector.extract_strided_slice %23 {offsets = [0, 1792], sizes = [128, 128], strides = [1, 1]} : vector<128x2048xf32> to vector<128x128xf32>
    %110 = arith.extf %108 : vector<128x128xbf16> to vector<128x128xf32>
    %111 = arith.mulf %110, %109 : vector<128x128xf32>
    %112 = arith.addf %106, %111 : vector<128x128xf32>
    %c15 = arith.constant 15 : index
    %c0_51 = arith.constant 0 : index
    %c0_52 = arith.constant 0 : index
    %113 = vector.load %arg12[%c15, %c0_51, %c0_52] : memref<16x128x128xbf16, #tpu.memory_space<vmem>>, vector<1x128x128xbf16>
    %114 = vector.shape_cast %113 : vector<1x128x128xbf16> to vector<128x128xbf16>
    %115 = vector.extract_strided_slice %23 {offsets = [0, 1920], sizes = [128, 128], strides = [1, 1]} : vector<128x2048xf32> to vector<128x128xf32>
    %116 = arith.extf %114 : vector<128x128xbf16> to vector<128x128xf32>
    %117 = arith.mulf %116, %115 : vector<128x128xf32>
    %118 = arith.addf %112, %117 : vector<128x128xf32>
    %119 = arith.addf %118, %11 : vector<128x128xf32>
    %cst_53 = arith.constant dense<0.000000e+00> : vector<128xf32>
    %120 = vector.multi_reduction <add>, %119, %cst_53 [1] : vector<128x128xf32> to vector<128xf32>
    %121 = vector.shape_cast %120 : vector<128xf32> to vector<128x1xf32>
    %122 = arith.mulf %119, %119 : vector<128x128xf32>
    %cst_54 = arith.constant dense<0.000000e+00> : vector<128xf32>
    %123 = vector.multi_reduction <add>, %122, %cst_54 [1] : vector<128x128xf32> to vector<128xf32>
    %124 = vector.shape_cast %123 : vector<128xf32> to vector<128x1xf32>
    %c0_55 = arith.constant 0 : index
    %c0_56 = arith.constant 0 : index
    %125 = vector.load %arg13[%c0_55, %c0_56] : memref<128x128xf32, #tpu.memory_space<vmem>>, vector<128x128xf32>
    %cst_57 = arith.constant dense<0.000000e+00> : vector<128x1xf32>
    %126 = tpu.matmul %125, %121, %cst_57 {dimension_numbers = #tpu.dot_dimension_numbers<[1], [0], [0], [1], [0, 0, 1, 1], [], []>} : vector<128x128xf32>, vector<128x1xf32>, vector<128x1xf32> -> vector<128x1xf32>
    %cst_58 = arith.constant 9.765625E-4 : f32
    %127 = vector.broadcast %cst_58 : f32 to vector<128x1xf32>
    %128 = arith.mulf %126, %127 : vector<128x1xf32>
    %c0_59 = arith.constant 0 : index
    %c0_60 = arith.constant 0 : index
    %129 = vector.load %arg13[%c0_59, %c0_60] : memref<128x128xf32, #tpu.memory_space<vmem>>, vector<128x128xf32>
    %cst_61 = arith.constant dense<0.000000e+00> : vector<128x1xf32>
    %130 = tpu.matmul %129, %124, %cst_61 {dimension_numbers = #tpu.dot_dimension_numbers<[1], [0], [0], [1], [0, 0, 1, 1], [], []>} : vector<128x128xf32>, vector<128x1xf32>, vector<128x1xf32> -> vector<128x1xf32>
    %cst_62 = arith.constant 9.765625E-4 : f32
    %131 = vector.broadcast %cst_62 : f32 to vector<128x1xf32>
    %132 = arith.mulf %130, %131 : vector<128x1xf32>
    %133 = arith.mulf %128, %128 : vector<128x1xf32>
    %134 = arith.subf %132, %133 : vector<128x1xf32>
    %135 = vector.broadcast %128 : vector<128x1xf32> to vector<128x128xf32>
    %136 = arith.subf %119, %135 : vector<128x128xf32>
    %cst_63 = arith.constant 9.99999974E-6 : f32
    %137 = vector.broadcast %cst_63 : f32 to vector<128x1xf32>
    %138 = arith.addf %134, %137 : vector<128x1xf32>
    %139 = math.rsqrt %138 : vector<128x1xf32>
    %140 = vector.broadcast %139 : vector<128x1xf32> to vector<128x128xf32>
    %141 = arith.mulf %136, %140 : vector<128x128xf32>
    %cst_64 = arith.constant 0.000000e+00 : f32
    %142 = vector.broadcast %cst_64 : f32 to vector<128x128xf32>
    %143 = arith.maximumf %141, %142 : vector<128x128xf32>
    %c0_65 = arith.constant 0 : index
    %c0_66 = arith.constant 0 : index
    %144 = vector.load %arg15[%c0_65, %c0_66] : memref<128x128xf32, #tpu.memory_space<vmem>>, vector<128x128xf32>
    tpu.vector_store %arg15[%c0_65, %c0_66], %143 {strides = array<i32>} : memref<128x128xf32, #tpu.memory_space<vmem>>, vector<128x128xf32>,
    %c1_i32 = arith.constant 1 : i32
    %145 = arith.cmpi eq, %arg0, %c1_i32 : i32
    %146 = arith.extui %145 : i1 to i32
    %c0_i32_67 = arith.constant 0 : i32
    %147 = arith.cmpi ne, %146, %c0_i32_67 : i32
    scf.if %147 {
      %c0_68 = arith.constant 0 : index
      %c0_69 = arith.constant 0 : index
      %148 = vector.load %arg4[%c0_68, %c0_69] : memref<8x128xbf16, #tpu.memory_space<vmem>>, vector<8x128xbf16>
      %149 = arith.truncf %143 : vector<128x128xf32> to vector<128x128xbf16>
      %cst_70 = arith.constant dense<0.000000e+00> : vector<8x128xf32>
      %150 = tpu.matmul %148, %149, %cst_70 {dimension_numbers = #tpu.dot_dimension_numbers<[1], [0], [0], [1], [0, 0, 1, 1], [], []>} : vector<8x128xbf16>, vector<128x128xbf16>, vector<8x128xf32> -> vector<8x128xf32>
      %c0_71 = arith.constant 0 : index
      %c0_72 = arith.constant 0 : index
      %151 = vector.load %arg5[%c0_71, %c0_72] : memref<8x1xf32, #tpu.memory_space<vmem>>, vector<8x1xf32>
      %152 = vector.broadcast %151 : vector<8x1xf32> to vector<8x128xf32>
      %153 = arith.addf %150, %152 : vector<8x128xf32>
      %c0_73 = arith.constant 0 : index
      %c0_74 = arith.constant 0 : index
      %154 = vector.load %arg14[%c0_73, %c0_74] : memref<8x128xf32, #tpu.memory_space<vmem>>, vector<8x128xf32>
      tpu.vector_store %arg14[%c0_73, %c0_74], %153 {strides = array<i32>} : memref<8x128xf32, #tpu.memory_space<vmem>>, vector<8x128xf32>,
    } else {
    }
    return
  }
  func.func @transform_0(%arg0: i32) -> (i32, i32) {
    %c0_i32 = arith.constant 0 : i32
    %c0_i32_0 = arith.constant 0 : i32
    %c0_i32_1 = arith.constant 0 : i32
    return %c0_i32, %c0_i32_0 : i32, i32
  }
  func.func @transform_1(%arg0: i32) -> (i32, i32) {
    %c0_i32 = arith.constant 0 : i32
    %c0_i32_0 = arith.constant 0 : i32
    %c0_i32_1 = arith.constant 0 : i32
    return %c0_i32, %c0_i32_0 : i32, i32
  }
  func.func @transform_2(%arg0: i32) -> (i32, i32) {
    %c0_i32 = arith.constant 0 : i32
    %c0_i32_0 = arith.constant 0 : i32
    %c0_i32_1 = arith.constant 0 : i32
    return %c0_i32, %c0_i32_0 : i32, i32
  }
  func.func @transform_3(%arg0: i32) -> (i32, i32) {
    %c0_i32 = arith.constant 0 : i32
    %c0_i32_0 = arith.constant 0 : i32
    %c0_i32_1 = arith.constant 0 : i32
    return %c0_i32, %c0_i32_0 : i32, i32
  }
  func.func @transform_4(%arg0: i32) -> (i32, i32) {
    %c0_i32 = arith.constant 0 : i32
    %c0_i32_0 = arith.constant 0 : i32
    %c0_i32_1 = arith.constant 0 : i32
    return %c0_i32, %c0_i32_0 : i32, i32
  }
  func.func @transform_5(%arg0: i32) -> (i32, i32, i32) {
    %c0_i32 = arith.constant 0 : i32
    %c0_i32_0 = arith.constant 0 : i32
    %c0_i32_1 = arith.constant 0 : i32
    return %arg0, %c0_i32, %c0_i32_0 : i32, i32, i32
  }
  func.func @transform_6(%arg0: i32) -> (i32, i32, i32) {
    %c0_i32 = arith.constant 0 : i32
    %c0_i32_0 = arith.constant 0 : i32
    %c0_i32_1 = arith.constant 0 : i32
    return %arg0, %c0_i32, %c0_i32_0 : i32, i32, i32
  }
  func.func @transform_7(%arg0: i32) -> (i32, i32, i32) {
    %c0_i32 = arith.constant 0 : i32
    %c0_i32_0 = arith.constant 0 : i32
    %c0_i32_1 = arith.constant 0 : i32
    return %arg0, %c0_i32, %c0_i32_0 : i32, i32, i32
  }
  func.func @transform_8(%arg0: i32) -> (i32, i32) {
    %c0_i32 = arith.constant 0 : i32
    %c0_i32_0 = arith.constant 0 : i32
    %c0_i32_1 = arith.constant 0 : i32
    return %c0_i32, %c0_i32_0 : i32, i32
  }
  func.func @transform_9(%arg0: i32) -> (i32, i32) {
    %c0_i32 = arith.constant 0 : i32
    %c0_i32_0 = arith.constant 0 : i32
    %c0_i32_1 = arith.constant 0 : i32
    return %c0_i32, %c0_i32_0 : i32, i32
  }
  func.func @transform_10(%arg0: i32) -> (i32, i32) {
    %c0_i32 = arith.constant 0 : i32
    %c0_i32_0 = arith.constant 0 : i32
    %c0_i32_1 = arith.constant 0 : i32
    return %c0_i32, %c0_i32_0 : i32, i32
  }
  func.func @transform_11(%arg0: i32) -> (i32, i32, i32) {
    %c0_i32 = arith.constant 0 : i32
    %c0_i32_0 = arith.constant 0 : i32
    %c0_i32_1 = arith.constant 0 : i32
    %c0_i32_2 = arith.constant 0 : i32
    return %c0_i32, %c0_i32_0, %c0_i32_1 : i32, i32, i32
  }
  func.func @transform_12(%arg0: i32) -> (i32, i32) {
    %c0_i32 = arith.constant 0 : i32
    %c0_i32_0 = arith.constant 0 : i32
    %c0_i32_1 = arith.constant 0 : i32
    return %c0_i32, %c0_i32_0 : i32, i32
  }
  func.func @transform_13(%arg0: i32) -> (i32, i32) {
    %c0_i32 = arith.constant 0 : i32
    %c0_i32_0 = arith.constant 0 : i32
    %c0_i32_1 = arith.constant 0 : i32
    return %c0_i32, %c0_i32_0 : i32, i32
  }
}

</mosaic_0001>

<bundles_post_ra>
// kernel: forward.1
= control target key start
LH: loop header
LB: loop body
LE: loop exit
PB: predicated region body
PF: predicated region fallthrough
CT: control target
= control target key end

     0   :  { %s9208_s0 = inlined_call_operand.vmem [shape: bf16[16,128], index: 0, kind: input, shape index: {}]   ;;  %s9209_s1 = inlined_call_operand.vmem [shape: bf16[128,16], index: 1, kind: input, shape index: {}]   ;;  %s9210_s2 = inlined_call_operand.vmem [shape: f32[128,1], index: 2, kind: input, shape index: {}]   ;;  %s9211_s3 = inlined_call_operand.hbm [shape: bf16[8,128], index: 3, kind: input, shape index: {}]   ;;  %s9212_s4 = inlined_call_operand.vmem [shape: f32[8,1], index: 4, kind: input, shape index: {}]   ;;  %s9213_s5 = inlined_call_operand.hbm [shape: bf16[2,256,2048], index: 5, kind: input, shape index: {}]   ;;  %s9214_s6 = inlined_call_operand.hbm [shape: bf16[2,128,128], index: 6, kind: input, shape index: {}]   ;;  %s9215_s7 = inlined_call_operand.vmem [shape: f32[2,128,1], index: 7, kind: input, shape index: {}]   ;;  %s9216_s8 = inlined_call_operand.hbm [shape: bf16[16,256], index: 8, kind: input, shape index: {}]   ;;  %s9217_s9 = inlined_call_operand.hbm [shape: bf16[128,256], index: 9, kind: input, shape index: {}]   ;;  %s9218_s10 = inlined_call_operand.hbm [shape: bf16[128,128], index: 10, kind: input, shape index: {}]   ;;  %s9219_s11 = inlined_call_operand.hbm [shape: bf16[16,128,128], index: 11, kind: input, shape index: {}]   ;;  %s9220_s12 = inlined_call_operand.hbm [shape: f32[128,128], index: 12, kind: input, shape index: {}]   ;;  %s9221_s13 = inlined_call_operand.vmem [shape: f32[8,128], index: 13, kind: output, shape index: {}]  }
   0x1   :  { %9243 = sst [smem:[#allocation25_spill]] %s9208_s0 }
   0x2   :  { %9244 = sst [smem:[#allocation26_spill]] %s9209_s1 }
   0x3   :  { %9245 = sst [smem:[#allocation27_spill]] %s9210_s2 }
   0x4   :  { %9246 = sst [smem:[#allocation28_spill]] %s9211_s3 }
   0x5   :  { %9247 = sst [smem:[#allocation29_spill]] %s9212_s4 }
   0x6   :  { %9248 = sst [smem:[#allocation30_spill]] %s9213_s5 }
   0x7   :  { %9249 = sst [smem:[#allocation31_spill]] %s9216_s8 }
   0x8   :  { %9250 = sst [smem:[#allocation32_spill]] %s9218_s10 }
   0x9   :  { %9251 = sst [smem:[#allocation33_spill]] %s9221_s13 }
   0xa   :  { %18 = vsyncpa [#allocation4], 0 }
   0xb   :  { %19 = vsyncpa [#allocation6], 0 }
   0xc   :  { %21 = vsyncpa [#allocation6 + $0x1], 0 }
   0xd   :  { %22 = vsyncpa [#allocation9], 0 }
   0xe   :  { %23 = vsyncpa [#allocation12], 0 }
   0xf   :  { %24 = vsyncpa [#allocation15], 0  ;;  %s7910_s25 = smov 0   ;;  %s7912_s26 = smov 0  }
  0x10   :  { %s7914_s27 = smov 0   ;;  %s7916_s28 = smov 0  }
  0x11 LB: > { %9252 = sst [smem:[#allocation21_spill]] %s7816_s27  ;;  %s7822_s29 = smov [#allocation8]   ;;  %s7820_s28 = sphi %s7916_s28, %s9290_s28   ;;  %s7816_s27 = sphi %s7914_s27, %s9292_s27   ;;  %s7812_s26 = sphi %s7912_s26, %s9294_s26   ;;  %s7808_s25 = sphi %s7910_s25, %s9293_s25  }
  0x12   : > { %s379_s30 = sshll.u32 %s7822_s29, 4  ;;  %s7931_s14 = sadd.s32 4294967295, %s7820_s28   ;;  %s7937_s30 = int_to_ptr.vmem [resolvable:$true] %s379_s30 }
  0x13   : > { %p6021_p0 = scmp.ge.s32.totalorder %s7820_s28, 1  ;;  %p9232_p1 = scmp.eq.s32.totalorder %s7931_s14, 0 }
  0x14   : > { %p344_p2 = scmp.lt.s32.totalorder %s7820_s28, 3  ;;  %s7823_s16 = smov [#allocation11]  }
  0x15   : > { %s405_s17 = sshll.u32 %s7823_s16, 4  ;;  %s9255_s8 = sld [smem:[#allocation31_spill]]  ;;  %s7951_s17 = int_to_ptr.vmem [resolvable:$true] %s405_s17 }
  0x16   : > { %p7939_p4 = pnand %p6021_p0, %p344_p2 }
  0x18   : > { %s9253_s15 = scalar_select %p7939_p4, 1, 0 }
  0x19   : > { %p7366_p5 = pneg %p7939_p4 }
  0x1b   : > { %p7947_p6 = pnand %p7366_p5, %p9232_p1  ;;  %s7542_s21 = scalar_lea.hbm %s9255_s8, 256 }
  0x1c   : > { %p7543_p7 = scmp.ne.s32.totalorder %s9255_s8, %s7542_s21  ;;  %p7549_p11 = scmp.lt.u32.totalorder %s7542_s21, %s9255_s8 }
  0x1d   : > { %s9254_s18 = scalar_select %p7947_p6, 1, 0 }
  0x1e   : > { %p7961_p8 = pneg %p7947_p6 }
  0x20   : > { %p7545_p9 = pnand %p7961_p8, %p7543_p7 }
  0x22   : > { %p7546_p10 = pneg %p7545_p9 }
  0x24   : > { %p7551_p12 = pnand %p7549_p11, %p7546_p10 }
  0x26   : > { %7554 = shalt.err (!%p7551_p12)
}
  0x27   : > { %s7555_s19 = scalar_lea.vmem %s7937_s30, 256  ;;  %p7563_p5 = scmp.lt.s32.totalorder %s7937_s30, %s7937_s30 }
  0x28   : > { %p7556_p13 = scmp.ne.s32.totalorder %s7937_s30, %s7555_s19  ;;  %p7564_p3 = scmp.lt.s32.totalorder %s7555_s19, %s7555_s19 }
  0x2a   : > { %p7558_p0 = pnand %p7556_p13, %p7961_p8  ;;  %p7565_p7 = por %p7564_p3, %p7563_p5 }
  0x2c   : > { %p7559_p2 = pneg %p7558_p0 }
  0x2e   : > { %p7566_p9 = pnand %p7565_p7, %p7559_p2 }
  0x30   : > { %7569 = shalt.err (!%p7566_p9)
}
  0x31   : > { %s9226_s20 = smov 128   ;;  %s9228_s21 = smov 8  }
  0x32   : > { %7372 = dma.hbm_to_vmem [thread:$0]  (!%p7947_p6), %s9255_s8, 256, %s7937_s30, [#allocation9], %s9226_s20, %s9226_s20, %s9228_s21  }
  0x33   : > { %s9257_s10 = sld [smem:[#allocation32_spill]] }
  0x39   : > { %s7570_s19 = scalar_lea.hbm %s9257_s10, 1024 }
  0x3a   : > { %p7571_p3 = scmp.ne.s32.totalorder %s9257_s10, %s7570_s19  ;;  %p7577_p12 = scmp.lt.u32.totalorder %s7570_s19, %s9257_s10 }
  0x3c   : > { %p7573_p10 = pnand %p7571_p3, %p7961_p8 }
  0x3e   : > { %p7574_p11 = pneg %p7573_p10 }
  0x40   : > { %p7579_p13 = pnand %p7577_p12, %p7574_p11 }
  0x42   : > { %7582 = shalt.err (!%p7579_p13)
}
  0x43   : > { %s7583_s30 = scalar_lea.vmem %s7951_s17, 1024  ;;  %p7591_p7 = scmp.lt.s32.totalorder %s7951_s17, %s7951_s17 }
  0x44   : > { %p7584_p0 = scmp.ne.s32.totalorder %s7951_s17, %s7583_s30  ;;  %p7592_p9 = scmp.lt.s32.totalorder %s7583_s30, %s7583_s30 }
  0x46   : > { %p7586_p2 = pnand %p7584_p0, %p7961_p8  ;;  %p7593_p3 = por %p7592_p9, %p7591_p7 }
  0x48   : > { %p7587_p5 = pneg %p7586_p2 }
  0x4a   : > { %p7594_p10 = pnand %p7593_p3, %p7587_p5 }
  0x4c   : > { %7597 = shalt.err (!%p7594_p10)
}
  0x4d   : > { %s9230_s4 = smov 64   ;;  %s9224_s1 = smov 4  }
  0x4e   : > { %7378 = dma.hbm_to_vmem [thread:$0]  (!%p7947_p6), %s9257_s10, 1024, %s7951_s17, [#allocation12], %s9230_s4, %s9230_s4, %s9224_s1  }
  0x4f   : > { %s8012_s22 = sadd.s32 1, %s7820_s28   ;;  %s142_s23 = sadd.s32 1, %s7816_s27 }
  0x50   : > { %9258 = sst [smem:[#allocation22_spill]] %s8012_s22  ;;  %s139_s29 = ssub.s32 %s7820_s28, %s8012_s22 }
  0x51   : > { %p149_p11 = scmp.ne.s32.totalorder %s7816_s27, %s7812_s26  ;;  %p140_p12 = scmp.eq.s32.totalorder %s139_s29, 0 }
  0x52   : > { %p150_p13 = scmp.eq.s32.totalorder %s7820_s28, 0  ;;  %p155_p0 = scmp.ne.s32.totalorder %s7812_s26, %s7808_s25 }
  0x53   : > { %p7398_p2 = scmp.lt.s32.totalorder %s7820_s28, 2  ;;  %s445_s30 = sand.u32 1, %s7820_s28  }
  0x54   : > { %s8024_s16 = scalar_select %p140_p12, %s7816_s27, %s142_s23  }
  0x55   : > { %p151_p5 = por %p150_p13, %p149_p11  ;;  %p8028_p7 = por %p9232_p1, %p155_p0 }
  0x56   : > { %9259 = sst [smem:[#allocation23_spill]] %s8024_s16  ;;  %s447_s17 = sand.u32 1, %s7816_s27  }
  0x57   : > { %s9260_s19 = scalar_select %p8028_p7, 1, 0 }
  0x58   : > { %s6029_s2 = sshll.u32 %s447_s17, 11  ;;  %s6365_s13 = sshll.u32 %s7820_s28, 15 }
  0x59   : > { %s9261_s5 = sld [smem:[#allocation30_spill]]  ;;  %s449_s25 = scalar_lea.vmem [#allocation5], %s6029_s2 }
  0x5a   : > { %s456_s23 = sshll.u32 %s449_s25, 4  ;;  %p8042_p9 = pnand %p7398_p2, %p151_p5  ;;  %s8040_s23 = int_to_ptr.vmem [resolvable:$true] %s456_s23 }
  0x5b   : > { %s8046_s4 = sshll.u32 %s447_s17, 6  ;;  %s8048_s8 = scalar_lea.sflag [#allocation6], %s445_s30 }
  0x5c   : > { %s9262_s29 = scalar_select %p8042_p9, 1, 0 }
  0x5d   : > { %p9240_p10 = pneg %p8042_p9 }
  0x5f   : > { %s8038_s21 = scalar_lea.hbm %s9261_s5, %s6365_s13  ;;  %s7603_s13 = scalar_lea.hbm %s9261_s5, 65536 }
  0x60   : > { %s7598_s20 = scalar_lea.hbm %s8038_s21, 32768  ;;  %p7604_p13 = scmp.lt.u32.totalorder %s8038_s21, %s9261_s5 }
  0x61   : > { %p7599_p3 = scmp.ne.s32.totalorder %s8038_s21, %s7598_s20  ;;  %p7605_p0 = scmp.lt.u32.totalorder %s7603_s13, %s7598_s20 }
  0x62   : > { %p7607_p5 = scmp.lt.u32.totalorder %s7598_s20, %s8038_s21 }
  0x63   : > { %p7601_p11 = pnand %p9240_p10, %p7599_p3  ;;  %p7606_p2 = por %p7605_p0, %p7604_p13 }
  0x65   : > { %p7602_p12 = pneg %p7601_p11  ;;  %p7608_p1 = por %p7607_p5, %p7606_p2 }
  0x67   : > { %p7609_p7 = pnand %p7608_p1, %p7602_p12 }
  0x69   : > { %7612 = shalt.err (!%p7609_p7)
}
  0x6a   : > { %s7613_s30 = scalar_lea.vmem %s8040_s23, 32768  ;;  %s7828_s17 = smov [#allocation5]  }
  0x6b   : > { %p7614_p3 = scmp.ne.s32.totalorder %s8040_s23, %s7613_s30  ;;  %s7618_s1 = sshll.u32 %s7828_s17, 4  ;;  %s7619_s1 = int_to_ptr.vmem [resolvable:$false] %s7618_s1 }
  0x6c   : > { %s7620_s10 = scalar_lea.vmem %s7619_s1, 65536  ;;  %p7621_p6 = scmp.lt.s32.totalorder %s8040_s23, %s7619_s1 }
  0x6d   : > { %p7616_p11 = pnand %p7614_p3, %p9240_p10  ;;  %p7622_p13 = scmp.lt.s32.totalorder %s7620_s10, %s7613_s30 }
  0x6f   : > { %p7617_p4 = pneg %p7616_p11  ;;  %p7623_p0 = por %p7622_p13, %p7621_p6 }
  0x71   : > { %p7624_p2 = pnand %p7623_p0, %p7617_p4 }
  0x73   : > { %7627 = shalt.err (!%p7624_p2)
}
  0x74   : > { %s7829_s20 = smov 1024   ;;  %s9263_s2 = smov 64  }
  0x75   : > { %7388 = dma.hbm_to_vmem [thread:$0]  (!%p8042_p9), %s8038_s21, 32768, %s8040_s23, %s8048_s8, %s7829_s20, %s7829_s20, %s9263_s2  }
  0x76   : > { %s470_s13 = scalar_lea.vmem [#allocation7], %s8046_s4  ;;  %s7830_s17 = smov [#allocation3]  }
  0x77   : > { %s8078_s25 = sshll.u32 %s470_s13, 4  ;;  %s366_s5 = sshll.u32 %s7830_s17, 4  ;;  %s367_s5 = int_to_ptr.vmem [resolvable:$true] %s366_s5  ;;  %s8168_s25 = int_to_ptr.vmem [resolvable:$true] %s8078_s25 }
  0x78   : > { %s7831_s30 = smov [#allocation10]   ;;  %s9264_s3 = sld [smem:[#allocation28_spill]] }
  0x79   : > { %s392_s1 = sshll.u32 %s7831_s30, 4  ;;  %s393_s1 = int_to_ptr.vmem [resolvable:$true] %s392_s1 }
  0x7e   : > { %s7628_s27 = scalar_lea.hbm %s9264_s3, 64 }
  0x7f   : > { %p7629_p1 = scmp.ne.s32.totalorder %s9264_s3, %s7628_s27  ;;  %p7635_p7 = scmp.lt.u32.totalorder %s7628_s27, %s9264_s3 }
  0x81   : > { %p7631_p4 = pnand %p7629_p1, %p7961_p8 }
  0x83   : > { %p7632_p6 = pneg %p7631_p4 }
  0x85   : > { %p7637_p12 = pnand %p7635_p7, %p7632_p6 }
  0x87   : > { %7640 = shalt.err (!%p7637_p12)
}
  0x88   : > { %s7641_s23 = scalar_lea.vmem %s367_s5, 64  ;;  %p7649_p13 = scmp.lt.s32.totalorder %s367_s5, %s367_s5 }
  0x89   : > { %p7642_p5 = scmp.ne.s32.totalorder %s367_s5, %s7641_s23  ;;  %p7650_p0 = scmp.lt.s32.totalorder %s7641_s23, %s7641_s23 }
  0x8b   : > { %p7644_p3 = pnand %p7642_p5, %p7961_p8  ;;  %p7651_p2 = por %p7650_p0, %p7649_p13 }
  0x8d   : > { %p7645_p11 = pneg %p7644_p3 }
  0x8f   : > { %p7652_p10 = pnand %p7651_p2, %p7645_p11 }
  0x91   : > { %7655 = shalt.err (!%p7652_p10)
}
  0x92   : > { %p9265_p1 = scmp.ne.s32.totalorder %s9254_s18, 0  ;;  %s7656_s20 = scalar_lea.hbm %s9217_s9, 2048 }
  0x93   : > { %p7657_p4 = scmp.ne.s32.totalorder %s9217_s9, %s7656_s20  ;;  %p7663_p10 = scmp.lt.u32.totalorder %s7656_s20, %s9217_s9 }
  0x94   : > { %7369 = dma.hbm_to_vmem [thread:$0]  (!%p9265_p1), %s9264_s3, 64, %s367_s5, [#allocation4]  }
  0x95   : > { %p7659_p6 = pnand %p7657_p4, %p7961_p8 }
  0x97   : > { %p7660_p7 = pneg %p7659_p6 }
  0x99   : > { %p7665_p12 = pnand %p7663_p10, %p7660_p7 }
  0x9b   : > { %7668 = shalt.err (!%p7665_p12)
}
  0x9c   : > { %s7669_s21 = scalar_lea.vmem %s393_s1, 2048  ;;  %p7677_p13 = scmp.lt.s32.totalorder %s393_s1, %s393_s1 }
  0x9d   : > { %p7670_p5 = scmp.ne.s32.totalorder %s393_s1, %s7669_s21  ;;  %p7678_p0 = scmp.lt.s32.totalorder %s7669_s21, %s7669_s21 }
  0x9f   : > { %p7672_p3 = pnand %p7670_p5, %p7961_p8  ;;  %p7679_p2 = por %p7678_p0, %p7677_p13 }
  0xa1   : > { %p7673_p11 = pneg %p7672_p3 }
  0xa3   : > { %p7680_p9 = pnand %p7679_p2, %p7673_p11 }
  0xa5   : > { %7683 = shalt.err (!%p7680_p9)
}
  0xa6   : > { %s9266_s5 = smov 8   ;;  %s9267_s4 = smov 128  }
  0xa7   : > { %7375 = dma.hbm_to_vmem [thread:$0]  (!%p9265_p1), %s9217_s9, 2048, %s393_s1, [#allocation9], %s9267_s4, %s9267_s4, %s9266_s5  }
  0xa8   : > { %s7832_s22 = smov [#allocation13]   ;;  %s7833_s16 = smov [#allocation14]  }
  0xa9   : > { %s418_s27 = sshll.u32 %s7832_s22, 4  ;;  %s431_s20 = sshll.u32 %s7833_s16, 4  ;;  %s419_s27 = int_to_ptr.vmem [resolvable:$true] %s418_s27  ;;  %s432_s20 = int_to_ptr.vmem [resolvable:$true] %s431_s20 }
  0xaa   : > { %s7684_s30 = scalar_lea.hbm %s9219_s11, 16384 }
  0xab   : > { %p7685_p9 = scmp.ne.s32.totalorder %s9219_s11, %s7684_s30  ;;  %p7691_p7 = scmp.lt.u32.totalorder %s7684_s30, %s9219_s11 }
  0xad   : > { %p7687_p4 = pnand %p7685_p9, %p7961_p8 }
  0xaf   : > { %p7688_p6 = pneg %p7687_p4 }
  0xb1   : > { %p7693_p10 = pnand %p7691_p7, %p7688_p6 }
  0xb3   : > { %7696 = shalt.err (!%p7693_p10)
}
  0xb4   : > { %s7697_s1 = scalar_lea.vmem %s419_s27, 16384  ;;  %p7705_p11 = scmp.lt.s32.totalorder %s419_s27, %s419_s27 }
  0xb5   : > { %p7698_p12 = scmp.ne.s32.totalorder %s419_s27, %s7697_s1  ;;  %p7706_p13 = scmp.lt.s32.totalorder %s7697_s1, %s7697_s1 }
  0xb7   : > { %p7700_p5 = pnand %p7698_p12, %p7961_p8  ;;  %p7707_p0 = por %p7706_p13, %p7705_p11 }
  0xb9   : > { %p7701_p3 = pneg %p7700_p5 }
  0xbb   : > { %p7708_p2 = pnand %p7707_p0, %p7701_p3 }
  0xbd   : > { %7711 = shalt.err (!%p7708_p2)
}
  0xbe   : > { %s9268_s0 = smov 4   ;;  %s6366_s16 = sshll.u32 %s7820_s28, 10 }
  0xbf   : > { %7381 = dma.hbm_to_vmem [thread:$0]  (!%p9265_p1), %s9219_s11, 16384, %s419_s27, [#allocation12], %s9263_s2, %s9263_s2, %s9268_s0  }
  0xc0   : > { %s7712_s30 = scalar_lea.hbm %s9220_s12, 2048 }
  0xc1   : > { %p7713_p9 = scmp.ne.s32.totalorder %s9220_s12, %s7712_s30  ;;  %p7719_p7 = scmp.lt.u32.totalorder %s7712_s30, %s9220_s12 }
  0xc3   : > { %p7715_p4 = pnand %p7713_p9, %p7961_p8 }
  0xc5   : > { %p7716_p6 = pneg %p7715_p4 }
  0xc7   : > { %p7721_p10 = pnand %p7719_p7, %p7716_p6 }
  0xc9   : > { %7724 = shalt.err (!%p7721_p10)
}
  0xca   : > { %s7725_s27 = scalar_lea.vmem %s432_s20, 2048  ;;  %p7733_p11 = scmp.lt.s32.totalorder %s432_s20, %s432_s20 }
  0xcb   : > { %p7726_p12 = scmp.ne.s32.totalorder %s432_s20, %s7725_s27  ;;  %p7734_p13 = scmp.lt.s32.totalorder %s7725_s27, %s7725_s27 }
  0xcd   : > { %p7728_p5 = pnand %p7726_p12, %p7961_p8  ;;  %p7735_p0 = por %p7734_p13, %p7733_p11 }
  0xcf   : > { %p7729_p3 = pneg %p7728_p5 }
  0xd1   : > { %p7736_p2 = pnand %p7735_p0, %p7729_p3 }
  0xd3   : > { %7739 = shalt.err (!%p7736_p2)
}
  0xd4   : > { %7384 = dma.hbm_to_vmem [thread:$0]  (!%p9265_p1), %s9220_s12, 2048, %s432_s20, [#allocation15], %s9267_s4, %s9267_s4, %s9266_s5  }
  0xd5   : > { %s8165_s13 = scalar_lea.hbm %s9214_s6, %s6366_s16  ;;  %p9269_p9 = scmp.ne.s32.totalorder %s9262_s29, 0 }
  0xd6   : > { %s7740_s18 = scalar_lea.hbm %s8165_s13, 1024  ;;  %s7745_s5 = scalar_lea.hbm %s9214_s6, 2048 }
  0xd7   : > { %p7741_p8 = scmp.ne.s32.totalorder %s8165_s13, %s7740_s18  ;;  %p9270_p4 = pneg %p9269_p9 }
  0xd8   : > { %p7746_p1 = scmp.lt.u32.totalorder %s8165_s13, %s9214_s6  ;;  %p7747_p10 = scmp.lt.u32.totalorder %s7745_s5, %s7740_s18 }
  0xd9   : > { %p7743_p6 = pnand %p7741_p8, %p9270_p4  ;;  %p7749_p5 = scmp.lt.u32.totalorder %s7740_s18, %s8165_s13 }
  0xda   : > { %p7748_p12 = por %p7747_p10, %p7746_p1 }
  0xdb   : > { %p7744_p7 = pneg %p7743_p6 }
  0xdc   : > { %p7750_p3 = por %p7749_p5, %p7748_p12 }
  0xde   : > { %p7751_p11 = pnand %p7750_p3, %p7744_p7 }
  0xe0   : > { %7754 = shalt.err (!%p7751_p11)
}
  0xe1   : > { %s7755_s16 = scalar_lea.vmem %s8168_s25, 1024  ;;  %p9271_p0 = pmov %p9270_p4 }
  0xe2   : > { %p7756_p13 = scmp.ne.s32.totalorder %s8168_s25, %s7755_s16  ;;  %s7834_s10 = smov [#allocation7]  }
  0xe3   : > { %s7760_s21 = sshll.u32 %s7834_s10, 4  ;;  %s7761_s21 = int_to_ptr.vmem [resolvable:$false] %s7760_s21 }
  0xe4   : > { %p7758_p2 = pnand %p7756_p13, %p9271_p0  ;;  %s7762_s23 = scalar_lea.vmem %s7761_s21, 2048 }
  0xe5   : > { %p7763_p4 = scmp.lt.s32.totalorder %s8168_s25, %s7761_s21  ;;  %p7764_p6 = scmp.lt.s32.totalorder %s7762_s23, %s7755_s16 }
  0xe6   : > { %p7759_p8 = pneg %p7758_p2 }
  0xe7   : > { %p7765_p1 = por %p7764_p6, %p7763_p4 }
  0xe9   : > { %p7766_p10 = pnand %p7765_p1, %p7759_p8 }
  0xeb   : > { %7769 = shalt.err (!%p7766_p10)
}
  0xec   : > { %7391 = dma.hbm_to_vmem [thread:$0]  (!%p9269_p9), %s8165_s13, 1024, %s8168_s25, %s8048_s8, %s9263_s2, %s9263_s2, %s9268_s0  }
  0xed   : > { %p9272_p7 = scmp.ne.s32.totalorder %s9253_s15, 0 }
  0xef   : > { %497 = sbr.rel (%p9272_p7) target bundleno = 2271 (0x8df), region = 72 }
  0xf6   : > { %p9273_p12 = scmp.eq.s32.totalorder %s7931_s14, 0 }
  0xf8   : > { %7787 = dma.done.wait (%p9273_p12), [#allocation4], 64   ;;  %p9274_p5 = pmov %p9273_p12 }
  0xf9   : > { %s503_s29 = sand.u32 1, %s7931_s14   ;;  %s505_s1 = sand.u32 1, %s7812_s26  }
  0xfa   : > { %7789 = vsyncadd (%p9274_p5), [#allocation4], 4294967232  ;;  %s6037_s27 = sshll.u32 %s505_s1, 11  ;;  %s504_s28 = scalar_lea.sflag [#allocation6], %s503_s29 }
  0xfb   : > { %s8205_s3 = scalar_lea.vmem [#allocation5], %s6037_s27  ;;  %p9275_p3 = scmp.ne.s32.totalorder %s9260_s19, 0 }
  0xfd   : > { %7791 = dma.done.wait (%p9275_p3), %s504_s28, 33792  }
  0xfe   : > { %7793 = vsyncadd (%p9275_p3), %s504_s28, 4294933504  ;;  %s6038_s8 = sshll.u32 %s505_s1, 6  ;;  %p9276_p9 = pmov %p9274_p5 }
  0xff   : > { %s8211_s15 = scalar_lea.vmem [#allocation7], %s6038_s8 }
 0x100   : > { %7795 = dma.done.wait (%p9276_p9), [#allocation9], 2304   ;;  %p9277_p11 = pmov %p9274_p5 }
 0x101   : > { %p9278_p13 = pmov %p9274_p5 }
 0x102   : > { %7797 = vsyncadd (%p9277_p11), [#allocation9], 4294964992 }
 0x103   : > { %7799 = dma.done.wait (%p9278_p13), [#allocation12], 17408   ;;  %p9279_p0 = pmov %p9274_p5 }
 0x105   : > { %7801 = vsyncadd (%p9279_p0), [#allocation12], 4294949888  ;;  %p9280_p2 = pmov %p9279_p0 }
 0x106   : > { %p9281_p8 = pmov %p9279_p0 }
 0x107   : > { %7803 = dma.done.wait (%p9280_p2), [#allocation15], 2048  }
 0x108   : > { %7805 = vsyncadd (%p9281_p8), [#allocation15], 4294965248  ;;  %p584_p4 = scmp.lt.s32.totalorder %s7931_s14, 1  ;;  %p9282_p6 = scmp.ne.s32.totalorder %s7931_s14, 0 }
 0x109   : > { %s9283_s18 = sld [smem:[#allocation25_spill]] (!%p9282_p6)  ;;  %s9284_s5 = sld [smem:[#allocation26_spill]] (!%p9282_p6)  ;;  %vm754_vm0 = vcmask (!%p9282_p6), 130048   ;;  %v7835_v6 = vmov (!%p9282_p6), 0  }
 0x10a   : > { %s585_s19 = scalar_select %p584_p4, %s7931_s14, 1 }
 0x10b   : > { %593 = sbr.rel (%p9282_p6) target bundleno = 502 (0x1f6), region = 108  ;;  %7454 = vset.pattern.permute.xlu1 (!%p9282_p6), %v7835_v6  ;;  %7453 = vset.pattern.permute.xlu0 (!%p9282_p6), %v7835_v6 }
 0x10c   : > { %s6367_s2 = sshll.u32 %s585_s19, 7 }
 0x10d   : > { %s8230_s22 = scalar_lea.vmem %s9215_s7, %s6367_s2  ;;  %s9285_s2 = sld [smem:[#allocation27_spill]] (!%p9282_p6) }
 0x10f   : > { %v7455_v0 = vld [vmem:[%s9283_s18] sm:$0xff] (!%p9282_p6)   ;;  %v7458_v3 = vld [vmem:[%s9284_s5 + $0x8] sm:$0xff] (!%p9282_p6)   ;;  %v7460_v5 = vld [vmem:[%s9284_s5 + $0x10] sm:$0xff] (!%p9282_p6)  }
 0x110   : > { %v7456_v1 = vld [vmem:[%s9284_s5] sm:$0xff] (!%p9282_p6)   ;;  %7090 = vmatprep.subr.bf16.mxu0 (!%p9282_p6), %v7455_v0  ;;  %7336 = vmatprep.subr.bf16.mxu1 (!%p9282_p6), %v7455_v0  ;;  %v7459_v4 = vld [vmem:[%s9284_s5 + $0x28] sm:$0xff] (!%p9282_p6)   ;;  %v7461_v7 = vld [vmem:[%s9284_s5 + $0x30] sm:$0xff] (!%p9282_p6)  }
 0x111   : > { %v7457_v2 = vld [vmem:[%s9284_s5 + $0x20] sm:$0xff] (!%p9282_p6)   ;;  %7091 = vmatpush3.bf16.msra.mxu0 (!%p9282_p6), %v7455_v0  ;;  %7337 = vmatpush3.bf16.msra.mxu1 (!%p9282_p6), %v7455_v0  ;;  %v7462_v10 = vld [vmem:[%s9284_s5 + $0x18] sm:$0xff] (!%p9282_p6)  }
 0x112   : > { %7092 = vmatprep.mubr.msk.bf16.mxu0 %vm754_vm0, %v7456_v1  ;;  %7100 = vmatprep.mubr.msk.bf16.mxu1 %vm754_vm0, %v7457_v2  ;;  %v7463_v11 = vld [vmem:[%s9284_s5 + $0x38] sm:$0xff]  }
 0x113   : > { %v614_v8 = vld [vmem:[%s9285_s2 + $0x10] sm:$0xff]  ;;  %v612_v9 = vld [vmem:[%s9285_s2] sm:$0xff]  ;;  %v615_v12 = vld [vmem:[%s9285_s2 + $0x18] sm:$0xff] }
 0x114   : > { %7093 = vmatmul.mubr.msk.bf16.vlgmr.msra.gmra.mrb[0].mxu0 %vm754_vm0, %v7458_v3  ;;  %7101 = vmatmul.mubr.msk.bf16.vlgmr.msra.gmra.mrb[0].mxu1 %vm754_vm0, %v7459_v4  ;;  %v613_v13 = vld [vmem:[%s9285_s2 + $0x8] sm:$0xff]  ;;  %v616_v15 = vld [vmem:[%s9285_s2 + $0x20] sm:$0xff]  ;;  %v619_v16 = vld [vmem:[%s9285_s2 + $0x38] sm:$0xff] }
 0x115   : > { %7096 = vmatprep.mubr.msk.bf16.mxu0 %vm754_vm0, %v7460_v5  ;;  %7104 = vmatprep.mubr.msk.bf16.mxu1 %vm754_vm0, %v7461_v7  ;;  %v617_v14 = vld [vmem:[%s9285_s2 + $0x28] sm:$0xff]  ;;  %v618_v17 = vld [vmem:[%s9285_s2 + $0x30] sm:$0xff]  ;;  %v620_v19 = vld [vmem:[%s9285_s2 + $0x40] sm:$0xff] }
 0x116   : > { %640 = vperm.xlu1 %7454, %v614_v8   ;;  %630 = vperm.xlu0 %7453, %v612_v9   ;;  %v621_v18 = vld [vmem:[%s9285_s2 + $0x48] sm:$0xff]  ;;  %v623_v20 = vld [vmem:[%s9285_s2 + $0x58] sm:$0xff]  ;;  %v622_v21 = vld [vmem:[%s9285_s2 + $0x50] sm:$0xff] }
 0x117   : > { %v625_v22 = vld [vmem:[%s9285_s2 + $0x68] sm:$0xff]  ;;  %v624_v23 = vld [vmem:[%s9285_s2 + $0x60] sm:$0xff]  ;;  %v627_v24 = vld [vmem:[%s9285_s2 + $0x78] sm:$0xff] }
 0x118   : > { %v626_v25 = vld [vmem:[%s9285_s2 + $0x70] sm:$0xff] }
 0x11a   : > { %645 = vperm.xlu1 %7454, %v615_v12   ;;  %635 = vperm.xlu0 %7453, %v613_v13  }
 0x11c   : > { %7097 = vmatmul.mubr.msk.bf16.gmra.mrb[4].mxu0 %vm754_vm0, %v7462_v10  ;;  %7105 = vmatmul.mubr.msk.bf16.gmra.mrb[4].mxu1 %vm754_vm0, %v7463_v11 }
 0x11e   : > { %655 = vperm.xlu1 %7454, %v617_v14   ;;  %650 = vperm.xlu0 %7453, %v616_v15  }
 0x122   : > { %665 = vperm.xlu1 %7454, %v619_v16   ;;  %660 = vperm.xlu0 %7453, %v618_v17  }
 0x126   : > { %675 = vperm.xlu1 %7454, %v621_v18   ;;  %670 = vperm.xlu0 %7453, %v620_v19  }
 0x12a   : > { %685 = vperm.xlu1 %7454, %v623_v20   ;;  %680 = vperm.xlu0 %7453, %v622_v21  }
 0x12e   : > { %695 = vperm.xlu1 %7454, %v625_v22   ;;  %690 = vperm.xlu0 %7453, %v624_v23  }
 0x132   : > { %705 = vperm.xlu1 %7454, %v627_v24   ;;  %700 = vperm.xlu0 %7453, %v626_v25  }
 0x195   : > { %v641_v26 = vpop.permute.xlu1 %640  ;;  %v631_v27 = vpop.permute.xlu0 %630 }
 0x199   : > { %v646_v28 = vpop.permute.xlu1 %645  ;;  %v636_v29 = vpop.permute.xlu0 %635 }
 0x19d   : > { %v656_v30 = vpop.permute.xlu1 %655  ;;  %v651_v31 = vpop.permute.xlu0 %650 }
 0x1a1   : > { %v666_v32 = vpop.permute.xlu1 %665  ;;  %v661_v33 = vpop.permute.xlu0 %660 }
 0x1a5   : > { %v676_v34 = vpop.permute.xlu1 %675  ;;  %v671_v35 = vpop.permute.xlu0 %670 }
 0x1a9   : > { %v686_v36 = vpop.permute.xlu1 %685  ;;  %v681_v37 = vpop.permute.xlu0 %680 }
 0x1ad   : > { %v696_v38 = vpop.permute.xlu1 %695  ;;  %v691_v39 = vpop.permute.xlu0 %690 }
 0x1b1   : > { %v706_v56 = vpop.permute.xlu1 %705  ;;  %v701_v57 = vpop.permute.xlu0 %700 }
 0x1e7   : > { %v7094_v40 = vpop.f32.mrb[0].mxu0  ;;  %v7102_v41 = vpop.f32.mrb[0].mxu1 }
 0x1e8   : > { %v822_v42 = vadd.f32 %v7094_v40, %v641_v26  ;;  %v854_v43 = vadd.f32 %v7102_v41, %v681_v37  ;;  %v813_v44 = vpop.f32.mrb[1].mxu0  ;;  %v845_v45 = vpop.f32.mrb[1].mxu1 }
 0x1e9   : > { %v814_v46 = vadd.f32 %v813_v44, %v631_v27  ;;  %v846_v47 = vadd.f32 %v845_v45, %v671_v35  ;;  %v7095_v48 = vpop.f32.mrb[2].mxu0  ;;  %v7103_v49 = vpop.f32.mrb[2].mxu1 }
 0x1ea   : > { %878 = vst [vmem:[#allocation2 + $0x10] sm:$0xff] %v822_v42  ;;  %886 = vst [vmem:[#allocation2 + $0x50] sm:$0xff] %v854_v43  ;;  %v825_v50 = vadd.f32 %v7095_v48, %v646_v28  ;;  %v857_v51 = vadd.f32 %v7103_v49, %v686_v36  ;;  %v816_v52 = vpop.f32.mrb[3].mxu0  ;;  %v848_v53 = vpop.f32.mrb[3].mxu1 }
 0x1eb   : > { %876 = vst [vmem:[#allocation2] sm:$0xff] %v814_v46  ;;  %884 = vst [vmem:[#allocation2 + $0x40] sm:$0xff] %v846_v47  ;;  %v817_v54 = vadd.f32 %v816_v52, %v636_v29  ;;  %v849_v55 = vadd.f32 %v848_v53, %v676_v34 }
 0x1ec   : > { %879 = vst [vmem:[#allocation2 + $0x18] sm:$0xff] %v825_v50  ;;  %887 = vst [vmem:[#allocation2 + $0x58] sm:$0xff] %v857_v51 }
 0x1ed   : > { %877 = vst [vmem:[#allocation2 + $0x8] sm:$0xff] %v817_v54  ;;  %885 = vst [vmem:[#allocation2 + $0x48] sm:$0xff] %v849_v55 }
 0x1ef   : > { %v7098_v58 = vpop.f32.mrb[4].mxu0  ;;  %v7106_v59 = vpop.f32.mrb[4].mxu1 }
 0x1f0   : > { %v838_v60 = vadd.f32 %v7098_v58, %v661_v33  ;;  %v870_v61 = vadd.f32 %v7106_v59, %v701_v57  ;;  %v829_v62 = vpop.f32.mrb[5].mxu0  ;;  %v861_v63 = vpop.f32.mrb[5].mxu1 }
 0x1f1   : > { %v830_v0 = vadd.f32 %v829_v62, %v651_v31  ;;  %v862_v1 = vadd.f32 %v861_v63, %v691_v39  ;;  %v7099_v2 = vpop.f32.mrb[6].mxu0  ;;  %v7107_v3 = vpop.f32.mrb[6].mxu1 }
 0x1f2   : > { %882 = vst [vmem:[#allocation2 + $0x30] sm:$0xff] %v838_v60  ;;  %890 = vst [vmem:[#allocation2 + $0x70] sm:$0xff] %v870_v61  ;;  %v841_v4 = vadd.f32 %v7099_v2, %v666_v32  ;;  %v873_v5 = vadd.f32 %v7107_v3, %v706_v56  ;;  %v832_v6 = vpop.f32.mrb[7].mxu0  ;;  %v864_v7 = vpop.f32.mrb[7].mxu1 }
 0x1f3   : > { %880 = vst [vmem:[#allocation2 + $0x20] sm:$0xff] %v830_v0  ;;  %888 = vst [vmem:[#allocation2 + $0x60] sm:$0xff] %v862_v1  ;;  %v833_v8 = vadd.f32 %v832_v6, %v656_v30  ;;  %v865_v9 = vadd.f32 %v864_v7, %v696_v38 }
 0x1f4   : > { %883 = vst [vmem:[#allocation2 + $0x38] sm:$0xff] %v841_v4  ;;  %891 = vst [vmem:[#allocation2 + $0x78] sm:$0xff] %v873_v5 }
 0x1f5   : > { %881 = vst [vmem:[#allocation2 + $0x28] sm:$0xff] %v833_v8  ;;  %889 = vst [vmem:[#allocation2 + $0x68] sm:$0xff] %v865_v9 }
 0x1f6 PF: > { %v7466_v10 = vld [vmem:[#allocation8 + $0x4] ss:$8 sps:$4 sm:$0xff]   ;;  %v7468_v11 = vld [vmem:[#allocation8] ss:$8 sps:$4 sm:$0xff]   ;;  %v7836_v12 = vmov 0   ;;  %v895_v17 = vld [vmem:[#allocation2 + $0x18] sm:$0xff] }
 0x1f7   : > { %1242 = vmatprep.mubr.bf16.mxu1 %v7836_v12  ;;  %v892_v13 = vld [vmem:[#allocation2] sm:$0xff]  ;;  %v893_v14 = vld [vmem:[#allocation2 + $0x8] sm:$0xff]  ;;  %7465 = vset.pattern.permute.xlu1 %v7836_v12  ;;  %v894_v16 = vld [vmem:[#allocation2 + $0x10] sm:$0xff]  ;;  %vm1185_vm1 = vcmask 130048   ;;  %p6362_p1 = scmp.ne.s32.totalorder %s7931_s14, 1 }
 0x1f8   : > { %1210 = vmatprep.subr.bf16.mxu1 %v7466_v10  ;;  %v908_v15 = vpack.c.bf16 %v893_v14, %v892_v13  ;;  %7464 = vset.pattern.permute.xlu0 %v7836_v12  ;;  %v909_v18 = vpack.c.bf16 %v895_v17, %v894_v16  ;;  %v900_v24 = vld [vmem:[#allocation2 + $0x40] sm:$0xff]  ;;  %v901_v25 = vld [vmem:[#allocation2 + $0x48] sm:$0xff]  ;;  %v902_v27 = vld [vmem:[#allocation2 + $0x50] sm:$0xff]  ;;  %vm7838_vm2 = vmmov (!%p6362_p1), 0   ;;  %s9289_s28 = sld [smem:[#allocation33_spill]] (!%p6362_p1) }
 0x1f9   : > { %1211 = vmatpush1.bf16.msra.mxu1 %v7468_v11  ;;  %v898_v21 = vld [vmem:[#allocation2 + $0x30] sm:$0xff]  ;;  %v903_v28 = vld [vmem:[#allocation2 + $0x58] sm:$0xff]  ;;  %v912_v29 = vpack.c.bf16 %v901_v25, %v900_v24  ;;  %v7472_v37 = vld [vmem:[%s8211_s15] sm:$0xff]  }
 0x1fa   : > { %7108 = vmatprep.subr.bf16.mxu0 %v908_v15  ;;  %v896_v19 = vld [vmem:[#allocation2 + $0x20] sm:$0xff]  ;;  %v913_v32 = vpack.c.bf16 %v903_v28, %v902_v27  ;;  %v906_v34 = vld [vmem:[#allocation2 + $0x70] sm:$0xff]  ;;  %7124 = vmatprep.mubr.bf16.mxu0 %v7472_v37  ;;  %v935_v47 = vld [vmem:[%s8230_s22 + $0x18] sm:$0xff] }
 0x1fb   : > { %7109 = vmatpush3.bf16.msra.mxu0 %v908_v15  ;;  %v899_v22 = vld [vmem:[#allocation2 + $0x38] sm:$0xff]  ;;  %v904_v30 = vld [vmem:[#allocation2 + $0x60] sm:$0xff]  ;;  %v7473_v38 = vld [vmem:[%s8211_s15 + $0x8] sm:$0xff]  }
 0x1fc   : > { %v897_v20 = vld [vmem:[#allocation2 + $0x28] sm:$0xff]  ;;  %6074 = vmatmul.mubr.msk.bf16.vlgmr.msra.gmra.mrb[0].mxu1 %vm1185_vm1, %v908_v15  ;;  %7110 = vmatprep.subr.bf16.mxu0 %v909_v18  ;;  %v911_v26 = vpack.c.bf16 %v899_v22, %v898_v21  ;;  %v907_v35 = vld [vmem:[#allocation2 + $0x78] sm:$0xff]  ;;  %v934_v45 = vld [vmem:[%s8230_s22 + $0x10] sm:$0xff] }
 0x1fd   : > { %1252 = vmatprep.mubr.bf16.mxu1 %v7836_v12  ;;  %v910_v23 = vpack.c.bf16 %v897_v20, %v896_v19  ;;  %v905_v31 = vld [vmem:[#allocation2 + $0x68] sm:$0xff]  ;;  %v915_v36 = vpack.c.bf16 %v907_v35, %v906_v34  ;;  %v7486_v39 = vld [vmem:[%s8211_s15 + $0x10] sm:$0xff]   ;;  %v7487_v40 = vld [vmem:[%s8211_s15 + $0x18] sm:$0xff]   ;;  %960 = vperm.xlu1 %7465, %v934_v45  }
 0x1fe   : > { %v914_v33 = vpack.c.bf16 %v905_v31, %v904_v30  ;;  %v7491_v41 = vld [vmem:[%s8211_s15 + $0x20] sm:$0xff]   ;;  %v7492_v42 = vld [vmem:[%s8211_s15 + $0x28] sm:$0xff]   ;;  %v7496_v43 = vld [vmem:[%s8211_s15 + $0x30] sm:$0xff]  }
 0x1ff   : > { %7111 = vmatpush3.bf16.msra.mxu0 %v909_v18  ;;  %v7497_v44 = vld [vmem:[%s8211_s15 + $0x38] sm:$0xff]   ;;  %v933_v48 = vld [vmem:[%s8230_s22 + $0x8] sm:$0xff]  ;;  %v938_v52 = vld [vmem:[%s8230_s22 + $0x30] sm:$0xff] }
 0x200   : > { %7112 = vmatprep.subr.bf16.mxu0 %v910_v23  ;;  %v932_v46 = vld [vmem:[%s8230_s22] sm:$0xff]  ;;  %v937_v49 = vld [vmem:[%s8230_s22 + $0x28] sm:$0xff]  ;;  %v939_v51 = vld [vmem:[%s8230_s22 + $0x38] sm:$0xff] }
 0x201   : > { %950 = vperm.xlu0 %7464, %v932_v46   ;;  %965 = vperm.xlu1 %7465, %v935_v47   ;;  %v936_v50 = vld [vmem:[%s8230_s22 + $0x20] sm:$0xff]  ;;  %v941_v53 = vld [vmem:[%s8230_s22 + $0x48] sm:$0xff]  ;;  %v943_v63 = vld [vmem:[%s8230_s22 + $0x58] sm:$0xff] }
 0x202   : > { %v940_v54 = vld [vmem:[%s8230_s22 + $0x40] sm:$0xff]  ;;  %v942_v2 = vld [vmem:[%s8230_s22 + $0x50] sm:$0xff]  ;;  %v945_v16 = vld [vmem:[%s8230_s22 + $0x68] sm:$0xff] }
 0x203   : > { %7113 = vmatpush3.bf16.msra.mxu0 %v910_v23  ;;  %v1644_v55 = vld [vmem:[%s8205_s3] sm:$0xff]  ;;  %v7471_v62 = vld [vmem:[#allocation10 + $0x4] ss:$8 sps:$4 sm:$0xff]   ;;  %v7469_v7 = vld [vmem:[#allocation10] ss:$8 sps:$4 sm:$0xff]  }
 0x204   : > { %6075 = vmatmul.mubr.msk.bf16.gmra.mrb[4].mxu1 %vm1185_vm1, %v909_v18  ;;  %7114 = vmatprep.subr.bf16.mxu0 %v911_v26  ;;  %v1652_v56 = vld [vmem:[%s8205_s3 + $0x40] sm:$0xff]  ;;  %v947_v27 = vld [vmem:[%s8230_s22 + $0x78] sm:$0xff]  ;;  %v946_v31 = vld [vmem:[%s8230_s22 + $0x70] sm:$0xff] }
 0x205   : > { %1262 = vmatprep.mubr.bf16.mxu1 %v7836_v12  ;;  %955 = vperm.xlu0 %7464, %v933_v48   ;;  %v6106_v58 = vcombine.low %v1644_v55, %v1652_v56  ;;  %v6107_v59 = vcombine.high %v1644_v55, %v1652_v56  ;;  %v1660_v60 = vld [vmem:[%s8205_s3 + $0x80] sm:$0xff]  ;;  %v7479_v46 = vld [vmem:[#allocation10 + $0x24] ss:$8 sps:$4 sm:$0xff]   ;;  %v7477_v48 = vld [vmem:[#allocation10 + $0x20] ss:$8 sps:$4 sm:$0xff]  }
 0x206   : > { %975 = vperm.xlu1 %7465, %v937_v49   ;;  %v1668_v0 = vld [vmem:[%s8205_s3 + $0xc0] sm:$0xff] }
 0x207   : > { %7115 = vmatpush3.bf16.msra.mxu0 %v911_v26  ;;  %3180 = vmatprep.subr.bf16.mxu1 %v6107_v59  ;;  %v6123_v3 = vcombine.high %v1660_v60, %v1668_v0  ;;  %v1676_v4 = vld [vmem:[%s8205_s3 + $0x100] sm:$0xff]  ;;  %v6122_v9 = vcombine.low %v1660_v60, %v1668_v0 }
 0x208   : > { %7116 = vmatprep.subr.bf16.mxu0 %v912_v29  ;;  %v1684_v5 = vld [vmem:[%s8205_s3 + $0x140] sm:$0xff]  ;;  %3181 = vmatpush1.bf16.msra.mxu1 %v6106_v58 }
 0x209   : > { %970 = vperm.xlu0 %7464, %v936_v50   ;;  %3182 = vmatprep.subr.bf16.mxu1 %v6123_v3  ;;  %v6139_v11 = vcombine.high %v1676_v4, %v1684_v5  ;;  %v1692_v13 = vld [vmem:[%s8205_s3 + $0x180] sm:$0xff]  ;;  %v6138_v19 = vcombine.low %v1676_v4, %v1684_v5 }
 0x20a   : > { %985 = vperm.xlu1 %7465, %v939_v51   ;;  %v1700_v14 = vld [vmem:[%s8205_s3 + $0x1c0] sm:$0xff] }
 0x20b   : > { %7117 = vmatpush3.bf16.msra.mxu0 %v912_v29  ;;  %v944_v18 = vld [vmem:[%s8230_s22 + $0x60] sm:$0xff]  ;;  %v6155_v21 = vcombine.high %v1692_v13, %v1700_v14  ;;  %v7482_v0 = vld [vmem:[#allocation10 + $0x34] ss:$8 sps:$4 sm:$0xff]   ;;  %s9288_s22 = sld [smem:[#allocation29_spill]] (!%p6362_p1) }
 0x20c   : > { %6076 = vmatmul.mubr.msk.bf16.gmra.mrb[8].mxu1 %vm1185_vm1, %v910_v23  ;;  %7118 = vmatprep.subr.bf16.mxu0 %v913_v32  ;;  %v1708_v23 = vld [vmem:[%s8205_s3 + $0x200] sm:$0xff] }
 0x20d   : > { %1272 = vmatprep.mubr.bf16.mxu1 %v7836_v12  ;;  %980 = vperm.xlu0 %7464, %v938_v52   ;;  %v1716_v24 = vld [vmem:[%s8205_s3 + $0x240] sm:$0xff] }
 0x20e   : > { %995 = vperm.xlu1 %7465, %v941_v53   ;;  %3183 = vmatpush1.bf16.msra.mxu1 %v6122_v9  ;;  %v6171_v34 = vcombine.high %v1708_v23, %v1716_v24  ;;  %v1724_v35 = vld [vmem:[%s8205_s3 + $0x280] sm:$0xff] }
 0x20f   : > { %7119 = vmatpush3.bf16.msra.mxu0 %v913_v32  ;;  %3184 = vmatprep.subr.bf16.mxu1 %v6139_v11  ;;  %v1756_v53 = vld [vmem:[%s8205_s3 + $0x380] sm:$0xff] }
 0x210   : > { %7120 = vmatprep.subr.bf16.mxu0 %v914_v33 }
 0x211   : > { %990 = vperm.xlu0 %7464, %v940_v54   ;;  %v1764_v54 = vld [vmem:[%s8205_s3 + $0x3c0] sm:$0xff] }
 0x212   : > { %1005 = vperm.xlu1 %7465, %v943_v63   ;;  %3185 = vmatpush1.bf16.msra.mxu1 %v6138_v19  ;;  %v6219_v59 = vcombine.high %v1756_v53, %v1764_v54  ;;  %v6218_v4 = vcombine.low %v1756_v53, %v1764_v54  ;;  %v7485_v19 = vld [vmem:[#allocation10 + $0x44] ss:$8 sps:$4 sm:$0xff]   ;;  %v1876_v53 = vld [vmem:[%s8205_s3 + $0x740] sm:$0xff] }
 0x213   : > { %7121 = vmatpush3.bf16.msra.mxu0 %v914_v33  ;;  %3186 = vmatprep.subr.bf16.mxu1 %v6155_v21  ;;  %v7483_v21 = vld [vmem:[#allocation10 + $0x40] ss:$8 sps:$4 sm:$0xff]  }
 0x214   : > { %6077 = vmatmul.mubr.msk.bf16.gmra.mrb[12].mxu1 %vm1185_vm1, %v911_v26  ;;  %7122 = vmatprep.subr.bf16.mxu0 %v915_v36  ;;  %v7476_v26 = vld [vmem:[#allocation10 + $0x14] ss:$8 sps:$4 sm:$0xff]  }
 0x215   : > { %1282 = vmatprep.mubr.bf16.mxu1 %v7836_v12  ;;  %1000 = vperm.xlu0 %7464, %v942_v2   ;;  %v7480_v2 = vld [vmem:[#allocation10 + $0x30] ss:$8 sps:$4 sm:$0xff]  }
 0x216   : > { %1015 = vperm.xlu1 %7465, %v945_v16   ;;  %v1804_v16 = vld [vmem:[%s8205_s3 + $0x500] sm:$0xff] }
 0x217   : > { %7123 = vmatpush3.bf16.msra.mxu0 %v915_v36 }
 0x219   : > { %1010 = vperm.xlu0 %7464, %v944_v18  }
 0x21a   : > { %7125 = vmatmul.mubr.bf16.vlgmr.msra.gmra.mrb[0].mxu0 %v7473_v38  ;;  %1025 = vperm.xlu1 %7465, %v947_v27   ;;  %v1828_v27 = vld [vmem:[%s8205_s3 + $0x5c0] sm:$0xff] }
 0x21b   : > { %7128 = vmatprep.mubr.bf16.mxu0 %v7486_v39  ;;  %v6170_v39 = vcombine.low %v1708_v23, %v1716_v24 }
 0x21c   : > { %6078 = vmatmul.mubr.msk.bf16.gmra.mrb[16].mxu1 %vm1185_vm1, %v912_v29  ;;  %v7474_v29 = vld [vmem:[#allocation10 + $0x10] ss:$8 sps:$4 sm:$0xff]  }
 0x21d   : > { %1292 = vmatprep.mubr.bf16.mxu1 %v7836_v12  ;;  %1020 = vperm.xlu0 %7464, %v946_v31  }
 0x222   : > { %7129 = vmatmul.mubr.bf16.gmra.mrb[4].mxu0 %v7487_v40 }
 0x223   : > { %7132 = vmatprep.mubr.bf16.mxu0 %v7491_v41 }
 0x224   : > { %6079 = vmatmul.mubr.msk.bf16.gmra.mrb[20].mxu1 %vm1185_vm1, %v913_v32  ;;  %v6154_v32 = vcombine.low %v1692_v13, %v1700_v14 }
 0x225   : > { %1302 = vmatprep.mubr.bf16.mxu1 %v7836_v12 }
 0x226   : > { %3187 = vmatpush1.bf16.msra.mxu1 %v6154_v32 }
 0x227   : > { %3188 = vmatprep.subr.bf16.mxu1 %v6171_v34  ;;  %v1836_v34 = vld [vmem:[%s8205_s3 + $0x600] sm:$0xff] }
 0x22a   : > { %7133 = vmatmul.mubr.bf16.gmra.mrb[8].mxu0 %v7492_v42  ;;  %3189 = vmatpush1.bf16.msra.mxu1 %v6170_v39  ;;  %v7488_v39 = vld [vmem:[#allocation10 + $0x50] ss:$8 sps:$4 sm:$0xff]  }
 0x22b   : > { %7136 = vmatprep.mubr.bf16.mxu0 %v7496_v43  ;;  %v1740_v43 = vld [vmem:[%s8205_s3 + $0x300] sm:$0xff] }
 0x22c   : > { %6080 = vmatmul.mubr.msk.bf16.gmra.mrb[24].mxu1 %vm1185_vm1, %v914_v33 }
 0x22d   : > { %1312 = vmatprep.mubr.bf16.mxu1 %v7836_v12 }
 0x232   : > { %7137 = vmatmul.mubr.bf16.gmra.mrb[12].mxu0 %v7497_v44  ;;  %v1748_v44 = vld [vmem:[%s8205_s3 + $0x340] sm:$0xff] }
 0x233   : > { %1547 = vmatprep.mubr.bf16.mxu0 %v7836_v12  ;;  %v6203_v52 = vcombine.high %v1740_v43, %v1748_v44 }
 0x234   : > { %6081 = vmatmul.mubr.msk.bf16.gmra.mrb[28].mxu1 %vm1185_vm1, %v915_v36  ;;  %v1732_v36 = vld [vmem:[%s8205_s3 + $0x2c0] sm:$0xff] }
 0x235   : > { %v6187_v41 = vcombine.high %v1724_v35, %v1732_v36  ;;  %v6186_v50 = vcombine.low %v1724_v35, %v1732_v36  ;;  %v1844_v35 = vld [vmem:[%s8205_s3 + $0x640] sm:$0xff] }
 0x237   : > { %3190 = vmatprep.subr.bf16.mxu1 %v6187_v41 }
 0x238   : > { %3191 = vmatpush1.bf16.msra.mxu1 %v6186_v50 }
 0x239   : > { %3192 = vmatprep.subr.bf16.mxu1 %v6203_v52  ;;  %v1868_v52 = vld [vmem:[%s8205_s3 + $0x700] sm:$0xff] }
 0x2cf   : > { %v1244_v57 = vpop.f32.mrb[0].mxu1 }
 0x2d0   : > { %v1246_v61 = vpop.f32.mrb[1].mxu1 }
 0x2d1   : > { %v1248_v1 = vpop.f32.mrb[2].mxu1 }
 0x2d2   : > { %v1323_v6 = vpack.c.bf16 %v1248_v1, %v1244_v57  ;;  %v1250_v8 = vpop.f32.mrb[3].mxu1  ;;  %v6202_v57 = vcombine.low %v1740_v43, %v1748_v44  ;;  %v6299_v43 = vcombine.high %v1836_v34, %v1844_v35  ;;  %v1852_v44 = vld [vmem:[%s8205_s3 + $0x680] sm:$0xff] }
 0x2d3   : > { %v1324_v10 = vpack.c.bf16 %v1250_v8, %v1246_v61  ;;  %v1772_v61 = vld [vmem:[%s8205_s3 + $0x400] sm:$0xff] }
 0x2d4   : > { %v1435_v17 = vmul.bf16 %v7469_v7, %v1323_v6  ;;  %3193 = vmatpush1.bf16.msra.mxu1 %v6202_v57  ;;  %v1788_v7 = vld [vmem:[%s8205_s3 + $0x480] sm:$0xff]  ;;  %v7493_v57 = vld [vmem:[#allocation10 + $0x60] ss:$8 sps:$4 sm:$0xff]  }
 0x2d5   : > { %v1436_v15 = vmul.bf16 %v7471_v62, %v1324_v10  ;;  %v1780_v62 = vld [vmem:[%s8205_s3 + $0x440] sm:$0xff]  ;;  %3194 = vmatprep.subr.bf16.mxu1 %v6219_v59 }
 0x2d6   : > { %v6235_v6 = vcombine.high %v1772_v61, %v1780_v62  ;;  %v1796_v8 = vld [vmem:[%s8205_s3 + $0x4c0] sm:$0xff]  ;;  %v6234_v11 = vcombine.low %v1772_v61, %v1780_v62  ;;  %v6331_v61 = vcombine.high %v1868_v52, %v1876_v53 }
 0x2d7   : > { %v1254_v20 = vpop.f32.mrb[4].mxu1  ;;  %1515 = vmatprep.subr.bf16.mxu0 %v1436_v15  ;;  %v6251_v14 = vcombine.high %v1788_v7, %v1796_v8  ;;  %v6250_v23 = vcombine.low %v1788_v7, %v1796_v8  ;;  %v1645_v8 = vld [vmem:[%s8205_s3 + $0x8] sm:$0xff] }
 0x2d8   : > { %v1256_v22 = vpop.f32.mrb[5].mxu1  ;;  %1516 = vmatpush1.bf16.msra.mxu0 %v1435_v17  ;;  %3195 = vmatpush1.bf16.msra.mxu1 %v6218_v4  ;;  %v1812_v17 = vld [vmem:[%s8205_s3 + $0x540] sm:$0xff] }
 0x2d9   : > { %v1258_v25 = vpop.f32.mrb[6].mxu1  ;;  %3196 = vmatprep.subr.bf16.mxu1 %v6235_v6  ;;  %v7500_v4 = vld [vmem:[#allocation10 + $0x74] ss:$8 sps:$4 sm:$0xff]   ;;  %v7498_v6 = vld [vmem:[#allocation10 + $0x70] ss:$8 sps:$4 sm:$0xff]  }
 0x2da   : > { %v1325_v28 = vpack.c.bf16 %v1258_v25, %v1254_v20  ;;  %v1260_v30 = vpop.f32.mrb[7].mxu1  ;;  %v6267_v25 = vcombine.high %v1804_v16, %v1812_v17 }
 0x2db   : > { %v1326_v33 = vpack.c.bf16 %v1260_v30, %v1256_v22  ;;  %v6266_v30 = vcombine.low %v1804_v16, %v1812_v17  ;;  %v1669_v16 = vld [vmem:[%s8205_s3 + $0xc8] sm:$0xff]  ;;  %v7501_v17 = vld [vmem:[#allocation11] sm:$0xff]  }
 0x2dc   : > { %v1437_v38 = vmul.bf16 %v7474_v29, %v1325_v28  ;;  %3197 = vmatpush1.bf16.msra.mxu1 %v6234_v11 }
 0x2dd   : > { %v1438_v37 = vmul.bf16 %v7476_v26, %v1326_v33  ;;  %3198 = vmatprep.subr.bf16.mxu1 %v6251_v14  ;;  %v1820_v26 = vld [vmem:[%s8205_s3 + $0x580] sm:$0xff] }
 0x2de   : > { %v6283_v32 = vcombine.high %v1820_v26, %v1828_v27  ;;  %v6282_v41 = vcombine.low %v1820_v26, %v1828_v27  ;;  %v7502_v26 = vld [vmem:[#allocation11 + $0x8] sm:$0xff]  }
 0x2df   : > { %v1264_v40 = vpop.f32.mrb[8].mxu1  ;;  %1517 = vmatprep.subr.bf16.mxu0 %v1438_v37  ;;  %v7490_v37 = vld [vmem:[#allocation10 + $0x54] ss:$8 sps:$4 sm:$0xff]  }
 0x2e0   : > { %v1266_v42 = vpop.f32.mrb[9].mxu1  ;;  %1518 = vmatpush1.bf16.msra.mxu0 %v1437_v38  ;;  %3199 = vmatpush1.bf16.msra.mxu1 %v6250_v23 }
 0x2e1   : > { %v1268_v45 = vpop.f32.mrb[10].mxu1  ;;  %3200 = vmatprep.subr.bf16.mxu1 %v6267_v25  ;;  %v1701_v25 = vld [vmem:[%s8205_s3 + $0x1c8] sm:$0xff] }
 0x2e2   : > { %v1327_v47 = vpack.c.bf16 %v1268_v45, %v1264_v40  ;;  %v1270_v49 = vpop.f32.mrb[11].mxu1  ;;  %v1860_v45 = vld [vmem:[%s8205_s3 + $0x6c0] sm:$0xff] }
 0x2e3   : > { %v1328_v51 = vpack.c.bf16 %v1270_v49, %v1266_v42  ;;  %v6315_v50 = vcombine.high %v1852_v44, %v1860_v45  ;;  %v6314_v59 = vcombine.low %v1852_v44, %v1860_v45  ;;  %v7504_v44 = vld [vmem:[#allocation11 + $0x18] sm:$0xff]  }
 0x2e4   : > { %v1439_v56 = vmul.bf16 %v7477_v48, %v1327_v47  ;;  %3201 = vmatpush1.bf16.msra.mxu1 %v6266_v30  ;;  %v6298_v48 = vcombine.low %v1836_v34, %v1844_v35  ;;  %v1717_v30 = vld [vmem:[%s8205_s3 + $0x248] sm:$0xff]  ;;  %v7503_v35 = vld [vmem:[#allocation11 + $0x10] sm:$0xff]  }
 0x2e5   : > { %v1440_v55 = vmul.bf16 %v7479_v46, %v1328_v51  ;;  %3202 = vmatprep.subr.bf16.mxu1 %v6283_v32  ;;  %v1733_v34 = vld [vmem:[%s8205_s3 + $0x2c8] sm:$0xff] }
 0x2e7   : > { %v1274_v58 = vpop.f32.mrb[12].mxu1  ;;  %1519 = vmatprep.subr.bf16.mxu0 %v1440_v55  ;;  %v7495_v55 = vld [vmem:[#allocation10 + $0x64] ss:$8 sps:$4 sm:$0xff]  }
 0x2e8   : > { %v1276_v60 = vpop.f32.mrb[13].mxu1  ;;  %1520 = vmatpush1.bf16.msra.mxu0 %v1439_v56  ;;  %3203 = vmatpush1.bf16.msra.mxu1 %v6282_v41 }
 0x2e9   : > { %v1278_v63 = vpop.f32.mrb[14].mxu1  ;;  %3204 = vmatprep.subr.bf16.mxu1 %v6299_v43  ;;  %v1765_v43 = vld [vmem:[%s8205_s3 + $0x3c8] sm:$0xff] }
 0x2ea   : > { %v1329_v1 = vpack.c.bf16 %v1278_v63, %v1274_v58  ;;  %v1280_v3 = vpop.f32.mrb[15].mxu1 }
 0x2eb   : > { %v1330_v5 = vpack.c.bf16 %v1280_v3, %v1276_v60 }
 0x2ec   : > { %v1441_v10 = vmul.bf16 %v7480_v2, %v1329_v1  ;;  %3205 = vmatpush1.bf16.msra.mxu1 %v6298_v48  ;;  %v1781_v48 = vld [vmem:[%s8205_s3 + $0x448] sm:$0xff] }
 0x2ed   : > { %v1442_v9 = vmul.bf16 %v7482_v0, %v1330_v5  ;;  %3206 = vmatprep.subr.bf16.mxu1 %v6315_v50  ;;  %v6330_v0 = vcombine.low %v1868_v52, %v1876_v53 }
 0x2ef   : > { %v1284_v13 = vpop.f32.mrb[16].mxu1  ;;  %1521 = vmatprep.subr.bf16.mxu0 %v1442_v9  ;;  %v1653_v9 = vld [vmem:[%s8205_s3 + $0x48] sm:$0xff] }
 0x2f0   : > { %v1286_v15 = vpop.f32.mrb[17].mxu1  ;;  %1522 = vmatpush1.bf16.msra.mxu0 %v1441_v10  ;;  %3207 = vmatpush1.bf16.msra.mxu1 %v6314_v59 }
 0x2f1   : > { %v1288_v18 = vpop.f32.mrb[18].mxu1  ;;  %3208 = vmatprep.subr.bf16.mxu1 %v6331_v61  ;;  %v1813_v61 = vld [vmem:[%s8205_s3 + $0x548] sm:$0xff] }
 0x2f2   : > { %v1331_v20 = vpack.c.bf16 %v1288_v18, %v1284_v13  ;;  %v1290_v22 = vpop.f32.mrb[19].mxu1  ;;  %v6109_v13 = vcombine.high %v1645_v8, %v1653_v9  ;;  %v6108_v18 = vcombine.low %v1645_v8, %v1653_v9  ;;  %v1853_v9 = vld [vmem:[%s8205_s3 + $0x688] sm:$0xff] }
 0x2f3   : > { %v1332_v24 = vpack.c.bf16 %v1290_v22, %v1286_v15  ;;  %v1661_v15 = vld [vmem:[%s8205_s3 + $0x88] sm:$0xff] }
 0x2f4   : > { %v1443_v29 = vmul.bf16 %v7483_v21, %v1331_v20  ;;  %3209 = vmatpush1.bf16.msra.mxu1 %v6330_v0  ;;  %v1677_v20 = vld [vmem:[%s8205_s3 + $0x108] sm:$0xff]  ;;  %v6124_v22 = vcombine.low %v1661_v15, %v1669_v16 }
 0x2f5   : > { %v1444_v28 = vmul.bf16 %v7485_v19, %v1332_v24  ;;  %v6125_v19 = vcombine.high %v1661_v15, %v1669_v16  ;;  %v1685_v21 = vld [vmem:[%s8205_s3 + $0x148] sm:$0xff] }
 0x2f6   : > { %v6141_v23 = vcombine.high %v1677_v20, %v1685_v21  ;;  %v1693_v24 = vld [vmem:[%s8205_s3 + $0x188] sm:$0xff]  ;;  %v6140_v27 = vcombine.low %v1677_v20, %v1685_v21 }
 0x2f7   : > { %v1294_v31 = vpop.f32.mrb[20].mxu1  ;;  %1523 = vmatprep.subr.bf16.mxu0 %v1444_v28  ;;  %v6157_v28 = vcombine.high %v1693_v24, %v1701_v25  ;;  %v1821_v0 = vld [vmem:[%s8205_s3 + $0x588] sm:$0xff] }
 0x2f8   : > { %v1296_v33 = vpop.f32.mrb[21].mxu1  ;;  %1524 = vmatpush1.bf16.msra.mxu0 %v1443_v29  ;;  %v1709_v29 = vld [vmem:[%s8205_s3 + $0x208] sm:$0xff] }
 0x2f9   : > { %v1298_v36 = vpop.f32.mrb[22].mxu1  ;;  %v6173_v32 = vcombine.high %v1709_v29, %v1717_v30  ;;  %v1869_v15 = vld [vmem:[%s8205_s3 + $0x708] sm:$0xff] }
 0x2fa   : > { %v1333_v38 = vpack.c.bf16 %v1298_v36, %v1294_v31  ;;  %v1300_v40 = vpop.f32.mrb[23].mxu1  ;;  %v6156_v31 = vcombine.low %v1693_v24, %v1701_v25  ;;  %v6172_v36 = vcombine.low %v1709_v29, %v1717_v30  ;;  %v1877_v16 = vld [vmem:[%s8205_s3 + $0x748] sm:$0xff] }
 0x2fb   : > { %v1334_v42 = vpack.c.bf16 %v1300_v40, %v1296_v33  ;;  %v1725_v33 = vld [vmem:[%s8205_s3 + $0x288] sm:$0xff]  ;;  %v6332_v20 = vcombine.low %v1869_v15, %v1877_v16 }
 0x2fc   : > { %v1445_v47 = vmul.bf16 %v7488_v39, %v1333_v38  ;;  %v1741_v38 = vld [vmem:[%s8205_s3 + $0x308] sm:$0xff]  ;;  %v6188_v40 = vcombine.low %v1725_v33, %v1733_v34 }
 0x2fd   : > { %v1446_v46 = vmul.bf16 %v7490_v37, %v1334_v42  ;;  %v6189_v37 = vcombine.high %v1725_v33, %v1733_v34  ;;  %v1749_v39 = vld [vmem:[%s8205_s3 + $0x348] sm:$0xff]  ;;  %v1892_v33 = vld [vmem:[%s8205_s3 + $0x7c0] sm:$0xff] }
 0x2fe   : > { %v6205_v41 = vcombine.high %v1741_v38, %v1749_v39  ;;  %v1757_v42 = vld [vmem:[%s8205_s3 + $0x388] sm:$0xff]  ;;  %v6204_v45 = vcombine.low %v1741_v38, %v1749_v39 }
 0x2ff   : > { %v1304_v49 = vpop.f32.mrb[24].mxu1  ;;  %1525 = vmatprep.subr.bf16.mxu0 %v1446_v46  ;;  %v6221_v46 = vcombine.high %v1757_v42, %v1765_v43  ;;  %v1885_v34 = vld [vmem:[%s8205_s3 + $0x788] sm:$0xff] }
 0x300   : > { %v1306_v51 = vpop.f32.mrb[25].mxu1  ;;  %1526 = vmatpush1.bf16.msra.mxu0 %v1445_v47  ;;  %v1773_v47 = vld [vmem:[%s8205_s3 + $0x408] sm:$0xff] }
 0x301   : > { %v1308_v54 = vpop.f32.mrb[26].mxu1  ;;  %v6237_v53 = vcombine.high %v1773_v47, %v1781_v48 }
 0x302   : > { %v1335_v56 = vpack.c.bf16 %v1308_v54, %v1304_v49  ;;  %v1310_v58 = vpop.f32.mrb[27].mxu1  ;;  %v8411_v49 = vpop.f32.mrb[0].mxu0 }
 0x303   : > { %v1336_v60 = vpack.c.bf16 %v1310_v58, %v1306_v51  ;;  %v8414_v50 = vpop.f32.mrb[1].mxu0  ;;  %v6220_v51 = vcombine.low %v1757_v42, %v1765_v43  ;;  %v6236_v58 = vcombine.low %v1773_v47, %v1781_v48  ;;  %v1647_v42 = vld [vmem:[%s8205_s3 + $0x18] sm:$0xff] }
 0x304   : > { %v1447_v63 = vmul.bf16 %v7493_v57, %v1335_v56  ;;  %v8416_v52 = vpop.f32.mrb[2].mxu0  ;;  %v1797_v56 = vld [vmem:[%s8205_s3 + $0x4c8] sm:$0xff]  ;;  %v7505_v57 = vld [vmem:[#allocation11 + $0x20] sm:$0xff]  }
 0x305   : > { %v1448_v62 = vmul.bf16 %v7495_v55, %v1336_v60  ;;  %v8418_v54 = vpop.f32.mrb[3].mxu0  ;;  %v1789_v55 = vld [vmem:[%s8205_s3 + $0x488] sm:$0xff] }
 0x306   : > { %v6253_v59 = vcombine.high %v1789_v55, %v1797_v56  ;;  %v1805_v60 = vld [vmem:[%s8205_s3 + $0x508] sm:$0xff]  ;;  %v8435_v21 = vpop.f32.mrb[4].mxu0 }
 0x307   : > { %v1314_v1 = vpop.f32.mrb[28].mxu1  ;;  %1527 = vmatprep.subr.bf16.mxu0 %v1448_v62  ;;  %v6252_v62 = vcombine.low %v1789_v55, %v1797_v56  ;;  %v1670_v56 = vld [vmem:[%s8205_s3 + $0xd0] sm:$0xff] }
 0x308   : > { %v1316_v2 = vpop.f32.mrb[29].mxu1  ;;  %1528 = vmatpush1.bf16.msra.mxu0 %v1447_v63  ;;  %v6269_v63 = vcombine.high %v1805_v60, %v1813_v61 }
 0x309   : > { %v1318_v3 = vpop.f32.mrb[30].mxu1 }
 0x30a   : > { %v1337_v5 = vpack.c.bf16 %v1318_v3, %v1314_v1  ;;  %v1320_v7 = vpop.f32.mrb[31].mxu1  ;;  %v1829_v1 = vld [vmem:[%s8205_s3 + $0x5c8] sm:$0xff]  ;;  %v6268_v3 = vcombine.low %v1805_v60, %v1813_v61 }
 0x30b   : > { %v1338_v10 = vpack.c.bf16 %v1320_v7, %v1316_v2  ;;  %v7506_v2 = vld [vmem:[#allocation11 + $0x28] sm:$0xff]   ;;  %v6284_v7 = vcombine.low %v1821_v0, %v1829_v1 }
 0x30c   : > { %v1449_v14 = vmul.bf16 %v7498_v6, %v1337_v5  ;;  %v1837_v5 = vld [vmem:[%s8205_s3 + $0x608] sm:$0xff] }
 0x30d   : > { %v1450_v11 = vmul.bf16 %v7500_v4, %v1338_v10  ;;  %v6285_v4 = vcombine.high %v1821_v0, %v1829_v1  ;;  %v1845_v6 = vld [vmem:[%s8205_s3 + $0x648] sm:$0xff]  ;;  %v1678_v0 = vld [vmem:[%s8205_s3 + $0x110] sm:$0xff] }
 0x30e   : > { %v6301_v8 = vcombine.high %v1837_v5, %v1845_v6  ;;  %v1861_v10 = vld [vmem:[%s8205_s3 + $0x6c8] sm:$0xff]  ;;  %v1686_v1 = vld [vmem:[%s8205_s3 + $0x150] sm:$0xff] }
 0x30f   : > { %1529 = vmatprep.subr.bf16.mxu0 %v1450_v11  ;;  %v7507_v11 = vld [vmem:[#allocation11 + $0x30] sm:$0xff]  }
 0x310   : > { %1530 = vmatpush1.bf16.msra.mxu0 %v1449_v14  ;;  %v6317_v14 = vcombine.high %v1853_v9, %v1861_v10 }
 0x311   : > { %3293 = vmatprep.subr.bf16.mxu0 %v6109_v13  ;;  %v6300_v13 = vcombine.low %v1837_v5, %v1845_v6 }
 0x313   : > { %1548 = vmatmul.mubr.bf16.vlgmr.msra.gmra.mrb[16].mxu0 %v7501_v17  ;;  %v6316_v17 = vcombine.low %v1853_v9, %v1861_v10  ;;  %v1694_v10 = vld [vmem:[%s8205_s3 + $0x190] sm:$0xff] }
 0x314   : > { %1557 = vmatprep.mubr.bf16.mxu0 %v7836_v12  ;;  %3294 = vmatpush1.bf16.msra.mxu0 %v6108_v18  ;;  %v6333_v18 = vcombine.high %v1869_v15, %v1877_v16  ;;  %v1703_v15 = vld [vmem:[%s8205_s3 + $0x1d8] sm:$0xff] }
 0x315   : > { %3295 = vmatprep.subr.bf16.mxu0 %v6125_v19  ;;  %v7508_v19 = vld [vmem:[#allocation11 + $0x38] sm:$0xff]  }
 0x318   : > { %3296 = vmatpush1.bf16.msra.mxu0 %v6124_v22  ;;  %v8437_v22 = vpop.f32.mrb[5].mxu0 }
 0x319   : > { %3297 = vmatprep.subr.bf16.mxu0 %v6141_v23  ;;  %v8439_v23 = vpop.f32.mrb[6].mxu0 }
 0x31b   : > { %1558 = vmatmul.mubr.bf16.gmra.mrb[20].mxu0 %v7502_v26 }
 0x31c   : > { %1567 = vmatprep.mubr.bf16.mxu0 %v7836_v12  ;;  %3298 = vmatpush1.bf16.msra.mxu0 %v6140_v27 }
 0x31d   : > { %3299 = vmatprep.subr.bf16.mxu0 %v6157_v28 }
 0x320   : > { %3300 = vmatpush1.bf16.msra.mxu0 %v6156_v31 }
 0x321   : > { %3301 = vmatprep.subr.bf16.mxu0 %v6173_v32  ;;  %v1884_v32 = vld [vmem:[%s8205_s3 + $0x780] sm:$0xff] }
 0x323   : > { %1568 = vmatmul.mubr.bf16.gmra.mrb[24].mxu0 %v7503_v35  ;;  %v6347_v35 = vcombine.high %v1884_v32, %v1892_v33 }
 0x324   : > { %1577 = vmatprep.mubr.bf16.mxu0 %v7836_v12  ;;  %3302 = vmatpush1.bf16.msra.mxu0 %v6172_v36  ;;  %v1893_v36 = vld [vmem:[%s8205_s3 + $0x7c8] sm:$0xff] }
 0x325   : > { %3303 = vmatprep.subr.bf16.mxu0 %v6189_v37  ;;  %v6346_v37 = vcombine.low %v1884_v32, %v1892_v33  ;;  %v6348_v38 = vcombine.low %v1885_v34, %v1893_v36  ;;  %v6349_v39 = vcombine.high %v1885_v34, %v1893_v36  ;;  %3210 = vmatprep.subr.bf16.mxu1 %v6347_v35  ;;  %v1710_v34 = vld [vmem:[%s8205_s3 + $0x210] sm:$0xff]  ;;  %v1711_v36 = vld [vmem:[%s8205_s3 + $0x218] sm:$0xff] }
 0x326   : > { %v1718_v35 = vld [vmem:[%s8205_s3 + $0x250] sm:$0xff] }
 0x327   : > { %3211 = vmatpush1.bf16.msra.mxu1 %v6346_v37  ;;  %v1719_v37 = vld [vmem:[%s8205_s3 + $0x258] sm:$0xff] }
 0x328   : > { %3304 = vmatpush1.bf16.msra.mxu0 %v6188_v40  ;;  %v1646_v40 = vld [vmem:[%s8205_s3 + $0x10] sm:$0xff] }
 0x329   : > { %3305 = vmatprep.subr.bf16.mxu0 %v6205_v41  ;;  %v1654_v41 = vld [vmem:[%s8205_s3 + $0x50] sm:$0xff] }
 0x32a   : > { %v6111_v43 = vcombine.high %v1646_v40, %v1654_v41 }
 0x32b   : > { %1578 = vmatmul.mubr.bf16.gmra.mrb[28].mxu0 %v7504_v44  ;;  %v1655_v44 = vld [vmem:[%s8205_s3 + $0x58] sm:$0xff] }
 0x32c   : > { %1587 = vmatprep.mubr.bf16.mxu0 %v7836_v12  ;;  %3306 = vmatpush1.bf16.msra.mxu0 %v6204_v45  ;;  %v6110_v45 = vcombine.low %v1646_v40, %v1654_v41  ;;  %v6113_v47 = vcombine.high %v1647_v42, %v1655_v44 }
 0x32d   : > { %3307 = vmatprep.subr.bf16.mxu0 %v6221_v46  ;;  %v6112_v46 = vcombine.low %v1647_v42, %v1655_v44  ;;  %3406 = vmatprep.subr.bf16.mxu1 %v6111_v43  ;;  %v6175_v42 = vcombine.high %v1710_v34, %v1718_v35  ;;  %v6177_v43 = vcombine.high %v1711_v36, %v1719_v37  ;;  %v1726_v44 = vld [vmem:[%s8205_s3 + $0x290] sm:$0xff] }
 0x330   : > { %3308 = vmatpush1.bf16.msra.mxu0 %v6220_v51 }
 0x331   : > { %3309 = vmatprep.subr.bf16.mxu0 %v6237_v53  ;;  %v1662_v53 = vld [vmem:[%s8205_s3 + $0x90] sm:$0xff] }
 0x332   : > { %v6126_v5 = vcombine.low %v1662_v53, %v1670_v56 }
 0x333   : > { %1588 = vmatmul.mubr.bf16.gmra.mrb[32].mxu0 %v7505_v57  ;;  %v1663_v57 = vld [vmem:[%s8205_s3 + $0x98] sm:$0xff] }
 0x334   : > { %1597 = vmatprep.mubr.bf16.mxu0 %v7836_v12  ;;  %3310 = vmatpush1.bf16.msra.mxu0 %v6236_v58  ;;  %v1671_v58 = vld [vmem:[%s8205_s3 + $0xd8] sm:$0xff] }
 0x335   : > { %3311 = vmatprep.subr.bf16.mxu0 %v6253_v59  ;;  %v6128_v6 = vcombine.low %v1663_v57, %v1671_v58 }
 0x338   : > { %3312 = vmatpush1.bf16.msra.mxu0 %v6252_v62  ;;  %v6127_v62 = vcombine.high %v1662_v53, %v1670_v56  ;;  %v6174_v56 = vcombine.low %v1710_v34, %v1718_v35  ;;  %v1774_v34 = vld [vmem:[%s8205_s3 + $0x410] sm:$0xff] }
 0x339   : > { %3313 = vmatprep.subr.bf16.mxu0 %v6269_v63  ;;  %v6129_v63 = vcombine.high %v1663_v57, %v1671_v58  ;;  %v6176_v57 = vcombine.low %v1711_v36, %v1719_v37  ;;  %v1782_v35 = vld [vmem:[%s8205_s3 + $0x450] sm:$0xff]  ;;  %v1775_v36 = vld [vmem:[%s8205_s3 + $0x418] sm:$0xff] }
 0x33a   : > { %v1783_v37 = vld [vmem:[%s8205_s3 + $0x458] sm:$0xff] }
 0x33b   : > { %1598 = vmatmul.mubr.bf16.gmra.mrb[36].mxu0 %v7506_v2  ;;  %v1679_v2 = vld [vmem:[%s8205_s3 + $0x118] sm:$0xff] }
 0x33c   : > { %1607 = vmatprep.mubr.bf16.mxu0 %v7836_v12  ;;  %3314 = vmatpush1.bf16.msra.mxu0 %v6268_v3  ;;  %v1687_v3 = vld [vmem:[%s8205_s3 + $0x158] sm:$0xff] }
 0x33d   : > { %3315 = vmatprep.subr.bf16.mxu0 %v6285_v4  ;;  %v6145_v9 = vcombine.high %v1679_v2, %v1687_v3 }
 0x340   : > { %3316 = vmatpush1.bf16.msra.mxu0 %v6284_v7 }
 0x341   : > { %3317 = vmatprep.subr.bf16.mxu0 %v6301_v8  ;;  %v6143_v8 = vcombine.high %v1678_v0, %v1686_v1 }
 0x343   : > { %1608 = vmatmul.mubr.bf16.gmra.mrb[40].mxu0 %v7507_v11 }
 0x344   : > { %1617 = vmatprep.mubr.bf16.mxu0 %v7836_v12  ;;  %3318 = vmatpush1.bf16.msra.mxu0 %v6300_v13  ;;  %v8441_v12 = vpop.f32.mrb[7].mxu0  ;;  %v1702_v13 = vld [vmem:[%s8205_s3 + $0x1d0] sm:$0xff] }
 0x345   : > { %3319 = vmatprep.subr.bf16.mxu0 %v6317_v14  ;;  %v8443_v24 = vpop.f32.mrb[8].mxu0  ;;  %v1695_v14 = vld [vmem:[%s8205_s3 + $0x198] sm:$0xff]  ;;  %v6159_v32 = vcombine.high %v1694_v10, %v1702_v13 }
 0x346   : > { %v8445_v25 = vpop.f32.mrb[9].mxu0  ;;  %v6161_v33 = vcombine.high %v1695_v14, %v1703_v15  ;;  %v6160_v40 = vcombine.low %v1695_v14, %v1703_v15 }
 0x347   : > { %v8447_v26 = vpop.f32.mrb[10].mxu0 }
 0x348   : > { %3320 = vmatpush1.bf16.msra.mxu0 %v6316_v17  ;;  %v8449_v27 = vpop.f32.mrb[11].mxu0 }
 0x349   : > { %3321 = vmatprep.subr.bf16.mxu0 %v6333_v18  ;;  %v8451_v28 = vpop.f32.mrb[12].mxu0 }
 0x34a   : > { %v8453_v29 = vpop.f32.mrb[13].mxu0 }
 0x34b   : > { %1618 = vmatmul.mubr.bf16.gmra.mrb[44].mxu0 %v7508_v19  ;;  %v8455_v30 = vpop.f32.mrb[14].mxu0  ;;  %v6142_v19 = vcombine.low %v1678_v0, %v1686_v1  ;;  %v1743_v0 = vld [vmem:[%s8205_s3 + $0x318] sm:$0xff] }
 0x34c   : > { %3322 = vmatpush1.bf16.msra.mxu0 %v6332_v20  ;;  %9286 = vst [vmem:[#allocation24_spill] sm:$0xff] %v8455_v30  ;;  %v8457_v31 = vpop.f32.mrb[15].mxu0  ;;  %v6144_v20 = vcombine.low %v1679_v2, %v1687_v3  ;;  %v1751_v1 = vld [vmem:[%s8205_s3 + $0x358] sm:$0xff] }
 0x34d   : > { %3323 = vmatprep.subr.bf16.mxu0 %v6349_v39  ;;  %v6158_v39 = vcombine.low %v1694_v10, %v1702_v13  ;;  %v1766_v10 = vld [vmem:[%s8205_s3 + $0x3d0] sm:$0xff]  ;;  %v1767_v13 = vld [vmem:[%s8205_s3 + $0x3d8] sm:$0xff] }
 0x350   : > { %3324 = vmatpush1.bf16.msra.mxu0 %v6348_v38 }
 0x351   : > { %3519 = vmatprep.subr.bf16.mxu0 %v6113_v47  ;;  %v1727_v47 = vld [vmem:[%s8205_s3 + $0x298] sm:$0xff] }
 0x3e6   : > { %v1549_v48 = vpop.f32.mrb[16].mxu0 }
 0x3e7   : > { %v1551_v51 = vpop.f32.mrb[17].mxu0 }
 0x3e8   : > { %v1553_v55 = vpop.f32.mrb[18].mxu0 }
 0x3e9   : > { %v8471_v59 = vpack.c.bf16 %v1553_v55, %v1549_v48  ;;  %v1555_v60 = vpop.f32.mrb[19].mxu0  ;;  %v1735_v48 = vld [vmem:[%s8205_s3 + $0x2d8] sm:$0xff] }
 0x3ea   : > { %v8473_v61 = vpack.c.bf16 %v1555_v60, %v1551_v51  ;;  %v6193_v60 = vcombine.high %v1727_v47, %v1735_v48 }
 0x3ec   : > { %3212 = vmatprep.mubr.bf16.mxu1 %v8473_v61  ;;  %3325 = vmatprep.mubr.bf16.mxu0 %v8473_v61 }
 0x3ed   : > { %3213 = vmatmul.mubr.bf16.vlgmr.msra.gmra.mrb[32].mxu1 %v8471_v59  ;;  %3326 = vmatmul.mubr.bf16.vlgmr.msra.gmra.mrb[48].mxu0 %v8471_v59 }
 0x3ee   : > { %v1559_v4 = vpop.f32.mrb[20].mxu0  ;;  %3407 = vmatpush1.bf16.msra.mxu1 %v6110_v45  ;;  %3520 = vmatpush1.bf16.msra.mxu0 %v6112_v46  ;;  %v1734_v46 = vld [vmem:[%s8205_s3 + $0x2d0] sm:$0xff] }
 0x3ef   : > { %v1561_v7 = vpop.f32.mrb[21].mxu0  ;;  %3408 = vmatprep.subr.bf16.mxu1 %v6127_v62  ;;  %3521 = vmatprep.subr.bf16.mxu0 %v6129_v63  ;;  %v6191_v58 = vcombine.high %v1726_v44, %v1734_v46  ;;  %v1742_v62 = vld [vmem:[%s8205_s3 + $0x310] sm:$0xff]  ;;  %v6190_v3 = vcombine.low %v1726_v44, %v1734_v46 }
 0x3f0   : > { %v1563_v11 = vpop.f32.mrb[22].mxu0  ;;  %v1750_v63 = vld [vmem:[%s8205_s3 + $0x350] sm:$0xff] }
 0x3f1   : > { %v8487_v16 = vpack.c.bf16 %v1563_v11, %v1559_v4  ;;  %v1565_v17 = vpop.f32.mrb[23].mxu0  ;;  %v6192_v4 = vcombine.low %v1727_v47, %v1735_v48  ;;  %v1759_v11 = vld [vmem:[%s8205_s3 + $0x398] sm:$0xff]  ;;  %v1790_v44 = vld [vmem:[%s8205_s3 + $0x490] sm:$0xff] }
 0x3f2   : > { %v8489_v18 = vpack.c.bf16 %v1565_v17, %v1561_v7  ;;  %3409 = vmatpush1.bf16.msra.mxu1 %v6126_v5  ;;  %3522 = vmatpush1.bf16.msra.mxu0 %v6128_v6  ;;  %v6207_v6 = vcombine.high %v1742_v62, %v1750_v63  ;;  %v6209_v7 = vcombine.high %v1743_v0, %v1751_v1  ;;  %v1798_v46 = vld [vmem:[%s8205_s3 + $0x4d0] sm:$0xff]  ;;  %v1791_v47 = vld [vmem:[%s8205_s3 + $0x498] sm:$0xff] }
 0x3f3   : > { %3410 = vmatprep.subr.bf16.mxu1 %v6143_v8  ;;  %3523 = vmatprep.subr.bf16.mxu0 %v6145_v9  ;;  %v1758_v8 = vld [vmem:[%s8205_s3 + $0x390] sm:$0xff]  ;;  %v1799_v48 = vld [vmem:[%s8205_s3 + $0x4d8] sm:$0xff] }
 0x3f4   : > { %3222 = vmatprep.mubr.bf16.mxu1 %v8489_v18  ;;  %3335 = vmatprep.mubr.bf16.mxu0 %v8489_v18 }
 0x3f5   : > { %3223 = vmatmul.mubr.bf16.gmra.mrb[36].mxu1 %v8487_v16  ;;  %3336 = vmatmul.mubr.bf16.gmra.mrb[52].mxu0 %v8487_v16 }
 0x3f6   : > { %v1569_v38 = vpop.f32.mrb[24].mxu0  ;;  %3411 = vmatpush1.bf16.msra.mxu1 %v6142_v19  ;;  %3524 = vmatpush1.bf16.msra.mxu0 %v6144_v20  ;;  %v6206_v19 = vcombine.low %v1742_v62, %v1750_v63  ;;  %v6208_v20 = vcombine.low %v1743_v0, %v1751_v1  ;;  %v6255_v62 = vcombine.high %v1790_v44, %v1798_v46  ;;  %v1806_v0 = vld [vmem:[%s8205_s3 + $0x510] sm:$0xff] }
 0x3f7   : > { %v1571_v41 = vpop.f32.mrb[25].mxu0  ;;  %3412 = vmatprep.subr.bf16.mxu1 %v6159_v32  ;;  %3525 = vmatprep.subr.bf16.mxu0 %v6161_v33  ;;  %v6223_v32 = vcombine.high %v1758_v8, %v1766_v10  ;;  %v6225_v33 = vcombine.high %v1759_v11, %v1767_v13  ;;  %v6257_v63 = vcombine.high %v1791_v47, %v1799_v48  ;;  %v1814_v1 = vld [vmem:[%s8205_s3 + $0x550] sm:$0xff] }
 0x3f8   : > { %v1573_v45 = vpop.f32.mrb[26].mxu0 }
 0x3f9   : > { %v8503_v51 = vpack.c.bf16 %v1573_v45, %v1569_v38  ;;  %v1575_v53 = vpop.f32.mrb[27].mxu0 }
 0x3fa   : > { %v8505_v55 = vpack.c.bf16 %v1575_v53, %v1571_v41  ;;  %3413 = vmatpush1.bf16.msra.mxu1 %v6158_v39  ;;  %3526 = vmatpush1.bf16.msra.mxu0 %v6160_v40  ;;  %v6222_v39 = vcombine.low %v1758_v8, %v1766_v10  ;;  %v6224_v40 = vcombine.low %v1759_v11, %v1767_v13  ;;  %v1822_v10 = vld [vmem:[%s8205_s3 + $0x590] sm:$0xff] }
 0x3fb   : > { %3414 = vmatprep.subr.bf16.mxu1 %v6175_v42  ;;  %3527 = vmatprep.subr.bf16.mxu0 %v6177_v43  ;;  %v6239_v42 = vcombine.high %v1774_v34, %v1782_v35  ;;  %v6241_v43 = vcombine.high %v1775_v36, %v1783_v37  ;;  %v6271_v8 = vcombine.high %v1806_v0, %v1814_v1  ;;  %v1830_v13 = vld [vmem:[%s8205_s3 + $0x5d0] sm:$0xff] }
 0x3fc   : > { %3232 = vmatprep.mubr.bf16.mxu1 %v8505_v55  ;;  %3345 = vmatprep.mubr.bf16.mxu0 %v8505_v55 }
 0x3fd   : > { %3233 = vmatmul.mubr.bf16.gmra.mrb[40].mxu1 %v8503_v51  ;;  %3346 = vmatmul.mubr.bf16.gmra.mrb[56].mxu0 %v8503_v51 }
 0x3fe   : > { %v1579_v2 = vpop.f32.mrb[28].mxu0  ;;  %3415 = vmatpush1.bf16.msra.mxu1 %v6174_v56  ;;  %3528 = vmatpush1.bf16.msra.mxu0 %v6176_v57 }
 0x3ff   : > { %v1581_v5 = vpop.f32.mrb[29].mxu0  ;;  %3416 = vmatprep.subr.bf16.mxu1 %v6191_v58  ;;  %3529 = vmatprep.subr.bf16.mxu0 %v6193_v60  ;;  %v6238_v58 = vcombine.low %v1774_v34, %v1782_v35  ;;  %v6240_v60 = vcombine.low %v1775_v36, %v1783_v37  ;;  %v6270_v34 = vcombine.low %v1806_v0, %v1814_v1 }
 0x400   : > { %v1583_v9 = vpop.f32.mrb[30].mxu0  ;;  %v6287_v36 = vcombine.high %v1822_v10, %v1830_v13 }
 0x401   : > { %v8519_v14 = vpack.c.bf16 %v1583_v9, %v1579_v2  ;;  %v1585_v15 = vpop.f32.mrb[31].mxu0  ;;  %v1807_v2 = vld [vmem:[%s8205_s3 + $0x518] sm:$0xff] }
 0x402   : > { %v8521_v17 = vpack.c.bf16 %v1585_v15, %v1581_v5  ;;  %3417 = vmatpush1.bf16.msra.mxu1 %v6190_v3  ;;  %3530 = vmatpush1.bf16.msra.mxu0 %v6192_v4  ;;  %v1815_v3 = vld [vmem:[%s8205_s3 + $0x558] sm:$0xff]  ;;  %v6254_v5 = vcombine.low %v1790_v44, %v1798_v46 }
 0x403   : > { %3418 = vmatprep.subr.bf16.mxu1 %v6207_v6  ;;  %3531 = vmatprep.subr.bf16.mxu0 %v6209_v7  ;;  %v6256_v6 = vcombine.low %v1791_v47, %v1799_v48  ;;  %v6273_v9 = vcombine.high %v1807_v2, %v1815_v3  ;;  %v1823_v15 = vld [vmem:[%s8205_s3 + $0x598] sm:$0xff]  ;;  %v6272_v35 = vcombine.low %v1807_v2, %v1815_v3  ;;  %v1854_v48 = vld [vmem:[%s8205_s3 + $0x690] sm:$0xff] }
 0x404   : > { %3242 = vmatprep.mubr.bf16.mxu1 %v8521_v17  ;;  %3355 = vmatprep.mubr.bf16.mxu0 %v8521_v17 }
 0x405   : > { %3243 = vmatmul.mubr.bf16.gmra.mrb[44].mxu1 %v8519_v14  ;;  %3356 = vmatmul.mubr.bf16.gmra.mrb[60].mxu0 %v8519_v14 }
 0x406   : > { %v1589_v38 = vpop.f32.mrb[32].mxu0  ;;  %3419 = vmatpush1.bf16.msra.mxu1 %v6206_v19  ;;  %3532 = vmatpush1.bf16.msra.mxu0 %v6208_v20  ;;  %v1831_v19 = vld [vmem:[%s8205_s3 + $0x5d8] sm:$0xff] }
 0x407   : > { %v1591_v41 = vpop.f32.mrb[33].mxu0  ;;  %3420 = vmatprep.subr.bf16.mxu1 %v6223_v32  ;;  %3533 = vmatprep.subr.bf16.mxu0 %v6225_v33  ;;  %v6289_v37 = vcombine.high %v1823_v15, %v1831_v19  ;;  %v6288_v44 = vcombine.low %v1823_v15, %v1831_v19 }
 0x408   : > { %v1593_v45 = vpop.f32.mrb[34].mxu0 }
 0x409   : > { %v8535_v53 = vpack.c.bf16 %v1593_v45, %v1589_v38  ;;  %v1595_v56 = vpop.f32.mrb[35].mxu0  ;;  %v1838_v38 = vld [vmem:[%s8205_s3 + $0x610] sm:$0xff] }
 0x40a   : > { %v8537_v57 = vpack.c.bf16 %v1595_v56, %v1591_v41  ;;  %3421 = vmatpush1.bf16.msra.mxu1 %v6222_v39  ;;  %3534 = vmatpush1.bf16.msra.mxu0 %v6224_v40  ;;  %v1846_v39 = vld [vmem:[%s8205_s3 + $0x650] sm:$0xff]  ;;  %v1839_v40 = vld [vmem:[%s8205_s3 + $0x618] sm:$0xff] }
 0x40b   : > { %3422 = vmatprep.subr.bf16.mxu1 %v6239_v42  ;;  %3535 = vmatprep.subr.bf16.mxu0 %v6241_v43  ;;  %v1847_v41 = vld [vmem:[%s8205_s3 + $0x658] sm:$0xff]  ;;  %v6286_v43 = vcombine.low %v1822_v10, %v1830_v13  ;;  %v6303_v46 = vcombine.high %v1838_v38, %v1846_v39  ;;  %v6302_v2 = vcombine.low %v1838_v38, %v1846_v39  ;;  %v1894_v38 = vld [vmem:[%s8205_s3 + $0x7d0] sm:$0xff] }
 0x40c   : > { %3252 = vmatprep.mubr.bf16.mxu1 %v8537_v57  ;;  %3365 = vmatprep.mubr.bf16.mxu0 %v8537_v57  ;;  %v6305_v47 = vcombine.high %v1839_v40, %v1847_v41  ;;  %v6304_v3 = vcombine.low %v1839_v40, %v1847_v41  ;;  %v1887_v39 = vld [vmem:[%s8205_s3 + $0x798] sm:$0xff] }
 0x40d   : > { %3253 = vmatmul.mubr.bf16.gmra.mrb[48].mxu1 %v8535_v53  ;;  %3366 = vmatmul.mubr.bf16.gmra.mrb[64].mxu0 %v8535_v53  ;;  %v1895_v40 = vld [vmem:[%s8205_s3 + $0x7d8] sm:$0xff] }
 0x40e   : > { %v1599_v4 = vpop.f32.mrb[36].mxu0  ;;  %3423 = vmatpush1.bf16.msra.mxu1 %v6238_v58  ;;  %3536 = vmatpush1.bf16.msra.mxu0 %v6240_v60  ;;  %v1862_v58 = vld [vmem:[%s8205_s3 + $0x6d0] sm:$0xff]  ;;  %v1855_v60 = vld [vmem:[%s8205_s3 + $0x698] sm:$0xff] }
 0x40f   : > { %v1601_v7 = vpop.f32.mrb[37].mxu0  ;;  %3424 = vmatprep.subr.bf16.mxu1 %v6255_v62  ;;  %3537 = vmatprep.subr.bf16.mxu0 %v6257_v63  ;;  %v1863_v62 = vld [vmem:[%s8205_s3 + $0x6d8] sm:$0xff] }
 0x410   : > { %v1603_v11 = vpop.f32.mrb[38].mxu0  ;;  %v6320_v13 = vcombine.low %v1855_v60, %v1863_v62 }
 0x411   : > { %v8551_v20 = vpack.c.bf16 %v1603_v11, %v1599_v4  ;;  %v1605_v32 = vpop.f32.mrb[39].mxu0  ;;  %v6319_v4 = vcombine.high %v1854_v48, %v1862_v58  ;;  %v6318_v11 = vcombine.low %v1854_v48, %v1862_v58  ;;  %v1649_v48 = vld [vmem:[%s8205_s3 + $0x28] sm:$0xff] }
 0x412   : > { %v8553_v33 = vpack.c.bf16 %v1605_v32, %v1601_v7  ;;  %3425 = vmatpush1.bf16.msra.mxu1 %v6254_v5  ;;  %3538 = vmatpush1.bf16.msra.mxu0 %v6256_v6  ;;  %v6321_v5 = vcombine.high %v1855_v60, %v1863_v62  ;;  %v1870_v6 = vld [vmem:[%s8205_s3 + $0x710] sm:$0xff]  ;;  %v6352_v60 = vcombine.low %v1887_v39, %v1895_v40 }
 0x413   : > { %3426 = vmatprep.subr.bf16.mxu1 %v6271_v8  ;;  %3539 = vmatprep.subr.bf16.mxu0 %v6273_v9  ;;  %v1878_v7 = vld [vmem:[%s8205_s3 + $0x750] sm:$0xff]  ;;  %v1871_v8 = vld [vmem:[%s8205_s3 + $0x718] sm:$0xff] }
 0x414   : > { %3262 = vmatprep.mubr.bf16.mxu1 %v8553_v33  ;;  %3375 = vmatprep.mubr.bf16.mxu0 %v8553_v33  ;;  %v1879_v9 = vld [vmem:[%s8205_s3 + $0x758] sm:$0xff]  ;;  %v6335_v19 = vcombine.high %v1870_v6, %v1878_v7 }
 0x415   : > { %3263 = vmatmul.mubr.bf16.gmra.mrb[52].mxu1 %v8551_v20  ;;  %3376 = vmatmul.mubr.bf16.gmra.mrb[68].mxu0 %v8551_v20  ;;  %v6337_v32 = vcombine.high %v1871_v8, %v1879_v9 }
 0x416   : > { %v1609_v42 = vpop.f32.mrb[40].mxu0  ;;  %3427 = vmatpush1.bf16.msra.mxu1 %v6270_v34  ;;  %3540 = vmatpush1.bf16.msra.mxu0 %v6272_v35  ;;  %v1886_v35 = vld [vmem:[%s8205_s3 + $0x790] sm:$0xff] }
 0x417   : > { %v1611_v45 = vpop.f32.mrb[41].mxu0  ;;  %3428 = vmatprep.subr.bf16.mxu1 %v6287_v36  ;;  %3541 = vmatprep.subr.bf16.mxu0 %v6289_v37  ;;  %v6350_v58 = vcombine.low %v1886_v35, %v1894_v38 }
 0x418   : > { %v1613_v56 = vpop.f32.mrb[42].mxu0 }
 0x419   : > { %v8567_v63 = vpack.c.bf16 %v1613_v56, %v1609_v42  ;;  %v1615_v0 = vpop.f32.mrb[43].mxu0  ;;  %v6334_v42 = vcombine.low %v1870_v6, %v1878_v7  ;;  %v1657_v56 = vld [vmem:[%s8205_s3 + $0x68] sm:$0xff] }
 0x41a   : > { %v8569_v1 = vpack.c.bf16 %v1615_v0, %v1611_v45  ;;  %3429 = vmatpush1.bf16.msra.mxu1 %v6286_v43  ;;  %3542 = vmatpush1.bf16.msra.mxu0 %v6288_v44  ;;  %v6336_v43 = vcombine.low %v1871_v8, %v1879_v9  ;;  %v6351_v44 = vcombine.high %v1886_v35, %v1894_v38  ;;  %v1704_v38 = vld [vmem:[%s8205_s3 + $0x1e0] sm:$0xff] }
 0x41b   : > { %3430 = vmatprep.subr.bf16.mxu1 %v6303_v46  ;;  %3543 = vmatprep.subr.bf16.mxu0 %v6305_v47  ;;  %v6353_v45 = vcombine.high %v1887_v39, %v1895_v40  ;;  %v1648_v46 = vld [vmem:[%s8205_s3 + $0x20] sm:$0xff]  ;;  %v6117_v0 = vcombine.high %v1649_v48, %v1657_v56  ;;  %v6116_v7 = vcombine.low %v1649_v48, %v1657_v56  ;;  %v1697_v39 = vld [vmem:[%s8205_s3 + $0x1a8] sm:$0xff] }
 0x41c   : > { %3272 = vmatprep.mubr.bf16.mxu1 %v8569_v1  ;;  %3385 = vmatprep.mubr.bf16.mxu0 %v8569_v1  ;;  %v1656_v47 = vld [vmem:[%s8205_s3 + $0x60] sm:$0xff]  ;;  %v1705_v40 = vld [vmem:[%s8205_s3 + $0x1e8] sm:$0xff] }
 0x41d   : > { %3273 = vmatmul.mubr.bf16.gmra.mrb[56].mxu1 %v8567_v63  ;;  %3386 = vmatmul.mubr.bf16.gmra.mrb[72].mxu0 %v8567_v63  ;;  %v6115_v62 = vcombine.high %v1648_v46, %v1656_v47  ;;  %v6114_v6 = vcombine.low %v1648_v46, %v1656_v47  ;;  %v1712_v46 = vld [vmem:[%s8205_s3 + $0x220] sm:$0xff]  ;;  %v1713_v48 = vld [vmem:[%s8205_s3 + $0x228] sm:$0xff] }
 0x41e   : > { %v1619_v10 = vpop.f32.mrb[44].mxu0  ;;  %3431 = vmatpush1.bf16.msra.mxu1 %v6302_v2  ;;  %3544 = vmatpush1.bf16.msra.mxu0 %v6304_v3  ;;  %v1664_v2 = vld [vmem:[%s8205_s3 + $0xa0] sm:$0xff]  ;;  %v1721_v56 = vld [vmem:[%s8205_s3 + $0x268] sm:$0xff] }
 0x41f   : > { %v1621_v15 = vpop.f32.mrb[45].mxu0  ;;  %3432 = vmatprep.subr.bf16.mxu1 %v6319_v4  ;;  %3545 = vmatprep.subr.bf16.mxu0 %v6321_v5  ;;  %v1672_v3 = vld [vmem:[%s8205_s3 + $0xe0] sm:$0xff]  ;;  %v1665_v4 = vld [vmem:[%s8205_s3 + $0xa8] sm:$0xff] }
 0x420   : > { %v1623_v34 = vpop.f32.mrb[46].mxu0  ;;  %v1673_v5 = vld [vmem:[%s8205_s3 + $0xe8] sm:$0xff]  ;;  %v6131_v8 = vcombine.high %v1664_v2, %v1672_v3  ;;  %v1720_v47 = vld [vmem:[%s8205_s3 + $0x260] sm:$0xff] }
 0x421   : > { %v8580_v36 = vpack.c.bf16 %v1623_v34, %v1619_v10  ;;  %v1625_v37 = vpop.f32.mrb[47].mxu0  ;;  %v6133_v9 = vcombine.high %v1665_v4, %v1673_v5  ;;  %v1680_v10 = vld [vmem:[%s8205_s3 + $0x120] sm:$0xff] }
 0x422   : > { %v8585_v41 = vpack.c.bf16 %v1625_v37, %v1621_v15  ;;  %3433 = vmatpush1.bf16.msra.mxu1 %v6318_v11  ;;  %3546 = vmatpush1.bf16.msra.mxu0 %v6320_v13  ;;  %v1688_v11 = vld [vmem:[%s8205_s3 + $0x160] sm:$0xff]  ;;  %v1681_v13 = vld [vmem:[%s8205_s3 + $0x128] sm:$0xff] }
 0x423   : > { %3434 = vmatprep.subr.bf16.mxu1 %v6335_v19  ;;  %3547 = vmatprep.subr.bf16.mxu0 %v6337_v32  ;;  %v1689_v15 = vld [vmem:[%s8205_s3 + $0x168] sm:$0xff]  ;;  %v6130_v19 = vcombine.low %v1664_v2, %v1672_v3  ;;  %v6132_v32 = vcombine.low %v1665_v4, %v1673_v5  ;;  %v6147_v34 = vcombine.high %v1680_v10, %v1688_v11  ;;  %v1696_v37 = vld [vmem:[%s8205_s3 + $0x1a0] sm:$0xff] }
 0x424   : > { %3282 = vmatprep.mubr.bf16.mxu1 %v8585_v41  ;;  %3395 = vmatprep.mubr.bf16.mxu0 %v8585_v41  ;;  %v6149_v35 = vcombine.high %v1681_v13, %v1689_v15  ;;  %v1728_v2 = vld [vmem:[%s8205_s3 + $0x2a0] sm:$0xff]  ;;  %v1729_v4 = vld [vmem:[%s8205_s3 + $0x2a8] sm:$0xff] }
 0x425   : > { %3283 = vmatmul.mubr.bf16.gmra.mrb[60].mxu1 %v8580_v36  ;;  %3396 = vmatmul.mubr.bf16.gmra.mrb[76].mxu0 %v8580_v36  ;;  %v1736_v3 = vld [vmem:[%s8205_s3 + $0x2e0] sm:$0xff]  ;;  %v1737_v5 = vld [vmem:[%s8205_s3 + $0x2e8] sm:$0xff] }
 0x426   : > { %3435 = vmatpush1.bf16.msra.mxu1 %v6334_v42  ;;  %3438 = vmatprep.mubr.bf16.mxu1 %v8473_v61  ;;  %v6146_v42 = vcombine.low %v1680_v10, %v1688_v11  ;;  %v1744_v10 = vld [vmem:[%s8205_s3 + $0x320] sm:$0xff] }
 0x427   : > { %3548 = vmatpush1.bf16.msra.mxu0 %v6336_v43  ;;  %3551 = vmatprep.mubr.bf16.mxu0 %v8473_v61  ;;  %v6148_v43 = vcombine.low %v1681_v13, %v1689_v15  ;;  %v1752_v11 = vld [vmem:[%s8205_s3 + $0x360] sm:$0xff]  ;;  %v1745_v13 = vld [vmem:[%s8205_s3 + $0x328] sm:$0xff] }
 0x428   : > { %3436 = vmatprep.subr.bf16.mxu1 %v6351_v44  ;;  %3549 = vmatprep.subr.bf16.mxu0 %v6353_v45  ;;  %v6163_v44 = vcombine.high %v1696_v37, %v1704_v38  ;;  %v6165_v45 = vcombine.high %v1697_v39, %v1705_v40  ;;  %v1753_v15 = vld [vmem:[%s8205_s3 + $0x368] sm:$0xff] }
 0x42a   : > { %3437 = vmatpush1.bf16.msra.mxu1 %v6350_v58  ;;  %v6162_v58 = vcombine.low %v1696_v37, %v1704_v38  ;;  %v1760_v37 = vld [vmem:[%s8205_s3 + $0x3a0] sm:$0xff] }
 0x42b   : > { %3550 = vmatpush1.bf16.msra.mxu0 %v6352_v60  ;;  %3632 = vmatprep.subr.bf16.mxu1 %v6115_v62  ;;  %v6164_v60 = vcombine.low %v1697_v39, %v1705_v40  ;;  %v6179_v62 = vcombine.high %v1712_v46, %v1720_v47  ;;  %v1768_v38 = vld [vmem:[%s8205_s3 + $0x3e0] sm:$0xff]  ;;  %v1761_v39 = vld [vmem:[%s8205_s3 + $0x3a8] sm:$0xff] }
 0x42c   : > { %3745 = vmatprep.subr.bf16.mxu0 %v6117_v0  ;;  %v6181_v0 = vcombine.high %v1713_v48, %v1721_v56  ;;  %v1769_v40 = vld [vmem:[%s8205_s3 + $0x3e8] sm:$0xff] }
 0x42d   : > { %3439 = vmatmul.mubr.bf16.vlgmr.msra.gmra.mrb[64].mxu1 %v8471_v59 }
 0x42e   : > { %3552 = vmatmul.mubr.bf16.vlgmr.msra.gmra.mrb[80].mxu0 %v8471_v59  ;;  %3448 = vmatprep.mubr.bf16.mxu1 %v8489_v18 }
 0x42f   : > { %3561 = vmatprep.mubr.bf16.mxu0 %v8489_v18  ;;  %3633 = vmatpush1.bf16.msra.mxu1 %v6114_v6  ;;  %v6178_v6 = vcombine.low %v1712_v46, %v1720_v47  ;;  %v1776_v46 = vld [vmem:[%s8205_s3 + $0x420] sm:$0xff] }
 0x430   : > { %3746 = vmatpush1.bf16.msra.mxu0 %v6116_v7  ;;  %3634 = vmatprep.subr.bf16.mxu1 %v6131_v8  ;;  %v6180_v7 = vcombine.low %v1713_v48, %v1721_v56  ;;  %v6195_v8 = vcombine.high %v1728_v2, %v1736_v3  ;;  %v1784_v47 = vld [vmem:[%s8205_s3 + $0x460] sm:$0xff]  ;;  %v1777_v48 = vld [vmem:[%s8205_s3 + $0x428] sm:$0xff] }
 0x431   : > { %3747 = vmatprep.subr.bf16.mxu0 %v6133_v9  ;;  %v6197_v9 = vcombine.high %v1729_v4, %v1737_v5  ;;  %v1785_v56 = vld [vmem:[%s8205_s3 + $0x468] sm:$0xff] }
 0x433   : > { %3635 = vmatpush1.bf16.msra.mxu1 %v6130_v19  ;;  %v6194_v19 = vcombine.low %v1728_v2, %v1736_v3  ;;  %v1792_v2 = vld [vmem:[%s8205_s3 + $0x4a0] sm:$0xff] }
 0x434   : > { %3748 = vmatpush1.bf16.msra.mxu0 %v6132_v32  ;;  %3636 = vmatprep.subr.bf16.mxu1 %v6147_v34  ;;  %v6196_v32 = vcombine.low %v1729_v4, %v1737_v5  ;;  %v6211_v34 = vcombine.high %v1744_v10, %v1752_v11  ;;  %v1800_v3 = vld [vmem:[%s8205_s3 + $0x4e0] sm:$0xff]  ;;  %v1793_v4 = vld [vmem:[%s8205_s3 + $0x4a8] sm:$0xff] }
 0x435   : > { %3449 = vmatmul.mubr.bf16.gmra.mrb[68].mxu1 %v8487_v16  ;;  %3749 = vmatprep.subr.bf16.mxu0 %v6149_v35  ;;  %v6213_v35 = vcombine.high %v1745_v13, %v1753_v15  ;;  %v1801_v5 = vld [vmem:[%s8205_s3 + $0x4e8] sm:$0xff] }
 0x436   : > { %3562 = vmatmul.mubr.bf16.gmra.mrb[84].mxu0 %v8487_v16  ;;  %3458 = vmatprep.mubr.bf16.mxu1 %v8505_v55 }
 0x437   : > { %3571 = vmatprep.mubr.bf16.mxu0 %v8505_v55  ;;  %3637 = vmatpush1.bf16.msra.mxu1 %v6146_v42  ;;  %v6210_v42 = vcombine.low %v1744_v10, %v1752_v11  ;;  %v1808_v10 = vld [vmem:[%s8205_s3 + $0x520] sm:$0xff] }
 0x438   : > { %3750 = vmatpush1.bf16.msra.mxu0 %v6148_v43  ;;  %3638 = vmatprep.subr.bf16.mxu1 %v6163_v44  ;;  %v6212_v43 = vcombine.low %v1745_v13, %v1753_v15  ;;  %v6227_v44 = vcombine.high %v1760_v37, %v1768_v38  ;;  %v1816_v11 = vld [vmem:[%s8205_s3 + $0x560] sm:$0xff]  ;;  %v1809_v13 = vld [vmem:[%s8205_s3 + $0x528] sm:$0xff] }
 0x439   : > { %3751 = vmatprep.subr.bf16.mxu0 %v6165_v45  ;;  %v6229_v45 = vcombine.high %v1761_v39, %v1769_v40  ;;  %v1817_v15 = vld [vmem:[%s8205_s3 + $0x568] sm:$0xff] }
 0x43b   : > { %3639 = vmatpush1.bf16.msra.mxu1 %v6162_v58  ;;  %v6226_v58 = vcombine.low %v1760_v37, %v1768_v38  ;;  %v1824_v37 = vld [vmem:[%s8205_s3 + $0x5a0] sm:$0xff] }
 0x43c   : > { %3752 = vmatpush1.bf16.msra.mxu0 %v6164_v60  ;;  %3640 = vmatprep.subr.bf16.mxu1 %v6179_v62  ;;  %v6228_v60 = vcombine.low %v1761_v39, %v1769_v40  ;;  %v6243_v62 = vcombine.high %v1776_v46, %v1784_v47  ;;  %v1832_v38 = vld [vmem:[%s8205_s3 + $0x5e0] sm:$0xff]  ;;  %v1825_v39 = vld [vmem:[%s8205_s3 + $0x5a8] sm:$0xff] }
 0x43d   : > { %3459 = vmatmul.mubr.bf16.gmra.mrb[72].mxu1 %v8503_v51  ;;  %3753 = vmatprep.subr.bf16.mxu0 %v6181_v0  ;;  %v6245_v0 = vcombine.high %v1777_v48, %v1785_v56  ;;  %v1833_v40 = vld [vmem:[%s8205_s3 + $0x5e8] sm:$0xff] }
 0x43e   : > { %3572 = vmatmul.mubr.bf16.gmra.mrb[88].mxu0 %v8503_v51  ;;  %3468 = vmatprep.mubr.bf16.mxu1 %v8521_v17 }
 0x43f   : > { %3581 = vmatprep.mubr.bf16.mxu0 %v8521_v17  ;;  %3641 = vmatpush1.bf16.msra.mxu1 %v6178_v6  ;;  %v6242_v6 = vcombine.low %v1776_v46, %v1784_v47  ;;  %v1840_v46 = vld [vmem:[%s8205_s3 + $0x620] sm:$0xff] }
 0x440   : > { %3754 = vmatpush1.bf16.msra.mxu0 %v6180_v7  ;;  %3642 = vmatprep.subr.bf16.mxu1 %v6195_v8  ;;  %v6244_v7 = vcombine.low %v1777_v48, %v1785_v56  ;;  %v6259_v8 = vcombine.high %v1792_v2, %v1800_v3  ;;  %v1848_v47 = vld [vmem:[%s8205_s3 + $0x660] sm:$0xff]  ;;  %v1841_v48 = vld [vmem:[%s8205_s3 + $0x628] sm:$0xff] }
 0x441   : > { %3755 = vmatprep.subr.bf16.mxu0 %v6197_v9  ;;  %v6261_v9 = vcombine.high %v1793_v4, %v1801_v5  ;;  %v1849_v56 = vld [vmem:[%s8205_s3 + $0x668] sm:$0xff] }
 0x443   : > { %3643 = vmatpush1.bf16.msra.mxu1 %v6194_v19  ;;  %v6258_v19 = vcombine.low %v1792_v2, %v1800_v3  ;;  %v1856_v2 = vld [vmem:[%s8205_s3 + $0x6a0] sm:$0xff] }
 0x444   : > { %3756 = vmatpush1.bf16.msra.mxu0 %v6196_v32  ;;  %3644 = vmatprep.subr.bf16.mxu1 %v6211_v34  ;;  %v6260_v32 = vcombine.low %v1793_v4, %v1801_v5  ;;  %v6275_v34 = vcombine.high %v1808_v10, %v1816_v11  ;;  %v1864_v3 = vld [vmem:[%s8205_s3 + $0x6e0] sm:$0xff]  ;;  %v1857_v4 = vld [vmem:[%s8205_s3 + $0x6a8] sm:$0xff] }
 0x445   : > { %3469 = vmatmul.mubr.bf16.gmra.mrb[76].mxu1 %v8519_v14  ;;  %3757 = vmatprep.subr.bf16.mxu0 %v6213_v35  ;;  %v6277_v35 = vcombine.high %v1809_v13, %v1817_v15  ;;  %v1865_v5 = vld [vmem:[%s8205_s3 + $0x6e8] sm:$0xff] }
 0x446   : > { %3582 = vmatmul.mubr.bf16.gmra.mrb[92].mxu0 %v8519_v14  ;;  %3478 = vmatprep.mubr.bf16.mxu1 %v8537_v57 }
 0x447   : > { %3591 = vmatprep.mubr.bf16.mxu0 %v8537_v57  ;;  %3645 = vmatpush1.bf16.msra.mxu1 %v6210_v42  ;;  %v6274_v42 = vcombine.low %v1808_v10, %v1816_v11  ;;  %v1872_v10 = vld [vmem:[%s8205_s3 + $0x720] sm:$0xff] }
 0x448   : > { %3758 = vmatpush1.bf16.msra.mxu0 %v6212_v43  ;;  %3646 = vmatprep.subr.bf16.mxu1 %v6227_v44  ;;  %v6276_v43 = vcombine.low %v1809_v13, %v1817_v15  ;;  %v6291_v44 = vcombine.high %v1824_v37, %v1832_v38  ;;  %v1880_v11 = vld [vmem:[%s8205_s3 + $0x760] sm:$0xff]  ;;  %v1873_v13 = vld [vmem:[%s8205_s3 + $0x728] sm:$0xff] }
 0x449   : > { %3759 = vmatprep.subr.bf16.mxu0 %v6229_v45  ;;  %v6293_v45 = vcombine.high %v1825_v39, %v1833_v40  ;;  %v1881_v15 = vld [vmem:[%s8205_s3 + $0x768] sm:$0xff] }
 0x44b   : > { %3647 = vmatpush1.bf16.msra.mxu1 %v6226_v58  ;;  %v6290_v58 = vcombine.low %v1824_v37, %v1832_v38  ;;  %v1888_v37 = vld [vmem:[%s8205_s3 + $0x7a0] sm:$0xff] }
 0x44c   : > { %3760 = vmatpush1.bf16.msra.mxu0 %v6228_v60  ;;  %3648 = vmatprep.subr.bf16.mxu1 %v6243_v62  ;;  %v6292_v60 = vcombine.low %v1825_v39, %v1833_v40  ;;  %v6307_v62 = vcombine.high %v1840_v46, %v1848_v47  ;;  %v1896_v38 = vld [vmem:[%s8205_s3 + $0x7e0] sm:$0xff]  ;;  %v1889_v39 = vld [vmem:[%s8205_s3 + $0x7a8] sm:$0xff] }
 0x44d   : > { %3479 = vmatmul.mubr.bf16.gmra.mrb[80].mxu1 %v8535_v53  ;;  %3761 = vmatprep.subr.bf16.mxu0 %v6245_v0  ;;  %v6309_v0 = vcombine.high %v1841_v48, %v1849_v56  ;;  %v1897_v40 = vld [vmem:[%s8205_s3 + $0x7e8] sm:$0xff] }
 0x44e   : > { %3592 = vmatmul.mubr.bf16.gmra.mrb[96].mxu0 %v8535_v53  ;;  %3488 = vmatprep.mubr.bf16.mxu1 %v8553_v33 }
 0x44f   : > { %3601 = vmatprep.mubr.bf16.mxu0 %v8553_v33  ;;  %3649 = vmatpush1.bf16.msra.mxu1 %v6242_v6  ;;  %v6306_v6 = vcombine.low %v1840_v46, %v1848_v47  ;;  %v1650_v46 = vld [vmem:[%s8205_s3 + $0x30] sm:$0xff] }
 0x450   : > { %3762 = vmatpush1.bf16.msra.mxu0 %v6244_v7  ;;  %3650 = vmatprep.subr.bf16.mxu1 %v6259_v8  ;;  %v6308_v7 = vcombine.low %v1841_v48, %v1849_v56  ;;  %v6323_v8 = vcombine.high %v1856_v2, %v1864_v3  ;;  %v1658_v47 = vld [vmem:[%s8205_s3 + $0x70] sm:$0xff]  ;;  %v1651_v48 = vld [vmem:[%s8205_s3 + $0x38] sm:$0xff] }
 0x451   : > { %3763 = vmatprep.subr.bf16.mxu0 %v6261_v9  ;;  %v6325_v9 = vcombine.high %v1857_v4, %v1865_v5  ;;  %v1659_v56 = vld [vmem:[%s8205_s3 + $0x78] sm:$0xff] }
 0x453   : > { %3651 = vmatpush1.bf16.msra.mxu1 %v6258_v19  ;;  %v6322_v19 = vcombine.low %v1856_v2, %v1864_v3  ;;  %v1666_v2 = vld [vmem:[%s8205_s3 + $0xb0] sm:$0xff] }
 0x454   : > { %3764 = vmatpush1.bf16.msra.mxu0 %v6260_v32  ;;  %3652 = vmatprep.subr.bf16.mxu1 %v6275_v34  ;;  %v6324_v32 = vcombine.low %v1857_v4, %v1865_v5  ;;  %v6339_v34 = vcombine.high %v1872_v10, %v1880_v11  ;;  %v1674_v3 = vld [vmem:[%s8205_s3 + $0xf0] sm:$0xff]  ;;  %v1667_v4 = vld [vmem:[%s8205_s3 + $0xb8] sm:$0xff] }
 0x455   : > { %3489 = vmatmul.mubr.bf16.gmra.mrb[84].mxu1 %v8551_v20  ;;  %3765 = vmatprep.subr.bf16.mxu0 %v6277_v35  ;;  %v6341_v35 = vcombine.high %v1873_v13, %v1881_v15  ;;  %v1675_v5 = vld [vmem:[%s8205_s3 + $0xf8] sm:$0xff] }
 0x456   : > { %3602 = vmatmul.mubr.bf16.gmra.mrb[100].mxu0 %v8551_v20  ;;  %3498 = vmatprep.mubr.bf16.mxu1 %v8569_v1 }
 0x457   : > { %3611 = vmatprep.mubr.bf16.mxu0 %v8569_v1  ;;  %3653 = vmatpush1.bf16.msra.mxu1 %v6274_v42  ;;  %v6338_v42 = vcombine.low %v1872_v10, %v1880_v11  ;;  %v1682_v10 = vld [vmem:[%s8205_s3 + $0x130] sm:$0xff] }
 0x458   : > { %3766 = vmatpush1.bf16.msra.mxu0 %v6276_v43  ;;  %3654 = vmatprep.subr.bf16.mxu1 %v6291_v44  ;;  %v6340_v43 = vcombine.low %v1873_v13, %v1881_v15  ;;  %v6355_v44 = vcombine.high %v1888_v37, %v1896_v38  ;;  %v1690_v11 = vld [vmem:[%s8205_s3 + $0x170] sm:$0xff]  ;;  %v1683_v13 = vld [vmem:[%s8205_s3 + $0x138] sm:$0xff] }
 0x459   : > { %3767 = vmatprep.subr.bf16.mxu0 %v6293_v45  ;;  %v6357_v45 = vcombine.high %v1889_v39, %v1897_v40  ;;  %v1691_v15 = vld [vmem:[%s8205_s3 + $0x178] sm:$0xff] }
 0x45b   : > { %3655 = vmatpush1.bf16.msra.mxu1 %v6290_v58  ;;  %v6354_v58 = vcombine.low %v1888_v37, %v1896_v38  ;;  %v1698_v37 = vld [vmem:[%s8205_s3 + $0x1b0] sm:$0xff] }
 0x45c   : > { %3768 = vmatpush1.bf16.msra.mxu0 %v6292_v60  ;;  %3656 = vmatprep.subr.bf16.mxu1 %v6307_v62  ;;  %v6356_v60 = vcombine.low %v1889_v39, %v1897_v40  ;;  %v6119_v62 = vcombine.high %v1650_v46, %v1658_v47  ;;  %v1706_v38 = vld [vmem:[%s8205_s3 + $0x1f0] sm:$0xff]  ;;  %v1699_v39 = vld [vmem:[%s8205_s3 + $0x1b8] sm:$0xff] }
 0x45d   : > { %3499 = vmatmul.mubr.bf16.gmra.mrb[88].mxu1 %v8567_v63  ;;  %3769 = vmatprep.subr.bf16.mxu0 %v6309_v0  ;;  %v6121_v0 = vcombine.high %v1651_v48, %v1659_v56  ;;  %v1707_v40 = vld [vmem:[%s8205_s3 + $0x1f8] sm:$0xff] }
 0x45e   : > { %3612 = vmatmul.mubr.bf16.gmra.mrb[104].mxu0 %v8567_v63  ;;  %3508 = vmatprep.mubr.bf16.mxu1 %v8585_v41 }
 0x45f   : > { %3621 = vmatprep.mubr.bf16.mxu0 %v8585_v41  ;;  %3657 = vmatpush1.bf16.msra.mxu1 %v6306_v6  ;;  %v6118_v6 = vcombine.low %v1650_v46, %v1658_v47  ;;  %v1714_v46 = vld [vmem:[%s8205_s3 + $0x230] sm:$0xff] }
 0x460   : > { %3770 = vmatpush1.bf16.msra.mxu0 %v6308_v7  ;;  %3658 = vmatprep.subr.bf16.mxu1 %v6323_v8  ;;  %v6120_v7 = vcombine.low %v1651_v48, %v1659_v56  ;;  %v6135_v8 = vcombine.high %v1666_v2, %v1674_v3  ;;  %v1722_v47 = vld [vmem:[%s8205_s3 + $0x270] sm:$0xff]  ;;  %v1715_v48 = vld [vmem:[%s8205_s3 + $0x238] sm:$0xff] }
 0x461   : > { %3771 = vmatprep.subr.bf16.mxu0 %v6325_v9  ;;  %v6137_v9 = vcombine.high %v1667_v4, %v1675_v5  ;;  %v1723_v56 = vld [vmem:[%s8205_s3 + $0x278] sm:$0xff] }
 0x463   : > { %3659 = vmatpush1.bf16.msra.mxu1 %v6322_v19  ;;  %v6134_v19 = vcombine.low %v1666_v2, %v1674_v3  ;;  %v1730_v2 = vld [vmem:[%s8205_s3 + $0x2b0] sm:$0xff] }
 0x464   : > { %3772 = vmatpush1.bf16.msra.mxu0 %v6324_v32  ;;  %3660 = vmatprep.subr.bf16.mxu1 %v6339_v34  ;;  %v6136_v32 = vcombine.low %v1667_v4, %v1675_v5  ;;  %v6151_v34 = vcombine.high %v1682_v10, %v1690_v11  ;;  %v1738_v3 = vld [vmem:[%s8205_s3 + $0x2f0] sm:$0xff]  ;;  %v1731_v4 = vld [vmem:[%s8205_s3 + $0x2b8] sm:$0xff] }
 0x465   : > { %3509 = vmatmul.mubr.bf16.gmra.mrb[92].mxu1 %v8580_v36  ;;  %3773 = vmatprep.subr.bf16.mxu0 %v6341_v35  ;;  %v6153_v35 = vcombine.high %v1683_v13, %v1691_v15  ;;  %v1739_v5 = vld [vmem:[%s8205_s3 + $0x2f8] sm:$0xff] }
 0x466   : > { %3622 = vmatmul.mubr.bf16.gmra.mrb[108].mxu0 %v8580_v36  ;;  %3664 = vmatprep.mubr.bf16.mxu1 %v8473_v61 }
 0x467   : > { %3661 = vmatpush1.bf16.msra.mxu1 %v6338_v42  ;;  %3777 = vmatprep.mubr.bf16.mxu0 %v8473_v61  ;;  %v6150_v42 = vcombine.low %v1682_v10, %v1690_v11  ;;  %v1746_v10 = vld [vmem:[%s8205_s3 + $0x330] sm:$0xff] }
 0x468   : > { %3774 = vmatpush1.bf16.msra.mxu0 %v6340_v43  ;;  %3662 = vmatprep.subr.bf16.mxu1 %v6355_v44  ;;  %v6152_v43 = vcombine.low %v1683_v13, %v1691_v15  ;;  %v6167_v44 = vcombine.high %v1698_v37, %v1706_v38  ;;  %v1754_v11 = vld [vmem:[%s8205_s3 + $0x370] sm:$0xff]  ;;  %v1747_v13 = vld [vmem:[%s8205_s3 + $0x338] sm:$0xff] }
 0x469   : > { %3775 = vmatprep.subr.bf16.mxu0 %v6357_v45  ;;  %v6169_v45 = vcombine.high %v1699_v39, %v1707_v40  ;;  %v1755_v15 = vld [vmem:[%s8205_s3 + $0x378] sm:$0xff] }
 0x46b   : > { %3663 = vmatpush1.bf16.msra.mxu1 %v6354_v58  ;;  %v6166_v58 = vcombine.low %v1698_v37, %v1706_v38  ;;  %v1762_v37 = vld [vmem:[%s8205_s3 + $0x3b0] sm:$0xff] }
 0x46c   : > { %3776 = vmatpush1.bf16.msra.mxu0 %v6356_v60  ;;  %3858 = vmatprep.subr.bf16.mxu1 %v6119_v62  ;;  %v6168_v60 = vcombine.low %v1699_v39, %v1707_v40  ;;  %v6183_v62 = vcombine.high %v1714_v46, %v1722_v47  ;;  %v1770_v38 = vld [vmem:[%s8205_s3 + $0x3f0] sm:$0xff]  ;;  %v1763_v39 = vld [vmem:[%s8205_s3 + $0x3b8] sm:$0xff] }
 0x46d   : > { %3971 = vmatprep.subr.bf16.mxu0 %v6121_v0  ;;  %v6185_v0 = vcombine.high %v1715_v48, %v1723_v56  ;;  %v1771_v40 = vld [vmem:[%s8205_s3 + $0x3f8] sm:$0xff] }
 0x46e   : > { %3665 = vmatmul.mubr.bf16.vlgmr.msra.gmra.mrb[96].mxu1 %v8471_v59 }
 0x46f   : > { %3778 = vmatmul.mubr.bf16.vlgmr.msra.gmra.mrb[112].mxu0 %v8471_v59  ;;  %3674 = vmatprep.mubr.bf16.mxu1 %v8489_v18 }
 0x470   : > { %3787 = vmatprep.mubr.bf16.mxu0 %v8489_v18  ;;  %3859 = vmatpush1.bf16.msra.mxu1 %v6118_v6  ;;  %v6182_v6 = vcombine.low %v1714_v46, %v1722_v47  ;;  %v1778_v46 = vld [vmem:[%s8205_s3 + $0x430] sm:$0xff] }
 0x471   : > { %3972 = vmatpush1.bf16.msra.mxu0 %v6120_v7  ;;  %3860 = vmatprep.subr.bf16.mxu1 %v6135_v8  ;;  %v6184_v7 = vcombine.low %v1715_v48, %v1723_v56  ;;  %v6199_v8 = vcombine.high %v1730_v2, %v1738_v3  ;;  %v1786_v47 = vld [vmem:[%s8205_s3 + $0x470] sm:$0xff]  ;;  %v1779_v48 = vld [vmem:[%s8205_s3 + $0x438] sm:$0xff] }
 0x472   : > { %3973 = vmatprep.subr.bf16.mxu0 %v6137_v9  ;;  %v6201_v9 = vcombine.high %v1731_v4, %v1739_v5  ;;  %v1787_v56 = vld [vmem:[%s8205_s3 + $0x478] sm:$0xff] }
 0x474   : > { %3861 = vmatpush1.bf16.msra.mxu1 %v6134_v19  ;;  %v6198_v19 = vcombine.low %v1730_v2, %v1738_v3  ;;  %v1794_v2 = vld [vmem:[%s8205_s3 + $0x4b0] sm:$0xff] }
 0x475   : > { %3974 = vmatpush1.bf16.msra.mxu0 %v6136_v32  ;;  %3862 = vmatprep.subr.bf16.mxu1 %v6151_v34  ;;  %v6200_v32 = vcombine.low %v1731_v4, %v1739_v5  ;;  %v6215_v34 = vcombine.high %v1746_v10, %v1754_v11  ;;  %v1802_v3 = vld [vmem:[%s8205_s3 + $0x4f0] sm:$0xff]  ;;  %v1795_v4 = vld [vmem:[%s8205_s3 + $0x4b8] sm:$0xff] }
 0x476   : > { %3675 = vmatmul.mubr.bf16.gmra.mrb[100].mxu1 %v8487_v16  ;;  %3975 = vmatprep.subr.bf16.mxu0 %v6153_v35  ;;  %v6217_v35 = vcombine.high %v1747_v13, %v1755_v15  ;;  %v1803_v5 = vld [vmem:[%s8205_s3 + $0x4f8] sm:$0xff] }
 0x477   : > { %3788 = vmatmul.mubr.bf16.gmra.mrb[116].mxu0 %v8487_v16  ;;  %3684 = vmatprep.mubr.bf16.mxu1 %v8505_v55 }
 0x478   : > { %3797 = vmatprep.mubr.bf16.mxu0 %v8505_v55  ;;  %3863 = vmatpush1.bf16.msra.mxu1 %v6150_v42  ;;  %v6214_v42 = vcombine.low %v1746_v10, %v1754_v11  ;;  %v1810_v10 = vld [vmem:[%s8205_s3 + $0x530] sm:$0xff] }
 0x479   : > { %3976 = vmatpush1.bf16.msra.mxu0 %v6152_v43  ;;  %3864 = vmatprep.subr.bf16.mxu1 %v6167_v44  ;;  %v6216_v43 = vcombine.low %v1747_v13, %v1755_v15  ;;  %v6231_v44 = vcombine.high %v1762_v37, %v1770_v38  ;;  %v1818_v11 = vld [vmem:[%s8205_s3 + $0x570] sm:$0xff]  ;;  %v1811_v13 = vld [vmem:[%s8205_s3 + $0x538] sm:$0xff] }
 0x47a   : > { %3977 = vmatprep.subr.bf16.mxu0 %v6169_v45  ;;  %v6233_v45 = vcombine.high %v1763_v39, %v1771_v40  ;;  %v1819_v15 = vld [vmem:[%s8205_s3 + $0x578] sm:$0xff] }
 0x47c   : > { %3865 = vmatpush1.bf16.msra.mxu1 %v6166_v58  ;;  %v6230_v58 = vcombine.low %v1762_v37, %v1770_v38  ;;  %v1826_v37 = vld [vmem:[%s8205_s3 + $0x5b0] sm:$0xff] }
 0x47d   : > { %3978 = vmatpush1.bf16.msra.mxu0 %v6168_v60  ;;  %3866 = vmatprep.subr.bf16.mxu1 %v6183_v62  ;;  %v6232_v60 = vcombine.low %v1763_v39, %v1771_v40  ;;  %v6247_v62 = vcombine.high %v1778_v46, %v1786_v47  ;;  %v1834_v38 = vld [vmem:[%s8205_s3 + $0x5f0] sm:$0xff]  ;;  %v1827_v39 = vld [vmem:[%s8205_s3 + $0x5b8] sm:$0xff] }
 0x47e   : > { %3685 = vmatmul.mubr.bf16.gmra.mrb[104].mxu1 %v8503_v51  ;;  %3979 = vmatprep.subr.bf16.mxu0 %v6185_v0  ;;  %v6249_v0 = vcombine.high %v1779_v48, %v1787_v56  ;;  %v1835_v40 = vld [vmem:[%s8205_s3 + $0x5f8] sm:$0xff] }
 0x47f   : > { %3798 = vmatmul.mubr.bf16.gmra.mrb[120].mxu0 %v8503_v51  ;;  %3694 = vmatprep.mubr.bf16.mxu1 %v8521_v17 }
 0x480   : > { %3807 = vmatprep.mubr.bf16.mxu0 %v8521_v17  ;;  %3867 = vmatpush1.bf16.msra.mxu1 %v6182_v6  ;;  %v6246_v6 = vcombine.low %v1778_v46, %v1786_v47  ;;  %v1842_v46 = vld [vmem:[%s8205_s3 + $0x630] sm:$0xff] }
 0x481   : > { %3980 = vmatpush1.bf16.msra.mxu0 %v6184_v7  ;;  %3868 = vmatprep.subr.bf16.mxu1 %v6199_v8  ;;  %v6248_v7 = vcombine.low %v1779_v48, %v1787_v56  ;;  %v6263_v8 = vcombine.high %v1794_v2, %v1802_v3  ;;  %v1850_v47 = vld [vmem:[%s8205_s3 + $0x670] sm:$0xff]  ;;  %v1843_v48 = vld [vmem:[%s8205_s3 + $0x638] sm:$0xff] }
 0x482   : > { %3981 = vmatprep.subr.bf16.mxu0 %v6201_v9  ;;  %v6265_v9 = vcombine.high %v1795_v4, %v1803_v5  ;;  %v1851_v56 = vld [vmem:[%s8205_s3 + $0x678] sm:$0xff] }
 0x484   : > { %3869 = vmatpush1.bf16.msra.mxu1 %v6198_v19  ;;  %v6262_v19 = vcombine.low %v1794_v2, %v1802_v3  ;;  %v1858_v2 = vld [vmem:[%s8205_s3 + $0x6b0] sm:$0xff] }
 0x485   : > { %3982 = vmatpush1.bf16.msra.mxu0 %v6200_v32  ;;  %3870 = vmatprep.subr.bf16.mxu1 %v6215_v34  ;;  %v6264_v32 = vcombine.low %v1795_v4, %v1803_v5  ;;  %v6279_v34 = vcombine.high %v1810_v10, %v1818_v11  ;;  %v1866_v3 = vld [vmem:[%s8205_s3 + $0x6f0] sm:$0xff]  ;;  %v1859_v4 = vld [vmem:[%s8205_s3 + $0x6b8] sm:$0xff] }
 0x486   : > { %3695 = vmatmul.mubr.bf16.gmra.mrb[108].mxu1 %v8519_v14  ;;  %3983 = vmatprep.subr.bf16.mxu0 %v6217_v35  ;;  %v6281_v35 = vcombine.high %v1811_v13, %v1819_v15  ;;  %v1867_v5 = vld [vmem:[%s8205_s3 + $0x6f8] sm:$0xff] }
 0x487   : > { %3808 = vmatmul.mubr.bf16.gmra.mrb[124].mxu0 %v8519_v14  ;;  %3704 = vmatprep.mubr.bf16.mxu1 %v8537_v57 }
 0x488   : > { %3817 = vmatprep.mubr.bf16.mxu0 %v8537_v57  ;;  %3871 = vmatpush1.bf16.msra.mxu1 %v6214_v42  ;;  %v6278_v42 = vcombine.low %v1810_v10, %v1818_v11  ;;  %v1874_v10 = vld [vmem:[%s8205_s3 + $0x730] sm:$0xff] }
 0x489   : > { %3984 = vmatpush1.bf16.msra.mxu0 %v6216_v43  ;;  %3872 = vmatprep.subr.bf16.mxu1 %v6231_v44  ;;  %v6280_v43 = vcombine.low %v1811_v13, %v1819_v15  ;;  %v6295_v44 = vcombine.high %v1826_v37, %v1834_v38  ;;  %v1882_v11 = vld [vmem:[%s8205_s3 + $0x770] sm:$0xff]  ;;  %v1875_v13 = vld [vmem:[%s8205_s3 + $0x738] sm:$0xff] }
 0x48a   : > { %3985 = vmatprep.subr.bf16.mxu0 %v6233_v45  ;;  %v6297_v45 = vcombine.high %v1827_v39, %v1835_v40  ;;  %v1883_v15 = vld [vmem:[%s8205_s3 + $0x778] sm:$0xff] }
 0x48c   : > { %3873 = vmatpush1.bf16.msra.mxu1 %v6230_v58  ;;  %v6294_v58 = vcombine.low %v1826_v37, %v1834_v38  ;;  %v1890_v37 = vld [vmem:[%s8205_s3 + $0x7b0] sm:$0xff] }
 0x48d   : > { %3986 = vmatpush1.bf16.msra.mxu0 %v6232_v60  ;;  %3874 = vmatprep.subr.bf16.mxu1 %v6247_v62  ;;  %v6296_v60 = vcombine.low %v1827_v39, %v1835_v40  ;;  %v6311_v62 = vcombine.high %v1842_v46, %v1850_v47  ;;  %v1898_v38 = vld [vmem:[%s8205_s3 + $0x7f0] sm:$0xff]  ;;  %v1891_v39 = vld [vmem:[%s8205_s3 + $0x7b8] sm:$0xff] }
 0x48e   : > { %3705 = vmatmul.mubr.bf16.gmra.mrb[112].mxu1 %v8535_v53  ;;  %3987 = vmatprep.subr.bf16.mxu0 %v6249_v0  ;;  %v6313_v0 = vcombine.high %v1843_v48, %v1851_v56  ;;  %v1899_v40 = vld [vmem:[%s8205_s3 + $0x7f8] sm:$0xff] }
 0x48f   : > { %3818 = vmatmul.mubr.bf16.gmra.mrb[128].mxu0 %v8535_v53  ;;  %3714 = vmatprep.mubr.bf16.mxu1 %v8553_v33 }
 0x490   : > { %3827 = vmatprep.mubr.bf16.mxu0 %v8553_v33  ;;  %3875 = vmatpush1.bf16.msra.mxu1 %v6246_v6  ;;  %v6310_v6 = vcombine.low %v1842_v46, %v1850_v47  ;;  %v6358_v46 = vcombine.low %v1890_v37, %v1898_v38  ;;  %v6360_v47 = vcombine.low %v1891_v39, %v1899_v40 }
 0x491   : > { %3988 = vmatpush1.bf16.msra.mxu0 %v6248_v7  ;;  %3876 = vmatprep.subr.bf16.mxu1 %v6263_v8  ;;  %v6312_v7 = vcombine.low %v1843_v48, %v1851_v56  ;;  %v6327_v8 = vcombine.high %v1858_v2, %v1866_v3  ;;  %v6401_v48 = vld [vmem:[#allocation13 + $0x40] sm:$0xff]  }
 0x492   : > { %3989 = vmatprep.subr.bf16.mxu0 %v6265_v9  ;;  %v6329_v9 = vcombine.high %v1859_v4, %v1867_v5 }
 0x494   : > { %3877 = vmatpush1.bf16.msra.mxu1 %v6262_v19  ;;  %v6326_v19 = vcombine.low %v1858_v2, %v1866_v3  ;;  %v6403_v2 = vunpack.c.h.bf16 %v6401_v48 }
 0x495   : > { %3990 = vmatpush1.bf16.msra.mxu0 %v6264_v32  ;;  %3878 = vmatprep.subr.bf16.mxu1 %v6279_v34  ;;  %v6328_v32 = vcombine.low %v1859_v4, %v1867_v5  ;;  %v6343_v34 = vcombine.high %v1874_v10, %v1882_v11 }
 0x496   : > { %3715 = vmatmul.mubr.bf16.gmra.mrb[116].mxu1 %v8551_v20  ;;  %3991 = vmatprep.subr.bf16.mxu0 %v6281_v35  ;;  %v6345_v35 = vcombine.high %v1875_v13, %v1883_v15 }
 0x497   : > { %3828 = vmatmul.mubr.bf16.gmra.mrb[132].mxu0 %v8551_v20  ;;  %3724 = vmatprep.mubr.bf16.mxu1 %v8569_v1 }
 0x498   : > { %3837 = vmatprep.mubr.bf16.mxu0 %v8569_v1  ;;  %3879 = vmatpush1.bf16.msra.mxu1 %v6278_v42  ;;  %v6342_v42 = vcombine.low %v1874_v10, %v1882_v11  ;;  %v6880_v10 = vld [vmem:[#allocation13 + $0x8] sm:$0xff]  }
 0x499   : > { %3992 = vmatpush1.bf16.msra.mxu0 %v6280_v43  ;;  %3880 = vmatprep.subr.bf16.mxu1 %v6295_v44  ;;  %v6344_v43 = vcombine.low %v1875_v13, %v1883_v15  ;;  %v6359_v44 = vcombine.high %v1890_v37, %v1898_v38  ;;  %v6887_v11 = vld [vmem:[#allocation13 + $0x48] sm:$0xff]   ;;  %v6374_v38 = vunpack.c.l.bf16 %v6880_v10 }
 0x49a   : > { %3993 = vmatprep.subr.bf16.mxu0 %v6297_v45  ;;  %v6361_v45 = vcombine.high %v1891_v39, %v1899_v40  ;;  %v6894_v37 = vld [vmem:[#allocation13 + $0x88] sm:$0xff]  }
 0x49c   : > { %3881 = vmatpush1.bf16.msra.mxu1 %v6294_v58  ;;  %v6433_v58 = vld [vmem:[#allocation13 + $0x80] sm:$0xff]  }
 0x49d   : > { %3994 = vmatpush1.bf16.msra.mxu0 %v6296_v60  ;;  %3882 = vmatprep.subr.bf16.mxu1 %v6311_v62  ;;  %v6402_v60 = vunpack.c.l.bf16 %v6401_v48 }
 0x49e   : > { %3725 = vmatmul.mubr.bf16.gmra.mrb[120].mxu1 %v8567_v63  ;;  %3995 = vmatprep.subr.bf16.mxu0 %v6313_v0 }
 0x49f   : > { %3838 = vmatmul.mubr.bf16.gmra.mrb[136].mxu0 %v8567_v63  ;;  %3734 = vmatprep.mubr.bf16.mxu1 %v8585_v41 }
 0x4a0   : > { %3847 = vmatprep.mubr.bf16.mxu0 %v8585_v41  ;;  %3883 = vmatpush1.bf16.msra.mxu1 %v6310_v6 }
 0x4a1   : > { %3996 = vmatpush1.bf16.msra.mxu0 %v6312_v7  ;;  %3884 = vmatprep.subr.bf16.mxu1 %v6327_v8 }
 0x4a2   : > { %3997 = vmatprep.subr.bf16.mxu0 %v6329_v9  ;;  %v6435_v9 = vunpack.c.h.bf16 %v6433_v58 }
 0x4a4   : > { %3885 = vmatpush1.bf16.msra.mxu1 %v6326_v19 }
 0x4a5   : > { %3998 = vmatpush1.bf16.msra.mxu0 %v6328_v32  ;;  %3886 = vmatprep.subr.bf16.mxu1 %v6343_v34 }
 0x4a6   : > { %3735 = vmatmul.mubr.bf16.gmra.mrb[124].mxu1 %v8580_v36  ;;  %3999 = vmatprep.subr.bf16.mxu0 %v6345_v35 }
 0x4a7   : > { %3848 = vmatmul.mubr.bf16.gmra.mrb[140].mxu0 %v8580_v36  ;;  %3890 = vmatprep.mubr.bf16.mxu1 %v8473_v61 }
 0x4a8   : > { %3887 = vmatpush1.bf16.msra.mxu1 %v6342_v42  ;;  %4003 = vmatprep.mubr.bf16.mxu0 %v8473_v61  ;;  %v6369_v61 = vld [vmem:[#allocation13] sm:$0xff]  }
 0x4a9   : > { %4000 = vmatpush1.bf16.msra.mxu0 %v6344_v43  ;;  %3888 = vmatprep.subr.bf16.mxu1 %v6359_v44  ;;  %v6370_v56 = vunpack.c.l.bf16 %v6369_v61  ;;  %v6371_v62 = vunpack.c.h.bf16 %v6369_v61  ;;  %v6438_v44 = vunpack.c.l.bf16 %v6894_v37 }
 0x4aa   : > { %4001 = vmatprep.subr.bf16.mxu0 %v6361_v45  ;;  %v6901_v45 = vld [vmem:[#allocation13 + $0xc8] sm:$0xff]  }
 0x4ac   : > { %3889 = vmatpush1.bf16.msra.mxu1 %v6358_v46  ;;  %v6375_v46 = vunpack.c.h.bf16 %v6880_v10 }
 0x4ad   : > { %4002 = vmatpush1.bf16.msra.mxu0 %v6360_v47 }
 0x4af   : > { %3891 = vmatmul.mubr.bf16.vlgmr.msra.gmra.mrb[128].mxu1 %v8471_v59 }
 0x4b0   : > { %4004 = vmatmul.mubr.bf16.vlgmr.msra.gmra.mrb[144].mxu0 %v8471_v59  ;;  %3900 = vmatprep.mubr.bf16.mxu1 %v8489_v18  ;;  %v6465_v59 = vld [vmem:[#allocation13 + $0xc0] sm:$0xff]  }
 0x4b1   : > { %4013 = vmatprep.mubr.bf16.mxu0 %v8489_v18  ;;  %v6466_v6 = vunpack.c.l.bf16 %v6465_v59  ;;  %v6467_v35 = vunpack.c.h.bf16 %v6465_v59 }
 0x4b7   : > { %3901 = vmatmul.mubr.bf16.gmra.mrb[132].mxu1 %v8487_v16 }
 0x4b8   : > { %4014 = vmatmul.mubr.bf16.gmra.mrb[148].mxu0 %v8487_v16  ;;  %3910 = vmatprep.mubr.bf16.mxu1 %v8505_v55  ;;  %v6434_v16 = vunpack.c.l.bf16 %v6433_v58 }
 0x4b9   : > { %4023 = vmatprep.mubr.bf16.mxu0 %v8505_v55 }
 0x4bf   : > { %3911 = vmatmul.mubr.bf16.gmra.mrb[136].mxu1 %v8503_v51 }
 0x4c0   : > { %4024 = vmatmul.mubr.bf16.gmra.mrb[152].mxu0 %v8503_v51  ;;  %3920 = vmatprep.mubr.bf16.mxu1 %v8521_v17  ;;  %v3214_v18 = vpop.f32.mrb[32].mxu1  ;;  %v3327_v0 = vpop.f32.mrb[48].mxu0 }
 0x4c1   : > { %4033 = vmatprep.mubr.bf16.mxu0 %v8521_v17  ;;  %v4116_v55 = vmul.f32 %v6370_v56, %v3214_v18  ;;  %v3216_v3 = vpop.f32.mrb[33].mxu1  ;;  %v3329_v4 = vpop.f32.mrb[49].mxu0  ;;  %v4230_v19 = vmul.f32 %v6434_v16, %v3327_v0  ;;  %v6406_v17 = vunpack.c.l.bf16 %v6887_v11 }
 0x4c2   : > { %v4165_v5 = vmul.f32 %v6402_v60, %v3216_v3  ;;  %v3218_v7 = vpop.f32.mrb[34].mxu1  ;;  %v3331_v8 = vpop.f32.mrb[50].mxu0  ;;  %v4295_v40 = vmul.f32 %v6466_v6, %v3329_v4  ;;  %v6407_v60 = vunpack.c.h.bf16 %v6887_v11  ;;  %v6439_v4 = vunpack.c.h.bf16 %v6894_v37  ;;  %v6888_v6 = vld [vmem:[#allocation13 + $0x50] sm:$0xff]  }
 0x4c3   : > { %v4117_v13 = vmul.f32 %v6371_v62, %v3218_v7  ;;  %v3220_v51 = vpop.f32.mrb[35].mxu1  ;;  %v3333_v15 = vpop.f32.mrb[51].mxu0  ;;  %v4231_v42 = vmul.f32 %v6435_v9, %v3331_v8  ;;  %v6902_v37 = vld [vmem:[#allocation13 + $0xd0] sm:$0xff]  }
 0x4c4   : > { %v4181_v32 = vadd.f32 %v4165_v5, %v4116_v55  ;;  %v4166_v34 = vmul.f32 %v6403_v2, %v3220_v51  ;;  %v4296_v48 = vmul.f32 %v6467_v35, %v3333_v15  ;;  %v6470_v2 = vunpack.c.l.bf16 %v6901_v45  ;;  %v6881_v5 = vld [vmem:[#allocation13 + $0x10] sm:$0xff]  }
 0x4c5   : > { %v6378_v51 = vunpack.c.l.bf16 %v6881_v5  ;;  %v6410_v15 = vunpack.c.l.bf16 %v6888_v6 }
 0x4c6   : > { %v4246_v39 = vadd.f32 %v4230_v19, %v4181_v32  ;;  %v4182_v43 = vadd.f32 %v4166_v34, %v4117_v13  ;;  %v6471_v13 = vunpack.c.h.bf16 %v6901_v45  ;;  %v6411_v45 = vunpack.c.h.bf16 %v6888_v6 }
 0x4c7   : > { %3921 = vmatmul.mubr.bf16.gmra.mrb[140].mxu1 %v8519_v14 }
 0x4c8   : > { %v8798_v47 = vadd.f32 %v4295_v40, %v4246_v39  ;;  %v4247_v61 = vadd.f32 %v4231_v42, %v4182_v43  ;;  %4034 = vmatmul.mubr.bf16.gmra.mrb[156].mxu0 %v8519_v14  ;;  %3930 = vmatprep.mubr.bf16.mxu1 %v8537_v57  ;;  %v3224_v56 = vpop.f32.mrb[36].mxu1  ;;  %v3337_v58 = vpop.f32.mrb[52].mxu0 }
 0x4c9   : > { %4043 = vmatprep.mubr.bf16.mxu0 %v8537_v57  ;;  %v4118_v59 = vmul.f32 %v6374_v38, %v3224_v56  ;;  %v3226_v62 = vpop.f32.mrb[37].mxu1  ;;  %v3339_v18 = vpop.f32.mrb[53].mxu0  ;;  %v4232_v9 = vmul.f32 %v6438_v44, %v3337_v58  ;;  %v6895_v57 = vld [vmem:[#allocation13 + $0x90] sm:$0xff]  }
 0x4ca   : > { %v8803_v0 = vadd.f32 %v4296_v48, %v4247_v61  ;;  %v4167_v16 = vmul.f32 %v6406_v17, %v3226_v62  ;;  %v3228_v55 = vpop.f32.mrb[38].mxu1  ;;  %v3341_v3 = vpop.f32.mrb[54].mxu0  ;;  %v4297_v32 = vmul.f32 %v6470_v2, %v3339_v18  ;;  %v6442_v38 = vunpack.c.l.bf16 %v6895_v57  ;;  %v6889_v2 = vld [vmem:[#allocation13 + $0x58] sm:$0xff]  }
 0x4cb   : > { %v4119_v14 = vmul.f32 %v6375_v46, %v3228_v55  ;;  %v3230_v7 = vpop.f32.mrb[39].mxu1  ;;  %v3343_v8 = vpop.f32.mrb[55].mxu0  ;;  %v4233_v34 = vmul.f32 %v6439_v4, %v3341_v3  ;;  %v6379_v17 = vunpack.c.h.bf16 %v6881_v5  ;;  %v6443_v18 = vunpack.c.h.bf16 %v6895_v57  ;;  %v6903_v57 = vld [vmem:[#allocation13 + $0xd8] sm:$0xff]  }
 0x4cc   : > { %v4183_v10 = vadd.f32 %v4167_v16, %v4118_v59  ;;  %v4168_v11 = vmul.f32 %v6407_v60, %v3230_v7  ;;  %v4298_v42 = vmul.f32 %v6471_v13, %v3343_v8  ;;  %v6474_v60 = vunpack.c.l.bf16 %v6902_v37  ;;  %v6882_v16 = vld [vmem:[#allocation13 + $0x18] sm:$0xff]  }
 0x4cd   : > { %v6382_v7 = vunpack.c.l.bf16 %v6882_v16  ;;  %v6414_v8 = vunpack.c.l.bf16 %v6889_v2 }
 0x4ce   : > { %v4248_v19 = vadd.f32 %v4232_v9, %v4183_v10  ;;  %v4184_v35 = vadd.f32 %v4168_v11, %v4119_v14  ;;  %v6475_v14 = vunpack.c.h.bf16 %v6902_v37  ;;  %v6415_v37 = vunpack.c.h.bf16 %v6889_v2 }
 0x4cf   : > { %3931 = vmatmul.mubr.bf16.gmra.mrb[144].mxu1 %v8535_v53 }
 0x4d0   : > { %v8806_v39 = vadd.f32 %v4297_v32, %v4248_v19  ;;  %v4249_v40 = vadd.f32 %v4233_v34, %v4184_v35  ;;  %4044 = vmatmul.mubr.bf16.gmra.mrb[160].mxu0 %v8535_v53  ;;  %3940 = vmatprep.mubr.bf16.mxu1 %v8553_v33  ;;  %v3234_v43 = vpop.f32.mrb[40].mxu1  ;;  %v3347_v44 = vpop.f32.mrb[56].mxu0 }
 0x4d1   : > { %4053 = vmatprep.mubr.bf16.mxu0 %v8553_v33  ;;  %v4120_v46 = vmul.f32 %v6378_v51, %v3234_v43  ;;  %v3236_v61 = vpop.f32.mrb[41].mxu1  ;;  %v3349_v48 = vpop.f32.mrb[57].mxu0  ;;  %v4234_v4 = vmul.f32 %v6442_v38, %v3347_v44  ;;  %v6896_v33 = vld [vmem:[#allocation13 + $0x98] sm:$0xff]  }
 0x4d2   : > { %v8811_v56 = vadd.f32 %v4298_v42, %v4249_v40  ;;  %v4169_v58 = vmul.f32 %v6410_v15, %v3236_v61  ;;  %v3238_v59 = vpop.f32.mrb[42].mxu1  ;;  %v3351_v62 = vpop.f32.mrb[58].mxu0  ;;  %v4299_v10 = vmul.f32 %v6474_v60, %v3349_v48  ;;  %v6446_v51 = vunpack.c.l.bf16 %v6896_v33  ;;  %v6890_v60 = vld [vmem:[#allocation13 + $0x60] sm:$0xff]  }
 0x4d3   : > { %v4121_v53 = vmul.f32 %v6379_v17, %v3238_v59  ;;  %v3240_v55 = vpop.f32.mrb[43].mxu1  ;;  %v3353_v3 = vpop.f32.mrb[59].mxu0  ;;  %v4235_v11 = vmul.f32 %v6443_v18, %v3351_v62  ;;  %v6383_v15 = vunpack.c.h.bf16 %v6882_v16  ;;  %v6447_v48 = vunpack.c.h.bf16 %v6896_v33  ;;  %v6904_v33 = vld [vmem:[#allocation13 + $0xe0] sm:$0xff]  }
 0x4d4   : > { %v4185_v5 = vadd.f32 %v4169_v58, %v4120_v46  ;;  %v4170_v6 = vmul.f32 %v6411_v45, %v3240_v55  ;;  %v4300_v34 = vmul.f32 %v6475_v14, %v3353_v3  ;;  %v6478_v45 = vunpack.c.l.bf16 %v6903_v57  ;;  %v6883_v58 = vld [vmem:[#allocation13 + $0x20] sm:$0xff]  }
 0x4d5   : > { %v6386_v55 = vunpack.c.l.bf16 %v6883_v58  ;;  %v6418_v3 = vunpack.c.l.bf16 %v6890_v60 }
 0x4d6   : > { %v4250_v9 = vadd.f32 %v4234_v4, %v4185_v5  ;;  %v4186_v13 = vadd.f32 %v4170_v6, %v4121_v53  ;;  %v6479_v53 = vunpack.c.h.bf16 %v6903_v57  ;;  %v6419_v57 = vunpack.c.h.bf16 %v6890_v60 }
 0x4d7   : > { %3941 = vmatmul.mubr.bf16.gmra.mrb[148].mxu1 %v8551_v20 }
 0x4d8   : > { %v8814_v19 = vadd.f32 %v4299_v10, %v4250_v9  ;;  %v4251_v32 = vadd.f32 %v4235_v11, %v4186_v13  ;;  %4054 = vmatmul.mubr.bf16.gmra.mrb[164].mxu0 %v8551_v20  ;;  %3950 = vmatprep.mubr.bf16.mxu1 %v8569_v1  ;;  %v3244_v35 = vpop.f32.mrb[44].mxu1  ;;  %v3357_v38 = vpop.f32.mrb[60].mxu0 }
 0x4d9   : > { %4063 = vmatprep.mubr.bf16.mxu0 %v8569_v1  ;;  %v4122_v17 = vmul.f32 %v6382_v7, %v3244_v35  ;;  %v3246_v40 = vpop.f32.mrb[45].mxu1  ;;  %v3359_v42 = vpop.f32.mrb[61].mxu0  ;;  %v4236_v18 = vmul.f32 %v6446_v51, %v3357_v38  ;;  %v6897_v1 = vld [vmem:[#allocation13 + $0xa0] sm:$0xff]  }
 0x4da   : > { %v8819_v43 = vadd.f32 %v4300_v34, %v4251_v32  ;;  %v4171_v44 = vmul.f32 %v6414_v8, %v3246_v40  ;;  %v3248_v46 = vpop.f32.mrb[46].mxu1  ;;  %v3361_v61 = vpop.f32.mrb[62].mxu0  ;;  %v4301_v5 = vmul.f32 %v6478_v45, %v3359_v42  ;;  %v6450_v7 = vunpack.c.l.bf16 %v6897_v1  ;;  %v6891_v45 = vld [vmem:[#allocation13 + $0x68] sm:$0xff]  }
 0x4db   : > { %v4123_v20 = vmul.f32 %v6383_v15, %v3248_v46  ;;  %v3250_v59 = vpop.f32.mrb[47].mxu1  ;;  %v3363_v62 = vpop.f32.mrb[63].mxu0  ;;  %v4237_v6 = vmul.f32 %v6447_v48, %v3361_v61  ;;  %v6387_v8 = vunpack.c.h.bf16 %v6883_v58  ;;  %v6451_v42 = vunpack.c.h.bf16 %v6897_v1  ;;  %v6905_v1 = vld [vmem:[#allocation13 + $0xe8] sm:$0xff]  }
 0x4dc   : > { %v4187_v16 = vadd.f32 %v4171_v44, %v4122_v17  ;;  %v4172_v2 = vmul.f32 %v6415_v37, %v3250_v59  ;;  %v4302_v11 = vmul.f32 %v6479_v53, %v3363_v62  ;;  %v6482_v37 = vunpack.c.l.bf16 %v6904_v33  ;;  %v6884_v44 = vld [vmem:[#allocation13 + $0x28] sm:$0xff]  }
 0x4dd   : > { %v6390_v59 = vunpack.c.l.bf16 %v6884_v44  ;;  %v6422_v62 = vunpack.c.l.bf16 %v6891_v45 }
 0x4de   : > { %v4252_v4 = vadd.f32 %v4236_v18, %v4187_v16  ;;  %v4188_v14 = vadd.f32 %v4172_v2, %v4123_v20  ;;  %v6483_v20 = vunpack.c.h.bf16 %v6904_v33  ;;  %v6423_v33 = vunpack.c.h.bf16 %v6891_v45  ;;  %v6899_v45 = vld [vmem:[#allocation13 + $0xb0] sm:$0xff]  }
 0x4df   : > { %3951 = vmatmul.mubr.bf16.gmra.mrb[152].mxu1 %v8567_v63 }
 0x4e0   : > { %v8822_v9 = vadd.f32 %v4301_v5, %v4252_v4  ;;  %v4253_v10 = vadd.f32 %v4237_v6, %v4188_v14  ;;  %4064 = vmatmul.mubr.bf16.gmra.mrb[168].mxu0 %v8567_v63  ;;  %3960 = vmatprep.mubr.bf16.mxu1 %v8585_v41  ;;  %v3254_v13 = vpop.f32.mrb[48].mxu1  ;;  %v3367_v51 = vpop.f32.mrb[64].mxu0 }
 0x4e1   : > { %4073 = vmatprep.mubr.bf16.mxu0 %v8585_v41  ;;  %v4124_v15 = vmul.f32 %v6386_v55, %v3254_v13  ;;  %v3256_v32 = vpop.f32.mrb[49].mxu1  ;;  %v3369_v34 = vpop.f32.mrb[65].mxu0  ;;  %v4238_v48 = vmul.f32 %v6450_v7, %v3367_v51  ;;  %v6898_v41 = vld [vmem:[#allocation13 + $0xa8] sm:$0xff]  }
 0x4e2   : > { %v8827_v35 = vadd.f32 %v4302_v11, %v4253_v10  ;;  %v4173_v38 = vmul.f32 %v6418_v3, %v3256_v32  ;;  %v3258_v17 = vpop.f32.mrb[50].mxu1  ;;  %v3371_v40 = vpop.f32.mrb[66].mxu0  ;;  %v4303_v16 = vmul.f32 %v6482_v37, %v3369_v34  ;;  %v6454_v55 = vunpack.c.l.bf16 %v6898_v41  ;;  %v6892_v37 = vld [vmem:[#allocation13 + $0x70] sm:$0xff]  }
 0x4e3   : > { %v4125_v63 = vmul.f32 %v6387_v8, %v3258_v17  ;;  %v3260_v46 = vpop.f32.mrb[51].mxu1  ;;  %v3373_v61 = vpop.f32.mrb[67].mxu0  ;;  %v4239_v2 = vmul.f32 %v6451_v42, %v3371_v40  ;;  %v6391_v3 = vunpack.c.h.bf16 %v6884_v44  ;;  %v6455_v34 = vunpack.c.h.bf16 %v6898_v41 }
 0x4e4   : > { %v4189_v58 = vadd.f32 %v4173_v38, %v4124_v15  ;;  %v4174_v60 = vmul.f32 %v6419_v57, %v3260_v46  ;;  %v4304_v6 = vmul.f32 %v6483_v20, %v3373_v61  ;;  %v6486_v57 = vunpack.c.l.bf16 %v6905_v1  ;;  %v6885_v38 = vld [vmem:[#allocation13 + $0x30] sm:$0xff]  }
 0x4e5   : > { %v6487_v46 = vunpack.c.h.bf16 %v6905_v1  ;;  %v6394_v61 = vunpack.c.l.bf16 %v6885_v38 }
 0x4e6   : > { %v4254_v18 = vadd.f32 %v4238_v48, %v4189_v58  ;;  %v4190_v53 = vadd.f32 %v4174_v60, %v4125_v63  ;;  %v6426_v48 = vunpack.c.l.bf16 %v6892_v37 }
 0x4e7   : > { %3961 = vmatmul.mubr.bf16.gmra.mrb[156].mxu1 %v8580_v36 }
 0x4e8   : > { %v8830_v4 = vadd.f32 %v4303_v16, %v4254_v18  ;;  %v4255_v5 = vadd.f32 %v4239_v2, %v4190_v53  ;;  %4074 = vmatmul.mubr.bf16.gmra.mrb[172].mxu0 %v8580_v36  ;;  %v3264_v14 = vpop.f32.mrb[52].mxu1  ;;  %v3377_v7 = vpop.f32.mrb[68].mxu0  ;;  %v6906_v18 = vld [vmem:[#allocation13 + $0xf0] sm:$0xff]   ;;  %v6395_v16 = vunpack.c.h.bf16 %v6885_v38 }
 0x4e9   : > { %v4126_v8 = vmul.f32 %v6390_v59, %v3264_v14  ;;  %v3266_v10 = vpop.f32.mrb[53].mxu1  ;;  %v3379_v11 = vpop.f32.mrb[69].mxu0  ;;  %v4240_v44 = vmul.f32 %v6454_v55, %v3377_v7  ;;  %v6427_v55 = vunpack.c.h.bf16 %v6892_v37  ;;  %v6900_v37 = vld [vmem:[#allocation13 + $0xb8] sm:$0xff]  }
 0x4ea   : > { %v8833_v13 = vadd.f32 %v4304_v6, %v4255_v5  ;;  %v4175_v51 = vmul.f32 %v6422_v62, %v3266_v10  ;;  %v3268_v15 = vpop.f32.mrb[54].mxu1  ;;  %v3381_v32 = vpop.f32.mrb[70].mxu0  ;;  %v4305_v60 = vmul.f32 %v6486_v57, %v3379_v11  ;;  %v6458_v62 = vunpack.c.l.bf16 %v6899_v45  ;;  %v6886_v57 = vld [vmem:[#allocation13 + $0x38] sm:$0xff]  }
 0x4eb   : > { %v4127_v17 = vmul.f32 %v6391_v3, %v3268_v15  ;;  %v3270_v40 = vpop.f32.mrb[55].mxu1  ;;  %v3383_v42 = vpop.f32.mrb[71].mxu0  ;;  %v4241_v20 = vmul.f32 %v6455_v34, %v3381_v32  ;;  %v6893_v15 = vld [vmem:[#allocation13 + $0x78] sm:$0xff]  }
 0x4ec   : > { %v4191_v36 = vadd.f32 %v4175_v51, %v4126_v8  ;;  %v4176_v63 = vmul.f32 %v6423_v33, %v3270_v40  ;;  %v4306_v53 = vmul.f32 %v6487_v46, %v3383_v42  ;;  %v6490_v8 = vunpack.c.l.bf16 %v6906_v18 }
 0x4ed   : > { %v6459_v51 = vunpack.c.h.bf16 %v6899_v45 }
 0x4ee   : > { %v4256_v58 = vadd.f32 %v4240_v44, %v4191_v36  ;;  %v4192_v59 = vadd.f32 %v4176_v63, %v4127_v17  ;;  %v6491_v44 = vunpack.c.h.bf16 %v6906_v18  ;;  %v6398_v36 = vunpack.c.l.bf16 %v6886_v57 }
 0x4ef   : > { %v6430_v63 = vunpack.c.l.bf16 %v6893_v15 }
 0x4f0   : > { %v8835_v41 = vadd.f32 %v4305_v60, %v4256_v58  ;;  %v4257_v2 = vadd.f32 %v4241_v20, %v4192_v59  ;;  %v3274_v3 = vpop.f32.mrb[56].mxu1  ;;  %v3387_v5 = vpop.f32.mrb[72].mxu0  ;;  %v6462_v60 = vunpack.c.l.bf16 %v6900_v37  ;;  %v6907_v20 = vld [vmem:[#allocation13 + $0xf8] sm:$0xff]   ;;  %v6399_v59 = vunpack.c.h.bf16 %v6886_v57 }
 0x4f1   : > { %v4128_v6 = vmul.f32 %v6394_v61, %v3274_v3  ;;  %v3276_v14 = vpop.f32.mrb[57].mxu1  ;;  %v3389_v1 = vpop.f32.mrb[73].mxu0  ;;  %v4242_v17 = vmul.f32 %v6458_v62, %v3387_v5  ;;  %v6431_v62 = vunpack.c.h.bf16 %v6893_v15 }
 0x4f2   : > { %v8837_v7 = vadd.f32 %v4306_v53, %v4257_v2  ;;  %v4177_v33 = vmul.f32 %v6426_v48, %v3276_v14  ;;  %v3278_v10 = vpop.f32.mrb[58].mxu1  ;;  %v3391_v11 = vpop.f32.mrb[74].mxu0  ;;  %v4307_v61 = vmul.f32 %v6490_v8, %v3389_v1 }
 0x4f3   : > { %v4129_v32 = vmul.f32 %v6395_v16, %v3278_v10  ;;  %v3280_v34 = vpop.f32.mrb[59].mxu1  ;;  %v3393_v38 = vpop.f32.mrb[75].mxu0  ;;  %v4243_v58 = vmul.f32 %v6459_v51, %v3391_v11  ;;  %v6463_v10 = vunpack.c.h.bf16 %v6900_v37  ;;  %v6497_v11 = vld [vmem:[#allocation13 + $0x100] sm:$0xff]  }
 0x4f4   : > { %v4193_v40 = vadd.f32 %v4177_v33, %v4128_v6  ;;  %v4178_v42 = vmul.f32 %v6427_v55, %v3280_v34  ;;  %v4308_v16 = vmul.f32 %v6491_v44, %v3393_v38  ;;  %v6494_v33 = vunpack.c.l.bf16 %v6907_v20  ;;  %v6529_v51 = vld [vmem:[#allocation13 + $0x140] sm:$0xff]  }
 0x4f5   : > { %v6498_v15 = vunpack.c.l.bf16 %v6497_v11  ;;  %v6530_v44 = vunpack.c.l.bf16 %v6529_v51 }
 0x4f6   : > { %v4258_v46 = vadd.f32 %v4242_v17, %v4193_v40  ;;  %v4194_v48 = vadd.f32 %v4178_v42, %v4129_v32  ;;  %v6495_v42 = vunpack.c.h.bf16 %v6907_v20 }
 0x4f8   : > { %v8839_v45 = vadd.f32 %v4307_v61, %v4258_v46  ;;  %v4259_v2 = vadd.f32 %v4243_v58, %v4194_v48  ;;  %v3284_v53 = vpop.f32.mrb[60].mxu1  ;;  %v3397_v3 = vpop.f32.mrb[76].mxu0  ;;  %v6499_v48 = vunpack.c.h.bf16 %v6497_v11 }
 0x4f9   : > { %v4130_v5 = vmul.f32 %v6398_v36, %v3284_v53  ;;  %v3286_v55 = vpop.f32.mrb[61].mxu1  ;;  %v3399_v18 = vpop.f32.mrb[77].mxu0  ;;  %v4244_v17 = vmul.f32 %v6462_v60, %v3397_v3 }
 0x4fa   : > { %v8841_v6 = vadd.f32 %v4308_v16, %v4259_v2  ;;  %v4179_v14 = vmul.f32 %v6430_v63, %v3286_v55  ;;  %v3288_v1 = vpop.f32.mrb[62].mxu1  ;;  %v3401_v8 = vpop.f32.mrb[78].mxu0  ;;  %v4309_v46 = vmul.f32 %v6494_v33, %v3399_v18  ;;  %v6561_v63 = vld [vmem:[#allocation13 + $0x180] sm:$0xff]   ;;  %v6531_v55 = vunpack.c.h.bf16 %v6529_v51  ;;  %v6908_v33 = vld [vmem:[#allocation13 + $0x108] sm:$0xff]  }
 0x4fb   : > { %v4131_v57 = vmul.f32 %v6399_v59, %v3288_v1  ;;  %v3290_v32 = vpop.f32.mrb[63].mxu1  ;;  %v3403_v34 = vpop.f32.mrb[79].mxu0  ;;  %v4245_v61 = vmul.f32 %v6463_v10, %v3401_v8  ;;  %v6593_v59 = vld [vmem:[#allocation13 + $0x1c0] sm:$0xff]   ;;  %v6562_v3 = vunpack.c.l.bf16 %v6561_v63 }
 0x4fc   : > { %v4195_v38 = vadd.f32 %v4179_v14, %v4130_v5  ;;  %v4180_v40 = vmul.f32 %v6431_v62, %v3290_v32  ;;  %v4310_v16 = vmul.f32 %v6495_v42, %v3403_v34  ;;  %v6594_v10 = vunpack.c.l.bf16 %v6593_v59 }
 0x4fd   : > { %v6563_v32 = vunpack.c.h.bf16 %v6561_v63 }
 0x4fe   : > { %v4260_v36 = vadd.f32 %v4244_v17, %v4195_v38  ;;  %v4196_v58 = vadd.f32 %v4180_v40, %v4131_v57  ;;  %v6915_v17 = vld [vmem:[#allocation13 + $0x148] sm:$0xff]   ;;  %v6595_v40 = vunpack.c.h.bf16 %v6593_v59 }
 0x500   : > { %v8843_v2 = vadd.f32 %v4309_v46, %v4260_v36  ;;  %v4261_v37 = vadd.f32 %v4245_v61, %v4196_v58  ;;  %v3440_v53 = vpop.f32.mrb[64].mxu1  ;;  %v6502_v46 = vunpack.c.l.bf16 %v6908_v33  ;;  %v6534_v61 = vunpack.c.l.bf16 %v6915_v17 }
 0x501   : > { %v4360_v1 = vmul.f32 %v6498_v15, %v3440_v53  ;;  %v3553_v60 = vpop.f32.mrb[80].mxu0  ;;  %v3442_v62 = vpop.f32.mrb[65].mxu1  ;;  %v6503_v58 = vunpack.c.h.bf16 %v6908_v33  ;;  %v6909_v33 = vld [vmem:[#allocation13 + $0x110] sm:$0xff]  }
 0x502   : > { %v8845_v20 = vadd.f32 %v4310_v16, %v4261_v37  ;;  %v4425_v5 = vmul.f32 %v6530_v44, %v3442_v62  ;;  %v3555_v14 = vpop.f32.mrb[81].mxu0  ;;  %v3444_v18 = vpop.f32.mrb[66].mxu1  ;;  %v4490_v42 = vmul.f32 %v6562_v3, %v3553_v60  ;;  %v6922_v44 = vld [vmem:[#allocation13 + $0x188] sm:$0xff]   ;;  %v6535_v62 = vunpack.c.h.bf16 %v6915_v17 }
 0x503   : > { %v4376_v8 = vadd.f32 %v4360_v1, %v8798_v47  ;;  %v4361_v11 = vmul.f32 %v6499_v48, %v3444_v18  ;;  %v3557_v57 = vpop.f32.mrb[82].mxu0  ;;  %v3446_v34 = vpop.f32.mrb[67].mxu1  ;;  %v4555_v16 = vmul.f32 %v6594_v10, %v3555_v14  ;;  %v6929_v48 = vld [vmem:[#allocation13 + $0x1c8] sm:$0xff]   ;;  %v6566_v63 = vunpack.c.l.bf16 %v6922_v44 }
 0x504   : > { %v4426_v38 = vmul.f32 %v6531_v55, %v3446_v34  ;;  %v3559_v51 = vpop.f32.mrb[83].mxu0  ;;  %v4491_v47 = vmul.f32 %v6563_v32, %v3557_v57  ;;  %v6567_v32 = vunpack.c.h.bf16 %v6922_v44 }
 0x505   : > { %v4441_v15 = vadd.f32 %v4425_v5, %v4376_v8  ;;  %v4377_v36 = vadd.f32 %v4361_v11, %v8803_v0  ;;  %v4556_v59 = vmul.f32 %v6595_v40, %v3559_v51  ;;  %v6598_v11 = vunpack.c.l.bf16 %v6929_v48 }
 0x506   : > { %v6599_v51 = vunpack.c.h.bf16 %v6929_v48 }
 0x507   : > { %v4506_v37 = vadd.f32 %v4490_v42, %v4441_v15  ;;  %v4442_v53 = vadd.f32 %v4426_v38, %v4377_v36  ;;  %v6916_v38 = vld [vmem:[#allocation13 + $0x150] sm:$0xff]  }
 0x508   : > { %v3450_v1 = vpop.f32.mrb[68].mxu1 }
 0x509   : > { %v8849_v18 = vadd.f32 %v4555_v16, %v4506_v37  ;;  %v4507_v55 = vadd.f32 %v4491_v47, %v4442_v53  ;;  %v4362_v60 = vmul.f32 %v6502_v46, %v3450_v1  ;;  %v3563_v3 = vpop.f32.mrb[84].mxu0  ;;  %v3452_v5 = vpop.f32.mrb[69].mxu1  ;;  %v6506_v37 = vunpack.c.l.bf16 %v6909_v33  ;;  %v6923_v16 = vld [vmem:[#allocation13 + $0x190] sm:$0xff]  }
 0x50a   : > { %v4427_v0 = vmul.f32 %v6534_v61, %v3452_v5  ;;  %v3565_v8 = vpop.f32.mrb[85].mxu0  ;;  %v3454_v34 = vpop.f32.mrb[70].mxu1  ;;  %v4492_v40 = vmul.f32 %v6566_v63, %v3563_v3  ;;  %v6538_v47 = vunpack.c.l.bf16 %v6916_v38  ;;  %v6507_v53 = vunpack.c.h.bf16 %v6909_v33  ;;  %v6910_v33 = vld [vmem:[#allocation13 + $0x118] sm:$0xff]  }
 0x50b   : > { %v8851_v42 = vadd.f32 %v4556_v59, %v4507_v55  ;;  %v4378_v14 = vadd.f32 %v4362_v60, %v8806_v39  ;;  %v4363_v10 = vmul.f32 %v6503_v58, %v3454_v34  ;;  %v3567_v57 = vpop.f32.mrb[86].mxu0  ;;  %v3456_v17 = vpop.f32.mrb[71].mxu1  ;;  %v4557_v55 = vmul.f32 %v6598_v11, %v3565_v8  ;;  %v6930_v58 = vld [vmem:[#allocation13 + $0x1d0] sm:$0xff]  }
 0x50c   : > { %v4428_v15 = vmul.f32 %v6535_v62, %v3456_v17  ;;  %v3569_v36 = vpop.f32.mrb[87].mxu0  ;;  %v4493_v59 = vmul.f32 %v6567_v32, %v3567_v57  ;;  %v6570_v44 = vunpack.c.l.bf16 %v6923_v16  ;;  %v6539_v5 = vunpack.c.h.bf16 %v6916_v38 }
 0x50d   : > { %v4443_v46 = vadd.f32 %v4427_v0, %v4378_v14  ;;  %v4379_v61 = vadd.f32 %v4363_v10, %v8811_v56  ;;  %v4558_v48 = vmul.f32 %v6599_v51, %v3569_v36  ;;  %v6602_v10 = vunpack.c.l.bf16 %v6930_v58 }
 0x50e   : > { %v6571_v32 = vunpack.c.h.bf16 %v6923_v16  ;;  %v6603_v36 = vunpack.c.h.bf16 %v6930_v58 }
 0x50f   : > { %v4508_v1 = vadd.f32 %v4492_v40, %v4443_v46  ;;  %v4444_v39 = vadd.f32 %v4428_v15, %v4379_v61  ;;  %v6917_v15 = vld [vmem:[#allocation13 + $0x158] sm:$0xff]  }
 0x510   : > { %v3460_v60 = vpop.f32.mrb[72].mxu1 }
 0x511   : > { %v8855_v34 = vadd.f32 %v4557_v55, %v4508_v1  ;;  %v4509_v62 = vadd.f32 %v4493_v59, %v4444_v39  ;;  %v4364_v63 = vmul.f32 %v6506_v37, %v3460_v60  ;;  %v3573_v3 = vpop.f32.mrb[88].mxu0  ;;  %v3462_v0 = vpop.f32.mrb[73].mxu1  ;;  %v6510_v1 = vunpack.c.l.bf16 %v6910_v33  ;;  %v6924_v55 = vld [vmem:[#allocation13 + $0x198] sm:$0xff]  }
 0x512   : > { %v4429_v56 = vmul.f32 %v6538_v47, %v3462_v0  ;;  %v3575_v14 = vpop.f32.mrb[89].mxu0  ;;  %v3464_v17 = vpop.f32.mrb[74].mxu1  ;;  %v4494_v51 = vmul.f32 %v6570_v44, %v3573_v3  ;;  %v6542_v59 = vunpack.c.l.bf16 %v6917_v15  ;;  %v6511_v39 = vunpack.c.h.bf16 %v6910_v33  ;;  %v6911_v33 = vld [vmem:[#allocation13 + $0x120] sm:$0xff]  }
 0x513   : > { %v8857_v40 = vadd.f32 %v4558_v48, %v4509_v62  ;;  %v4380_v8 = vadd.f32 %v4364_v63, %v8814_v19  ;;  %v4365_v11 = vmul.f32 %v6507_v53, %v3464_v17  ;;  %v3577_v57 = vpop.f32.mrb[90].mxu0  ;;  %v3466_v38 = vpop.f32.mrb[75].mxu1  ;;  %v4559_v62 = vmul.f32 %v6602_v10, %v3575_v14  ;;  %v6931_v53 = vld [vmem:[#allocation13 + $0x1d8] sm:$0xff]  }
 0x514   : > { %v4430_v46 = vmul.f32 %v6539_v5, %v3466_v38  ;;  %v3579_v61 = vpop.f32.mrb[91].mxu0  ;;  %v4495_v48 = vmul.f32 %v6571_v32, %v3577_v57  ;;  %v6574_v16 = vunpack.c.l.bf16 %v6924_v55  ;;  %v6543_v0 = vunpack.c.h.bf16 %v6917_v15 }
 0x515   : > { %v4445_v37 = vadd.f32 %v4429_v56, %v4380_v8  ;;  %v4381_v47 = vadd.f32 %v4365_v11, %v8819_v43  ;;  %v4560_v58 = vmul.f32 %v6603_v36, %v3579_v61  ;;  %v6606_v11 = vunpack.c.l.bf16 %v6931_v53 }
 0x516   : > { %v6575_v32 = vunpack.c.h.bf16 %v6924_v55  ;;  %v6607_v61 = vunpack.c.h.bf16 %v6931_v53 }
 0x517   : > { %v4510_v60 = vadd.f32 %v4494_v51, %v4445_v37  ;;  %v4446_v19 = vadd.f32 %v4430_v46, %v4381_v47  ;;  %v6918_v46 = vld [vmem:[#allocation13 + $0x160] sm:$0xff]  }
 0x518   : > { %v3470_v63 = vpop.f32.mrb[76].mxu1 }
 0x519   : > { %v8861_v17 = vadd.f32 %v4559_v62, %v4510_v60  ;;  %v4511_v5 = vadd.f32 %v4495_v48, %v4446_v19  ;;  %v4366_v44 = vmul.f32 %v6510_v1, %v3470_v63  ;;  %v3583_v3 = vpop.f32.mrb[92].mxu0  ;;  %v3472_v56 = vpop.f32.mrb[77].mxu1  ;;  %v6514_v60 = vunpack.c.l.bf16 %v6911_v33  ;;  %v6925_v62 = vld [vmem:[#allocation13 + $0x1a0] sm:$0xff]  }
 0x51a   : > { %v4431_v43 = vmul.f32 %v6542_v59, %v3472_v56  ;;  %v3585_v8 = vpop.f32.mrb[93].mxu0  ;;  %v3474_v38 = vpop.f32.mrb[78].mxu1  ;;  %v4496_v36 = vmul.f32 %v6574_v16, %v3583_v3  ;;  %v6546_v48 = vunpack.c.l.bf16 %v6918_v46  ;;  %v6515_v19 = vunpack.c.h.bf16 %v6911_v33  ;;  %v6912_v33 = vld [vmem:[#allocation13 + $0x128] sm:$0xff]  }
 0x51b   : > { %v8863_v51 = vadd.f32 %v4560_v58, %v4511_v5  ;;  %v4382_v14 = vadd.f32 %v4366_v44, %v8822_v9  ;;  %v4367_v10 = vmul.f32 %v6511_v39, %v3474_v38  ;;  %v3587_v57 = vpop.f32.mrb[94].mxu0  ;;  %v3476_v15 = vpop.f32.mrb[79].mxu1  ;;  %v4561_v5 = vmul.f32 %v6606_v11, %v3585_v8  ;;  %v6932_v39 = vld [vmem:[#allocation13 + $0x1e0] sm:$0xff]  }
 0x51c   : > { %v4432_v37 = vmul.f32 %v6543_v0, %v3476_v15  ;;  %v3589_v47 = vpop.f32.mrb[95].mxu0  ;;  %v4497_v58 = vmul.f32 %v6575_v32, %v3587_v57  ;;  %v6578_v55 = vunpack.c.l.bf16 %v6925_v62  ;;  %v6547_v56 = vunpack.c.h.bf16 %v6918_v46 }
 0x51d   : > { %v4447_v1 = vadd.f32 %v4431_v43, %v4382_v14  ;;  %v4383_v59 = vadd.f32 %v4367_v10, %v8827_v35  ;;  %v4562_v53 = vmul.f32 %v6607_v61, %v3589_v47  ;;  %v6610_v10 = vunpack.c.l.bf16 %v6932_v39 }
 0x51e   : > { %v6579_v32 = vunpack.c.h.bf16 %v6925_v62  ;;  %v6611_v47 = vunpack.c.h.bf16 %v6932_v39 }
 0x51f   : > { %v4512_v63 = vadd.f32 %v4496_v36, %v4447_v1  ;;  %v4448_v9 = vadd.f32 %v4432_v37, %v4383_v59  ;;  %v6919_v37 = vld [vmem:[#allocation13 + $0x168] sm:$0xff]  }
 0x520   : > { %v3480_v44 = vpop.f32.mrb[80].mxu1 }
 0x521   : > { %v8867_v38 = vadd.f32 %v4561_v5, %v4512_v63  ;;  %v4513_v0 = vadd.f32 %v4497_v58, %v4448_v9  ;;  %v4368_v16 = vmul.f32 %v6514_v60, %v3480_v44  ;;  %v3593_v3 = vpop.f32.mrb[96].mxu0  ;;  %v3482_v43 = vpop.f32.mrb[81].mxu1  ;;  %v6518_v63 = vunpack.c.l.bf16 %v6912_v33  ;;  %v6926_v5 = vld [vmem:[#allocation13 + $0x1a8] sm:$0xff]  }
 0x522   : > { %v4433_v35 = vmul.f32 %v6546_v48, %v3482_v43  ;;  %v3595_v14 = vpop.f32.mrb[97].mxu0  ;;  %v3484_v15 = vpop.f32.mrb[82].mxu1  ;;  %v4498_v61 = vmul.f32 %v6578_v55, %v3593_v3  ;;  %v6550_v58 = vunpack.c.l.bf16 %v6919_v37  ;;  %v6519_v9 = vunpack.c.h.bf16 %v6912_v33  ;;  %v6913_v33 = vld [vmem:[#allocation13 + $0x130] sm:$0xff]  }
 0x523   : > { %v8869_v36 = vadd.f32 %v4562_v53, %v4513_v0  ;;  %v4384_v8 = vadd.f32 %v4368_v16, %v8830_v4  ;;  %v4369_v11 = vmul.f32 %v6515_v19, %v3484_v15  ;;  %v3597_v57 = vpop.f32.mrb[98].mxu0  ;;  %v3486_v46 = vpop.f32.mrb[83].mxu1  ;;  %v4563_v0 = vmul.f32 %v6610_v10, %v3595_v14  ;;  %v6933_v19 = vld [vmem:[#allocation13 + $0x1e8] sm:$0xff]  }
 0x524   : > { %v4434_v1 = vmul.f32 %v6547_v56, %v3486_v46  ;;  %v3599_v59 = vpop.f32.mrb[99].mxu0  ;;  %v4499_v53 = vmul.f32 %v6579_v32, %v3597_v57  ;;  %v6582_v62 = vunpack.c.l.bf16 %v6926_v5  ;;  %v6551_v43 = vunpack.c.h.bf16 %v6919_v37 }
 0x525   : > { %v4449_v60 = vadd.f32 %v4433_v35, %v4384_v8  ;;  %v4385_v48 = vadd.f32 %v4369_v11, %v8833_v13  ;;  %v4564_v39 = vmul.f32 %v6611_v47, %v3599_v59  ;;  %v6614_v11 = vunpack.c.l.bf16 %v6933_v19 }
 0x526   : > { %v6583_v32 = vunpack.c.h.bf16 %v6926_v5  ;;  %v6615_v59 = vunpack.c.h.bf16 %v6933_v19 }
 0x527   : > { %v4514_v44 = vadd.f32 %v4498_v61, %v4449_v60  ;;  %v4450_v4 = vadd.f32 %v4434_v1, %v4385_v48  ;;  %v6920_v1 = vld [vmem:[#allocation13 + $0x170] sm:$0xff]  }
 0x528   : > { %v3490_v16 = vpop.f32.mrb[84].mxu1 }
 0x529   : > { %v8873_v15 = vadd.f32 %v4563_v0, %v4514_v44  ;;  %v4515_v56 = vadd.f32 %v4499_v53, %v4450_v4  ;;  %v4370_v55 = vmul.f32 %v6518_v63, %v3490_v16  ;;  %v3603_v3 = vpop.f32.mrb[100].mxu0  ;;  %v3492_v35 = vpop.f32.mrb[85].mxu1  ;;  %v6522_v44 = vunpack.c.l.bf16 %v6913_v33  ;;  %v6927_v0 = vld [vmem:[#allocation13 + $0x1b0] sm:$0xff]  }
 0x52a   : > { %v4435_v13 = vmul.f32 %v6550_v58, %v3492_v35  ;;  %v3605_v8 = vpop.f32.mrb[101].mxu0  ;;  %v3494_v46 = vpop.f32.mrb[86].mxu1  ;;  %v4500_v47 = vmul.f32 %v6582_v62, %v3603_v3  ;;  %v6554_v53 = vunpack.c.l.bf16 %v6920_v1  ;;  %v6523_v4 = vunpack.c.h.bf16 %v6913_v33  ;;  %v6914_v33 = vld [vmem:[#allocation13 + $0x138] sm:$0xff]  }
 0x52b   : > { %v8875_v61 = vadd.f32 %v4564_v39, %v4515_v56  ;;  %v4386_v14 = vadd.f32 %v4370_v55, %v8835_v41  ;;  %v4371_v10 = vmul.f32 %v6519_v9, %v3494_v46  ;;  %v3607_v57 = vpop.f32.mrb[102].mxu0  ;;  %v3496_v37 = vpop.f32.mrb[87].mxu1  ;;  %v4565_v56 = vmul.f32 %v6614_v11, %v3605_v8  ;;  %v6934_v9 = vld [vmem:[#allocation13 + $0x1f0] sm:$0xff]  }
 0x52c   : > { %v4436_v60 = vmul.f32 %v6551_v43, %v3496_v37  ;;  %v3609_v48 = vpop.f32.mrb[103].mxu0  ;;  %v4501_v39 = vmul.f32 %v6583_v32, %v3607_v57  ;;  %v6586_v5 = vunpack.c.l.bf16 %v6927_v0  ;;  %v6555_v35 = vunpack.c.h.bf16 %v6920_v1 }
 0x52d   : > { %v4451_v63 = vadd.f32 %v4435_v13, %v4386_v14  ;;  %v4387_v58 = vadd.f32 %v4371_v10, %v8837_v7  ;;  %v4566_v19 = vmul.f32 %v6615_v59, %v3609_v48  ;;  %v6618_v10 = vunpack.c.l.bf16 %v6934_v9 }
 0x52e   : > { %v6587_v32 = vunpack.c.h.bf16 %v6927_v0  ;;  %v6619_v48 = vunpack.c.h.bf16 %v6934_v9 }
 0x52f   : > { %v4516_v16 = vadd.f32 %v4500_v47, %v4451_v63  ;;  %v4452_v41 = vadd.f32 %v4436_v60, %v4387_v58  ;;  %v6921_v60 = vld [vmem:[#allocation13 + $0x178] sm:$0xff]  }
 0x530   : > { %v3500_v55 = vpop.f32.mrb[88].mxu1 }
 0x531   : > { %v8879_v46 = vadd.f32 %v4565_v56, %v4516_v16  ;;  %v4517_v43 = vadd.f32 %v4501_v39, %v4452_v41  ;;  %v4372_v62 = vmul.f32 %v6522_v44, %v3500_v55  ;;  %v3613_v3 = vpop.f32.mrb[104].mxu0  ;;  %v3502_v13 = vpop.f32.mrb[89].mxu1  ;;  %v6526_v16 = vunpack.c.l.bf16 %v6914_v33  ;;  %v6928_v56 = vld [vmem:[#allocation13 + $0x1b8] sm:$0xff]  }
 0x532   : > { %v4437_v7 = vmul.f32 %v6554_v53, %v3502_v13  ;;  %v3615_v14 = vpop.f32.mrb[105].mxu0  ;;  %v3504_v37 = vpop.f32.mrb[90].mxu1  ;;  %v4502_v59 = vmul.f32 %v6586_v5, %v3613_v3  ;;  %v6558_v39 = vunpack.c.l.bf16 %v6921_v60  ;;  %v6527_v41 = vunpack.c.h.bf16 %v6914_v33 }
 0x533   : > { %v8881_v47 = vadd.f32 %v4566_v19, %v4517_v43  ;;  %v4388_v8 = vadd.f32 %v4372_v62, %v8839_v45  ;;  %v4373_v11 = vmul.f32 %v6523_v4, %v3504_v37  ;;  %v3617_v57 = vpop.f32.mrb[106].mxu0  ;;  %v3506_v1 = vpop.f32.mrb[91].mxu1  ;;  %v4567_v43 = vmul.f32 %v6618_v10, %v3615_v14  ;;  %v6935_v4 = vld [vmem:[#allocation13 + $0x1f8] sm:$0xff]  }
 0x534   : > { %v4438_v63 = vmul.f32 %v6555_v35, %v3506_v1  ;;  %v3619_v58 = vpop.f32.mrb[107].mxu0  ;;  %v4503_v19 = vmul.f32 %v6587_v32, %v3617_v57  ;;  %v6590_v0 = vunpack.c.l.bf16 %v6928_v56  ;;  %v6559_v13 = vunpack.c.h.bf16 %v6921_v60  ;;  %v6625_v60 = vld [vmem:[#allocation13 + $0x200] sm:$0xff]  }
 0x535   : > { %v4453_v44 = vadd.f32 %v4437_v7, %v4388_v8  ;;  %v4389_v53 = vadd.f32 %v4373_v11, %v8841_v6  ;;  %v4568_v9 = vmul.f32 %v6619_v48, %v3619_v58  ;;  %v6622_v11 = vunpack.c.l.bf16 %v6935_v4 }
 0x536   : > { %v6591_v32 = vunpack.c.h.bf16 %v6928_v56 }
 0x537   : > { %v4518_v55 = vadd.f32 %v4502_v59, %v4453_v44  ;;  %v4454_v45 = vadd.f32 %v4438_v63, %v4389_v53  ;;  %v6657_v59 = vld [vmem:[#allocation13 + $0x240] sm:$0xff]  }
 0x538   : > { %v3510_v62 = vpop.f32.mrb[92].mxu1 }
 0x539   : > { %v8885_v37 = vadd.f32 %v4567_v43, %v4518_v55  ;;  %v4519_v35 = vadd.f32 %v4503_v19, %v4454_v45  ;;  %v4374_v5 = vmul.f32 %v6526_v16, %v3510_v62  ;;  %v3623_v3 = vpop.f32.mrb[108].mxu0  ;;  %v3512_v7 = vpop.f32.mrb[93].mxu1  ;;  %v6626_v55 = vunpack.c.l.bf16 %v6625_v60 }
 0x53a   : > { %v4439_v6 = vmul.f32 %v6558_v39, %v3512_v7  ;;  %v3625_v8 = vpop.f32.mrb[109].mxu0  ;;  %v3514_v1 = vpop.f32.mrb[94].mxu1  ;;  %v4504_v58 = vmul.f32 %v6590_v0, %v3623_v3  ;;  %v6623_v39 = vunpack.c.h.bf16 %v6935_v4  ;;  %v6658_v43 = vunpack.c.l.bf16 %v6657_v59 }
 0x53b   : > { %v8887_v33 = vadd.f32 %v4568_v9, %v4519_v35  ;;  %v4390_v14 = vadd.f32 %v4374_v5, %v8843_v2  ;;  %v4375_v10 = vmul.f32 %v6527_v41, %v3514_v1  ;;  %v3627_v57 = vpop.f32.mrb[110].mxu0  ;;  %v3516_v63 = vpop.f32.mrb[95].mxu1  ;;  %v4569_v45 = vmul.f32 %v6622_v11, %v3625_v8  ;;  %v6689_v2 = vld [vmem:[#allocation13 + $0x280] sm:$0xff]   ;;  %v6936_v11 = vld [vmem:[#allocation13 + $0x208] sm:$0xff]  }
 0x53c   : > { %v4440_v44 = vmul.f32 %v6559_v13, %v3516_v63  ;;  %v3629_v53 = vpop.f32.mrb[111].mxu0  ;;  %v4505_v62 = vmul.f32 %v6591_v32, %v3627_v57  ;;  %v6627_v41 = vunpack.c.h.bf16 %v6625_v60  ;;  %v6721_v13 = vld [vmem:[#allocation13 + $0x2c0] sm:$0xff]   ;;  %v6659_v1 = vunpack.c.h.bf16 %v6657_v59 }
 0x53d   : > { %v4455_v48 = vadd.f32 %v4439_v6, %v4390_v14  ;;  %v4391_v16 = vadd.f32 %v4375_v10, %v8845_v20  ;;  %v4570_v5 = vmul.f32 %v6623_v39, %v3629_v53  ;;  %v6690_v6 = vunpack.c.l.bf16 %v6689_v2 }
 0x53e   : > { %v6722_v32 = vunpack.c.l.bf16 %v6721_v13 }
 0x53f   : > { %v4520_v19 = vadd.f32 %v4504_v58, %v4455_v48  ;;  %v4456_v35 = vadd.f32 %v4440_v44, %v4391_v16  ;;  %v6691_v44 = vunpack.c.h.bf16 %v6689_v2  ;;  %v6943_v58 = vld [vmem:[#allocation13 + $0x248] sm:$0xff]   ;;  %v6723_v16 = vunpack.c.h.bf16 %v6721_v13 }
 0x541   : > { %v8891_v9 = vadd.f32 %v4569_v45, %v4520_v19  ;;  %v4521_v56 = vadd.f32 %v4505_v62, %v4456_v35  ;;  %v3666_v7 = vpop.f32.mrb[96].mxu1  ;;  %v6630_v45 = vunpack.c.l.bf16 %v6936_v11  ;;  %v6662_v62 = vunpack.c.l.bf16 %v6943_v58 }
 0x542   : > { %v4620_v0 = vmul.f32 %v6626_v55, %v3666_v7  ;;  %v3779_v3 = vpop.f32.mrb[112].mxu0  ;;  %v3668_v20 = vpop.f32.mrb[97].mxu1  ;;  %v6631_v35 = vunpack.c.h.bf16 %v6936_v11  ;;  %v6937_v11 = vld [vmem:[#allocation13 + $0x210] sm:$0xff]  }
 0x543   : > { %v8893_v4 = vadd.f32 %v4570_v5, %v4521_v56  ;;  %v4685_v14 = vmul.f32 %v6658_v43, %v3668_v20  ;;  %v3781_v10 = vpop.f32.mrb[113].mxu0  ;;  %v3670_v8 = vpop.f32.mrb[98].mxu1  ;;  %v4750_v39 = vmul.f32 %v6690_v6, %v3779_v3  ;;  %v6950_v43 = vld [vmem:[#allocation13 + $0x288] sm:$0xff]   ;;  %v6663_v20 = vunpack.c.h.bf16 %v6943_v58 }
 0x544   : > { %v4636_v57 = vadd.f32 %v4620_v0, %v8849_v18  ;;  %v4621_v63 = vmul.f32 %v6627_v41, %v3670_v8  ;;  %v3783_v60 = vpop.f32.mrb[114].mxu0  ;;  %v3672_v53 = vpop.f32.mrb[99].mxu1  ;;  %v4815_v5 = vmul.f32 %v6722_v32, %v3781_v10  ;;  %v6957_v41 = vld [vmem:[#allocation13 + $0x2c8] sm:$0xff]   ;;  %v6694_v2 = vunpack.c.l.bf16 %v6950_v43 }
 0x545   : > { %v4686_v48 = vmul.f32 %v6659_v1, %v3672_v53  ;;  %v3785_v59 = vpop.f32.mrb[115].mxu0  ;;  %v4751_v18 = vmul.f32 %v6691_v44, %v3783_v60  ;;  %v6695_v44 = vunpack.c.h.bf16 %v6950_v43 }
 0x546   : > { %v4701_v55 = vadd.f32 %v4685_v14, %v4636_v57  ;;  %v4637_v19 = vadd.f32 %v4621_v63, %v8851_v42  ;;  %v4816_v13 = vmul.f32 %v6723_v16, %v3785_v59  ;;  %v6726_v63 = vunpack.c.l.bf16 %v6957_v41 }
 0x547   : > { %v6727_v59 = vunpack.c.h.bf16 %v6957_v41 }
 0x548   : > { %v4766_v56 = vadd.f32 %v4750_v39, %v4701_v55  ;;  %v4702_v7 = vadd.f32 %v4686_v48, %v4637_v19  ;;  %v6944_v48 = vld [vmem:[#allocation13 + $0x250] sm:$0xff]  }
 0x549   : > { %v3676_v0 = vpop.f32.mrb[100].mxu1 }
 0x54a   : > { %v8897_v8 = vadd.f32 %v4815_v5, %v4766_v56  ;;  %v4767_v1 = vadd.f32 %v4751_v18, %v4702_v7  ;;  %v4622_v3 = vmul.f32 %v6630_v45, %v3676_v0  ;;  %v3789_v6 = vpop.f32.mrb[116].mxu0  ;;  %v3678_v14 = vpop.f32.mrb[101].mxu1  ;;  %v6634_v56 = vunpack.c.l.bf16 %v6937_v11  ;;  %v6951_v5 = vld [vmem:[#allocation13 + $0x290] sm:$0xff]  }
 0x54b   : > { %v4687_v42 = vmul.f32 %v6662_v62, %v3678_v14  ;;  %v3791_v57 = vpop.f32.mrb[117].mxu0  ;;  %v3680_v53 = vpop.f32.mrb[102].mxu1  ;;  %v4752_v16 = vmul.f32 %v6694_v2, %v3789_v6  ;;  %v6666_v18 = vunpack.c.l.bf16 %v6944_v48  ;;  %v6635_v7 = vunpack.c.h.bf16 %v6937_v11  ;;  %v6938_v11 = vld [vmem:[#allocation13 + $0x218] sm:$0xff]  }
 0x54c   : > { %v8899_v39 = vadd.f32 %v4816_v13, %v4767_v1  ;;  %v4638_v10 = vadd.f32 %v4622_v3, %v8855_v34  ;;  %v4623_v32 = vmul.f32 %v6631_v35, %v3680_v53  ;;  %v3793_v60 = vpop.f32.mrb[118].mxu0  ;;  %v3682_v58 = vpop.f32.mrb[103].mxu1  ;;  %v4817_v1 = vmul.f32 %v6726_v63, %v3791_v57  ;;  %v6958_v35 = vld [vmem:[#allocation13 + $0x2d0] sm:$0xff]  }
 0x54d   : > { %v4688_v55 = vmul.f32 %v6663_v20, %v3682_v58  ;;  %v3795_v19 = vpop.f32.mrb[119].mxu0  ;;  %v4753_v13 = vmul.f32 %v6695_v44, %v3793_v60  ;;  %v6698_v43 = vunpack.c.l.bf16 %v6951_v5  ;;  %v6667_v14 = vunpack.c.h.bf16 %v6944_v48 }
 0x54e   : > { %v4703_v45 = vadd.f32 %v4687_v42, %v4638_v10  ;;  %v4639_v62 = vadd.f32 %v4623_v32, %v8857_v40  ;;  %v4818_v41 = vmul.f32 %v6727_v59, %v3795_v19  ;;  %v6730_v32 = vunpack.c.l.bf16 %v6958_v35 }
 0x54f   : > { %v6699_v44 = vunpack.c.h.bf16 %v6951_v5  ;;  %v6731_v19 = vunpack.c.h.bf16 %v6958_v35 }
 0x550   : > { %v4768_v0 = vadd.f32 %v4752_v16, %v4703_v45  ;;  %v4704_v34 = vadd.f32 %v4688_v55, %v4639_v62  ;;  %v6945_v55 = vld [vmem:[#allocation13 + $0x258] sm:$0xff]  }
 0x551   : > { %v3686_v3 = vpop.f32.mrb[104].mxu1 }
 0x552   : > { %v8903_v53 = vadd.f32 %v4817_v1, %v4768_v0  ;;  %v4769_v20 = vadd.f32 %v4753_v13, %v4704_v34  ;;  %v4624_v2 = vmul.f32 %v6634_v56, %v3686_v3  ;;  %v3799_v6 = vpop.f32.mrb[120].mxu0  ;;  %v3688_v42 = vpop.f32.mrb[105].mxu1  ;;  %v6638_v0 = vunpack.c.l.bf16 %v6938_v11  ;;  %v6952_v1 = vld [vmem:[#allocation13 + $0x298] sm:$0xff]  }
 0x553   : > { %v4689_v40 = vmul.f32 %v6666_v18, %v3688_v42  ;;  %v3801_v10 = vpop.f32.mrb[121].mxu0  ;;  %v3690_v58 = vpop.f32.mrb[106].mxu1  ;;  %v4754_v59 = vmul.f32 %v6698_v43, %v3799_v6  ;;  %v6670_v13 = vunpack.c.l.bf16 %v6945_v55  ;;  %v6639_v34 = vunpack.c.h.bf16 %v6938_v11  ;;  %v6939_v11 = vld [vmem:[#allocation13 + $0x220] sm:$0xff]  }
 0x554   : > { %v8905_v16 = vadd.f32 %v4818_v41, %v4769_v20  ;;  %v4640_v57 = vadd.f32 %v4624_v2, %v8861_v17  ;;  %v4625_v63 = vmul.f32 %v6635_v7, %v3690_v58  ;;  %v3803_v60 = vpop.f32.mrb[122].mxu0  ;;  %v3692_v48 = vpop.f32.mrb[107].mxu1  ;;  %v4819_v20 = vmul.f32 %v6730_v32, %v3801_v10  ;;  %v6959_v7 = vld [vmem:[#allocation13 + $0x2d8] sm:$0xff]  }
 0x555   : > { %v4690_v45 = vmul.f32 %v6667_v14, %v3692_v48  ;;  %v3805_v62 = vpop.f32.mrb[123].mxu0  ;;  %v4755_v41 = vmul.f32 %v6699_v44, %v3803_v60  ;;  %v6702_v5 = vunpack.c.l.bf16 %v6952_v1  ;;  %v6671_v42 = vunpack.c.h.bf16 %v6945_v55 }
 0x556   : > { %v4705_v56 = vadd.f32 %v4689_v40, %v4640_v57  ;;  %v4641_v18 = vadd.f32 %v4625_v63, %v8863_v51  ;;  %v4820_v35 = vmul.f32 %v6731_v19, %v3805_v62  ;;  %v6734_v63 = vunpack.c.l.bf16 %v6959_v7 }
 0x557   : > { %v6703_v44 = vunpack.c.h.bf16 %v6952_v1  ;;  %v6735_v62 = vunpack.c.h.bf16 %v6959_v7 }
 0x558   : > { %v4770_v3 = vadd.f32 %v4754_v59, %v4705_v56  ;;  %v4706_v17 = vadd.f32 %v4690_v45, %v4641_v18  ;;  %v6946_v45 = vld [vmem:[#allocation13 + $0x260] sm:$0xff]  }
 0x559   : > { %v3696_v2 = vpop.f32.mrb[108].mxu1 }
 0x55a   : > { %v8909_v58 = vadd.f32 %v4819_v20, %v4770_v3  ;;  %v4771_v14 = vadd.f32 %v4755_v41, %v4706_v17  ;;  %v4626_v43 = vmul.f32 %v6638_v0, %v3696_v2  ;;  %v3809_v6 = vpop.f32.mrb[124].mxu0  ;;  %v3698_v40 = vpop.f32.mrb[109].mxu1  ;;  %v6642_v3 = vunpack.c.l.bf16 %v6939_v11  ;;  %v6953_v20 = vld [vmem:[#allocation13 + $0x2a0] sm:$0xff]  }
 0x55b   : > { %v4691_v51 = vmul.f32 %v6670_v13, %v3698_v40  ;;  %v3811_v57 = vpop.f32.mrb[125].mxu0  ;;  %v3700_v48 = vpop.f32.mrb[110].mxu1  ;;  %v4756_v19 = vmul.f32 %v6702_v5, %v3809_v6  ;;  %v6674_v41 = vunpack.c.l.bf16 %v6946_v45  ;;  %v6643_v17 = vunpack.c.h.bf16 %v6939_v11  ;;  %v6940_v11 = vld [vmem:[#allocation13 + $0x228] sm:$0xff]  }
 0x55c   : > { %v8911_v59 = vadd.f32 %v4820_v35, %v4771_v14  ;;  %v4642_v10 = vadd.f32 %v4626_v43, %v8867_v38  ;;  %v4627_v32 = vmul.f32 %v6639_v34, %v3700_v48  ;;  %v3813_v60 = vpop.f32.mrb[126].mxu0  ;;  %v3702_v55 = vpop.f32.mrb[111].mxu1  ;;  %v4821_v14 = vmul.f32 %v6734_v63, %v3811_v57  ;;  %v6960_v34 = vld [vmem:[#allocation13 + $0x2e0] sm:$0xff]  }
 0x55d   : > { %v4692_v56 = vmul.f32 %v6671_v42, %v3702_v55  ;;  %v3815_v18 = vpop.f32.mrb[127].mxu0  ;;  %v4757_v35 = vmul.f32 %v6703_v44, %v3813_v60  ;;  %v6706_v1 = vunpack.c.l.bf16 %v6953_v20  ;;  %v6675_v40 = vunpack.c.h.bf16 %v6946_v45 }
 0x55e   : > { %v4707_v0 = vadd.f32 %v4691_v51, %v4642_v10  ;;  %v4643_v13 = vadd.f32 %v4627_v32, %v8869_v36  ;;  %v4822_v7 = vmul.f32 %v6735_v62, %v3815_v18  ;;  %v6738_v32 = vunpack.c.l.bf16 %v6960_v34 }
 0x55f   : > { %v6707_v44 = vunpack.c.h.bf16 %v6953_v20  ;;  %v6739_v18 = vunpack.c.h.bf16 %v6960_v34 }
 0x560   : > { %v4772_v2 = vadd.f32 %v4756_v19, %v4707_v0  ;;  %v4708_v38 = vadd.f32 %v4692_v56, %v4643_v13  ;;  %v6947_v56 = vld [vmem:[#allocation13 + $0x268] sm:$0xff]  }
 0x561   : > { %v3706_v43 = vpop.f32.mrb[112].mxu1 }
 0x562   : > { %v8915_v48 = vadd.f32 %v4821_v14, %v4772_v2  ;;  %v4773_v42 = vadd.f32 %v4757_v35, %v4708_v38  ;;  %v4628_v5 = vmul.f32 %v6642_v3, %v3706_v43  ;;  %v3819_v6 = vpop.f32.mrb[128].mxu0  ;;  %v3708_v51 = vpop.f32.mrb[113].mxu1  ;;  %v6646_v2 = vunpack.c.l.bf16 %v6940_v11  ;;  %v6954_v14 = vld [vmem:[#allocation13 + $0x2a8] sm:$0xff]  }
 0x563   : > { %v4693_v36 = vmul.f32 %v6674_v41, %v3708_v51  ;;  %v3821_v10 = vpop.f32.mrb[129].mxu0  ;;  %v3710_v55 = vpop.f32.mrb[114].mxu1  ;;  %v4758_v62 = vmul.f32 %v6706_v1, %v3819_v6  ;;  %v6678_v35 = vunpack.c.l.bf16 %v6947_v56  ;;  %v6647_v38 = vunpack.c.h.bf16 %v6940_v11  ;;  %v6941_v11 = vld [vmem:[#allocation13 + $0x230] sm:$0xff]  }
 0x564   : > { %v8917_v19 = vadd.f32 %v4822_v7, %v4773_v42  ;;  %v4644_v57 = vadd.f32 %v4628_v5, %v8873_v15  ;;  %v4629_v63 = vmul.f32 %v6643_v17, %v3710_v55  ;;  %v3823_v60 = vpop.f32.mrb[130].mxu0  ;;  %v3712_v45 = vpop.f32.mrb[115].mxu1  ;;  %v4823_v42 = vmul.f32 %v6738_v32, %v3821_v10  ;;  %v6961_v17 = vld [vmem:[#allocation13 + $0x2e8] sm:$0xff]  }
 0x565   : > { %v4694_v0 = vmul.f32 %v6675_v40, %v3712_v45  ;;  %v3825_v13 = vpop.f32.mrb[131].mxu0  ;;  %v4759_v7 = vmul.f32 %v6707_v44, %v3823_v60  ;;  %v6710_v20 = vunpack.c.l.bf16 %v6954_v14  ;;  %v6679_v51 = vunpack.c.h.bf16 %v6947_v56 }
 0x566   : > { %v4709_v3 = vadd.f32 %v4693_v36, %v4644_v57  ;;  %v4645_v41 = vadd.f32 %v4629_v63, %v8875_v61  ;;  %v4824_v34 = vmul.f32 %v6739_v18, %v3825_v13  ;;  %v6742_v63 = vunpack.c.l.bf16 %v6961_v17 }
 0x567   : > { %v6711_v44 = vunpack.c.h.bf16 %v6954_v14  ;;  %v6743_v13 = vunpack.c.h.bf16 %v6961_v17 }
 0x568   : > { %v4774_v43 = vadd.f32 %v4758_v62, %v4709_v3  ;;  %v4710_v15 = vadd.f32 %v4694_v0, %v4645_v41  ;;  %v6948_v0 = vld [vmem:[#allocation13 + $0x270] sm:$0xff]  }
 0x569   : > { %v3716_v5 = vpop.f32.mrb[116].mxu1 }
 0x56a   : > { %v8921_v55 = vadd.f32 %v4823_v42, %v4774_v43  ;;  %v4775_v40 = vadd.f32 %v4759_v7, %v4710_v15  ;;  %v4630_v1 = vmul.f32 %v6646_v2, %v3716_v5  ;;  %v3829_v6 = vpop.f32.mrb[132].mxu0  ;;  %v3718_v36 = vpop.f32.mrb[117].mxu1  ;;  %v6650_v43 = vunpack.c.l.bf16 %v6941_v11  ;;  %v6955_v42 = vld [vmem:[#allocation13 + $0x2b0] sm:$0xff]  }
 0x56b   : > { %v4695_v61 = vmul.f32 %v6678_v35, %v3718_v36  ;;  %v3831_v57 = vpop.f32.mrb[133].mxu0  ;;  %v3720_v45 = vpop.f32.mrb[118].mxu1  ;;  %v4760_v18 = vmul.f32 %v6710_v20, %v3829_v6  ;;  %v6682_v7 = vunpack.c.l.bf16 %v6948_v0  ;;  %v6651_v15 = vunpack.c.h.bf16 %v6941_v11  ;;  %v6942_v11 = vld [vmem:[#allocation13 + $0x238] sm:$0xff]  }
 0x56c   : > { %v8923_v62 = vadd.f32 %v4824_v34, %v4775_v40  ;;  %v4646_v10 = vadd.f32 %v4630_v1, %v8879_v46  ;;  %v4631_v32 = vmul.f32 %v6647_v38, %v3720_v45  ;;  %v3833_v60 = vpop.f32.mrb[134].mxu0  ;;  %v3722_v56 = vpop.f32.mrb[119].mxu1  ;;  %v4825_v40 = vmul.f32 %v6742_v63, %v3831_v57  ;;  %v6962_v38 = vld [vmem:[#allocation13 + $0x2f0] sm:$0xff]  }
 0x56d   : > { %v4696_v3 = vmul.f32 %v6679_v51, %v3722_v56  ;;  %v3835_v41 = vpop.f32.mrb[135].mxu0  ;;  %v4761_v34 = vmul.f32 %v6711_v44, %v3833_v60  ;;  %v6714_v14 = vunpack.c.l.bf16 %v6955_v42  ;;  %v6683_v36 = vunpack.c.h.bf16 %v6948_v0 }
 0x56e   : > { %v4711_v2 = vadd.f32 %v4695_v61, %v4646_v10  ;;  %v4647_v35 = vadd.f32 %v4631_v32, %v8881_v47  ;;  %v4826_v17 = vmul.f32 %v6743_v13, %v3835_v41  ;;  %v6746_v32 = vunpack.c.l.bf16 %v6962_v38 }
 0x56f   : > { %v6715_v44 = vunpack.c.h.bf16 %v6955_v42  ;;  %v6747_v41 = vunpack.c.h.bf16 %v6962_v38 }
 0x570   : > { %v4776_v5 = vadd.f32 %v4760_v18, %v4711_v2  ;;  %v4712_v46 = vadd.f32 %v4696_v3, %v4647_v35  ;;  %v6949_v3 = vld [vmem:[#allocation13 + $0x278] sm:$0xff]  }
 0x571   : > { %v3726_v1 = vpop.f32.mrb[120].mxu1 }
 0x572   : > { %v8927_v45 = vadd.f32 %v4825_v40, %v4776_v5  ;;  %v4777_v51 = vadd.f32 %v4761_v34, %v4712_v46  ;;  %v4632_v20 = vmul.f32 %v6650_v43, %v3726_v1  ;;  %v3839_v6 = vpop.f32.mrb[136].mxu0  ;;  %v3728_v61 = vpop.f32.mrb[121].mxu1  ;;  %v6654_v5 = vunpack.c.l.bf16 %v6942_v11  ;;  %v6956_v40 = vld [vmem:[#allocation13 + $0x2b8] sm:$0xff]  }
 0x573   : > { %v4697_v47 = vmul.f32 %v6682_v7, %v3728_v61  ;;  %v3841_v10 = vpop.f32.mrb[137].mxu0  ;;  %v3730_v56 = vpop.f32.mrb[122].mxu1  ;;  %v4762_v13 = vmul.f32 %v6714_v14, %v3839_v6  ;;  %v6686_v34 = vunpack.c.l.bf16 %v6949_v3  ;;  %v6655_v46 = vunpack.c.h.bf16 %v6942_v11 }
 0x574   : > { %v8929_v18 = vadd.f32 %v4826_v17, %v4777_v51  ;;  %v4648_v57 = vadd.f32 %v4632_v20, %v8885_v37  ;;  %v4633_v63 = vmul.f32 %v6651_v15, %v3730_v56  ;;  %v3843_v60 = vpop.f32.mrb[138].mxu0  ;;  %v3732_v0 = vpop.f32.mrb[123].mxu1  ;;  %v4827_v51 = vmul.f32 %v6746_v32, %v3841_v10  ;;  %v6963_v15 = vld [vmem:[#allocation13 + $0x2f8] sm:$0xff]  }
 0x575   : > { %v4698_v2 = vmul.f32 %v6683_v36, %v3732_v0  ;;  %v3845_v35 = vpop.f32.mrb[139].mxu0  ;;  %v4763_v17 = vmul.f32 %v6715_v44, %v3843_v60  ;;  %v6718_v42 = vunpack.c.l.bf16 %v6956_v40  ;;  %v6687_v61 = vunpack.c.h.bf16 %v6949_v3  ;;  %v6753_v3 = vld [vmem:[#allocation13 + $0x300] sm:$0xff]  }
 0x576   : > { %v4713_v43 = vadd.f32 %v4697_v47, %v4648_v57  ;;  %v4649_v7 = vadd.f32 %v4633_v63, %v8887_v33  ;;  %v4828_v38 = vmul.f32 %v6747_v41, %v3845_v35  ;;  %v6750_v63 = vunpack.c.l.bf16 %v6963_v15 }
 0x577   : > { %v6719_v44 = vunpack.c.h.bf16 %v6956_v40 }
 0x578   : > { %v4778_v1 = vadd.f32 %v4762_v13, %v4713_v43  ;;  %v4714_v37 = vadd.f32 %v4698_v2, %v4649_v7  ;;  %v6785_v13 = vld [vmem:[#allocation13 + $0x340] sm:$0xff]  }
 0x579   : > { %v3736_v20 = vpop.f32.mrb[124].mxu1 }
 0x57a   : > { %v8933_v56 = vadd.f32 %v4827_v51, %v4778_v1  ;;  %v4779_v36 = vadd.f32 %v4763_v17, %v4714_v37  ;;  %v4634_v14 = vmul.f32 %v6654_v5, %v3736_v20  ;;  %v3849_v6 = vpop.f32.mrb[140].mxu0  ;;  %v3738_v47 = vpop.f32.mrb[125].mxu1  ;;  %v6754_v1 = vunpack.c.l.bf16 %v6753_v3 }
 0x57b   : > { %v4699_v33 = vmul.f32 %v6686_v34, %v3738_v47  ;;  %v3851_v57 = vpop.f32.mrb[141].mxu0  ;;  %v3740_v0 = vpop.f32.mrb[126].mxu1  ;;  %v4764_v35 = vmul.f32 %v6718_v42, %v3849_v6  ;;  %v6751_v34 = vunpack.c.h.bf16 %v6963_v15  ;;  %v6786_v51 = vunpack.c.l.bf16 %v6785_v13 }
 0x57c   : > { %v8935_v11 = vadd.f32 %v4828_v38, %v4779_v36  ;;  %v4650_v10 = vadd.f32 %v4634_v14, %v8891_v9  ;;  %v4635_v32 = vmul.f32 %v6655_v46, %v3740_v0  ;;  %v3853_v60 = vpop.f32.mrb[142].mxu0  ;;  %v3742_v2 = vpop.f32.mrb[127].mxu1  ;;  %v4829_v37 = vmul.f32 %v6750_v63, %v3851_v57  ;;  %v6817_v9 = vld [vmem:[#allocation13 + $0x380] sm:$0xff]  }
 0x57d   : > { %v4700_v43 = vmul.f32 %v6687_v61, %v3742_v2  ;;  %v3855_v7 = vpop.f32.mrb[143].mxu0  ;;  %v4765_v20 = vmul.f32 %v6719_v44, %v3853_v60  ;;  %v6755_v46 = vunpack.c.h.bf16 %v6753_v3  ;;  %v951_v38 = vpop.permute.xlu0 %950  ;;  %v6849_v0 = vld [vmem:[#allocation13 + $0x3c0] sm:$0xff]   ;;  %v6787_v42 = vunpack.c.h.bf16 %v6785_v13  ;;  %v6964_v60 = vld [vmem:[#allocation13 + $0x308] sm:$0xff]  }
 0x57e   : > { %v4715_v41 = vadd.f32 %v4699_v33, %v4650_v10  ;;  %v4651_v5 = vadd.f32 %v4635_v32, %v8893_v4  ;;  %v4830_v47 = vmul.f32 %v6751_v34, %v3855_v7  ;;  %v6818_v4 = vunpack.c.l.bf16 %v6817_v9 }
 0x57f   : > { %v6850_v2 = vunpack.c.l.bf16 %v6849_v0  ;;  %v6851_v34 = vunpack.c.h.bf16 %v6849_v0 }
 0x580   : > { %v4780_v17 = vadd.f32 %v4764_v35, %v4715_v41  ;;  %v4716_v36 = vadd.f32 %v4700_v43, %v4651_v5  ;;  %v6819_v35 = vunpack.c.h.bf16 %v6817_v9  ;;  %v6971_v41 = vld [vmem:[#allocation13 + $0x348] sm:$0xff]   ;;  %v961_v9 = vpop.permute.xlu1 %960 }
 0x582   : > { %v8939_v40 = vadd.f32 %v4829_v37, %v4780_v17  ;;  %v4781_v14 = vadd.f32 %v4765_v20, %v4716_v36  ;;  %v3892_v61 = vpop.f32.mrb[128].mxu1  ;;  %v6758_v20 = vunpack.c.l.bf16 %v6964_v60  ;;  %v6790_v36 = vunpack.c.l.bf16 %v6971_v41 }
 0x583   : > { %v4880_v6 = vmul.f32 %v6754_v1, %v3892_v61  ;;  %v4005_v33 = vpop.f32.mrb[144].mxu0  ;;  %v3894_v15 = vpop.f32.mrb[129].mxu1 }
 0x584   : > { %v8941_v10 = vadd.f32 %v4830_v47, %v4781_v14  ;;  %v4945_v32 = vmul.f32 %v6786_v51, %v3894_v15  ;;  %v4007_v57 = vpop.f32.mrb[145].mxu0  ;;  %v3896_v63 = vpop.f32.mrb[130].mxu1  ;;  %v5010_v1 = vmul.f32 %v6818_v4, %v4005_v33  ;;  %v6978_v51 = vld [vmem:[#allocation13 + $0x388] sm:$0xff]   ;;  %v6759_v14 = vunpack.c.h.bf16 %v6964_v60 }
 0x585   : > { %v4896_v44 = vadd.f32 %v4880_v6, %v8897_v8  ;;  %v4881_v3 = vmul.f32 %v6755_v46, %v3896_v63  ;;  %v4009_v43 = vpop.f32.mrb[146].mxu0  ;;  %v3898_v7 = vpop.f32.mrb[131].mxu1  ;;  %v5075_v8 = vmul.f32 %v6850_v2, %v4007_v57  ;;  %v6985_v15 = vld [vmem:[#allocation13 + $0x3c8] sm:$0xff]   ;;  %v6822_v30 = vunpack.c.l.bf16 %v6978_v51 }
 0x586   : > { %v4946_v5 = vmul.f32 %v6787_v42, %v3898_v7  ;;  %v4011_v13 = vpop.f32.mrb[147].mxu0  ;;  %v956_v47 = vpop.permute.xlu0 %955  ;;  %v5011_v6 = vmul.f32 %v6819_v35, %v4009_v43  ;;  %v6791_v42 = vunpack.c.h.bf16 %v6971_v41  ;;  %v6854_v2 = vunpack.c.l.bf16 %v6985_v15 }
 0x587   : > { %v4961_v17 = vadd.f32 %v4945_v32, %v4896_v44  ;;  %v4897_v37 = vadd.f32 %v4881_v3, %v8899_v39  ;;  %v5076_v33 = vmul.f32 %v6851_v34, %v4011_v13  ;;  %v6965_v44 = vld [vmem:[#allocation13 + $0x310] sm:$0xff]   ;;  %v1111_v3 = vadd.f32 %v8414_v50, %v951_v38 }
 0x588   : > { %v1114_v60 = vadd.f32 %v8418_v54, %v956_v47  ;;  %v6972_v13 = vld [vmem:[#allocation13 + $0x350] sm:$0xff]   ;;  %v6762_v50 = vunpack.c.l.bf16 %v6965_v44 }
 0x589   : > { %v5026_v61 = vadd.f32 %v5010_v1, %v4961_v17  ;;  %v4962_v46 = vadd.f32 %v4946_v5, %v4897_v37  ;;  %v6823_v37 = vunpack.c.h.bf16 %v6978_v51  ;;  %v966_v51 = vpop.permute.xlu1 %965 }
 0x58a   : > { %v3902_v63 = vpop.f32.mrb[132].mxu1 }
 0x58b   : > { %v5091_v7 = vadd.f32 %v5075_v8, %v5026_v61  ;;  %v5027_v0 = vadd.f32 %v5011_v6, %v4962_v46  ;;  %v4882_v4 = vmul.f32 %v6758_v20, %v3902_v63  ;;  %v4015_v32 = vpop.f32.mrb[148].mxu0  ;;  %v3904_v39 = vpop.f32.mrb[133].mxu1  ;;  %v6855_v8 = vunpack.c.h.bf16 %v6985_v15  ;;  %v6979_v46 = vld [vmem:[#allocation13 + $0x390] sm:$0xff]  }
 0x58c   : > { %v4947_v1 = vmul.f32 %v6790_v36, %v3904_v39  ;;  %v4017_v57 = vpop.f32.mrb[149].mxu0  ;;  %v3906_v43 = vpop.f32.mrb[134].mxu1  ;;  %v5012_v38 = vmul.f32 %v6822_v30, %v4015_v32  ;;  %v6986_v15 = vld [vmem:[#allocation13 + $0x3d0] sm:$0xff]   ;;  %v6826_v30 = vunpack.c.l.bf16 %v6979_v46 }
 0x58d   : > { %v5092_v35 = vadd.f32 %v5076_v33, %v5027_v0  ;;  %v4898_v5 = vadd.f32 %v4882_v4, %v8903_v53  ;;  %v4883_v17 = vmul.f32 %v6759_v14, %v3906_v43  ;;  %v4019_v41 = vpop.f32.mrb[150].mxu0  ;;  %v3908_v61 = vpop.f32.mrb[135].mxu1  ;;  %v8948_v6 = vadd.f32 %v5091_v7, %v1111_v3  ;;  %v6966_v43 = vld [vmem:[#allocation13 + $0x318] sm:$0xff]  }
 0x58e   : > { %v4948_v34 = vmul.f32 %v6791_v42, %v3908_v61  ;;  %v4021_v20 = vpop.f32.mrb[151].mxu0  ;;  %v6794_v53 = vunpack.c.l.bf16 %v6972_v13  ;;  %v6763_v14 = vunpack.c.h.bf16 %v6965_v44  ;;  %v5077_v0 = vmul.f32 %v6854_v2, %v4017_v57 }
 0x58f   : > { %v4963_v54 = vadd.f32 %v4947_v1, %v4898_v5  ;;  %v4899_v36 = vadd.f32 %v4883_v17, %v8905_v16  ;;  %v8951_v47 = vadd.f32 %v5092_v35, %v1114_v60  ;;  %5123 = vadd.xlane.f32.xlu0 %v8948_v6  ;;  %v5013_v42 = vmul.f32 %v6823_v37, %v4019_v41 }
 0x590   : > { %v6795_v4 = vunpack.c.h.bf16 %v6972_v13  ;;  %v5078_v39 = vmul.f32 %v6855_v8, %v4021_v20  ;;  %v1119_v44 = vadd.f32 %v8411_v49, %v961_v9  ;;  %v1122_v35 = vadd.f32 %v8416_v52, %v966_v51  ;;  %v6973_v20 = vld [vmem:[#allocation13 + $0x358] sm:$0xff]  }
 0x591   : > { %v5028_v63 = vadd.f32 %v5012_v38, %v4963_v54  ;;  %v4964_v33 = vadd.f32 %v4948_v34, %v4899_v36  ;;  %5125 = vadd.xlane.f32.xlu1 %v8951_v47  ;;  %v6858_v5 = vunpack.c.l.bf16 %v6986_v15  ;;  %v6827_v34 = vunpack.c.h.bf16 %v6979_v46  ;;  %v6980_v51 = vld [vmem:[#allocation13 + $0x398] sm:$0xff]   ;;  %v976_v46 = vpop.permute.xlu1 %975 }
 0x592   : > { %v3912_v7 = vpop.f32.mrb[136].mxu1  ;;  %v6859_v54 = vunpack.c.h.bf16 %v6986_v15  ;;  %v6766_v49 = vunpack.c.l.bf16 %v6966_v43  ;;  %v6987_v15 = vld [vmem:[#allocation13 + $0x3d8] sm:$0xff]  }
 0x593   : > { %v5093_v32 = vadd.f32 %v5077_v0, %v5028_v63  ;;  %v5029_v16 = vadd.f32 %v5013_v42, %v4964_v33  ;;  %v4884_v3 = vmul.f32 %v6762_v50, %v3912_v7  ;;  %v4025_v60 = vpop.f32.mrb[152].mxu0  ;;  %v3914_v1 = vpop.f32.mrb[137].mxu1 }
 0x594   : > { %v4949_v57 = vmul.f32 %v6794_v53, %v3914_v1  ;;  %v4027_v2 = vpop.f32.mrb[153].mxu0  ;;  %v3916_v17 = vpop.f32.mrb[138].mxu1  ;;  %v5014_v9 = vmul.f32 %v6826_v30, %v4025_v60  ;;  %v6799_v30 = vunpack.c.h.bf16 %v6973_v20 }
 0x595   : > { %v5094_v41 = vadd.f32 %v5078_v39, %v5029_v16  ;;  %v4900_v37 = vadd.f32 %v4884_v3, %v8909_v58  ;;  %v4885_v61 = vmul.f32 %v6763_v14, %v3916_v17  ;;  %v4029_v13 = vpop.f32.mrb[154].mxu0  ;;  %v3918_v38 = vpop.f32.mrb[139].mxu1  ;;  %v8958_v36 = vadd.f32 %v5093_v32, %v1119_v44 }
 0x596   : > { %v4950_v8 = vmul.f32 %v6795_v4, %v3918_v38  ;;  %v4031_v50 = vpop.f32.mrb[155].mxu0  ;;  %v6798_v58 = vunpack.c.l.bf16 %v6973_v20  ;;  %v6767_v14 = vunpack.c.h.bf16 %v6966_v43  ;;  %v5079_v42 = vmul.f32 %v6858_v5, %v4027_v2  ;;  %v971_v4 = vpop.permute.xlu0 %970 }
 0x597   : > { %v4965_v52 = vadd.f32 %v4949_v57, %v4900_v37  ;;  %v4901_v53 = vadd.f32 %v4885_v61, %v8911_v59  ;;  %v8961_v63 = vadd.f32 %v5094_v41, %v1122_v35  ;;  %5127 = vadd.xlane.f32.xlu0 %v8958_v36  ;;  %v5015_v33 = vmul.f32 %v6827_v34, %v4029_v13  ;;  %v6967_v35 = vld [vmem:[#allocation13 + $0x320] sm:$0xff]  }
 0x598   : > { %v6830_v16 = vunpack.c.l.bf16 %v6980_v51  ;;  %v5080_v59 = vmul.f32 %v6859_v54, %v4031_v50  ;;  %v1127_v57 = vadd.f32 %v8437_v22, %v971_v4  ;;  %v1130_v43 = vadd.f32 %v8441_v12, %v976_v46  ;;  %v6981_v46 = vld [vmem:[#allocation13 + $0x3a0] sm:$0xff]  }
 0x599   : > { %v5030_v0 = vadd.f32 %v5014_v9, %v4965_v52  ;;  %v4966_v7 = vadd.f32 %v4950_v8, %v4901_v53  ;;  %v6862_v5 = vunpack.c.l.bf16 %v6987_v15  ;;  %v6831_v38 = vunpack.c.h.bf16 %v6980_v51  ;;  %v6974_v8 = vld [vmem:[#allocation13 + $0x360] sm:$0xff]   ;;  %v986_v51 = vpop.permute.xlu1 %985 }
 0x59a   : > { %v3922_v32 = vpop.f32.mrb[140].mxu1  ;;  %v6770_v12 = vunpack.c.l.bf16 %v6967_v35  ;;  %v6988_v4 = vld [vmem:[#allocation13 + $0x3e0] sm:$0xff]  }
 0x59b   : > { %v5095_v39 = vadd.f32 %v5079_v42, %v5030_v0  ;;  %v5031_v3 = vadd.f32 %v5015_v33, %v4966_v7  ;;  %v4886_v60 = vmul.f32 %v6766_v49, %v3922_v32  ;;  %v4035_v1 = vpop.f32.mrb[156].mxu0  ;;  %v3924_v44 = vpop.f32.mrb[141].mxu1  ;;  %5129 = vadd.xlane.f32.xlu0 %v8961_v63  ;;  %v6863_v49 = vunpack.c.h.bf16 %v6987_v15 }
 0x59c   : > { %v4951_v17 = vmul.f32 %v6798_v58, %v3924_v44  ;;  %v4037_v2 = vpop.f32.mrb[157].mxu0  ;;  %v3926_v41 = vpop.f32.mrb[142].mxu1  ;;  %v5016_v9 = vmul.f32 %v6830_v16, %v4035_v1  ;;  %v6834_v16 = vunpack.c.l.bf16 %v6981_v46  ;;  %v6968_v44 = vld [vmem:[#allocation13 + $0x328] sm:$0xff]  }
 0x59d   : > { %v5096_v37 = vadd.f32 %v5080_v59, %v5031_v3  ;;  %v4902_v61 = vadd.f32 %v4886_v60, %v8915_v48  ;;  %v4887_v13 = vmul.f32 %v6767_v14, %v3926_v41  ;;  %v4039_v34 = vpop.f32.mrb[158].mxu0  ;;  %v3928_v20 = vpop.f32.mrb[143].mxu1  ;;  %v8968_v22 = vadd.f32 %v5095_v39, %v1127_v57 }
 0x59e   : > { %v4952_v50 = vmul.f32 %v6799_v30, %v3928_v20  ;;  %v4041_v54 = vpop.f32.mrb[159].mxu0  ;;  %v6802_v48 = vunpack.c.l.bf16 %v6974_v8  ;;  %v6771_v14 = vunpack.c.h.bf16 %v6967_v35  ;;  %v981_v0 = vpop.permute.xlu0 %980  ;;  %v5081_v33 = vmul.f32 %v6862_v5, %v4037_v2  ;;  %v6975_v20 = vld [vmem:[#allocation13 + $0x368] sm:$0xff]  }
 0x59f   : > { %v4967_v52 = vadd.f32 %v4951_v17, %v4902_v61  ;;  %v4903_v53 = vadd.f32 %v4887_v13, %v8917_v19  ;;  %v8971_v58 = vadd.f32 %v5096_v37, %v1130_v43  ;;  %5131 = vadd.xlane.f32.xlu1 %v8968_v22  ;;  %v5017_v7 = vmul.f32 %v6831_v38, %v4039_v34 }
 0x5a0   : > { %v6803_v30 = vunpack.c.h.bf16 %v6974_v8  ;;  %v5082_v3 = vmul.f32 %v6863_v49, %v4041_v54  ;;  %v1138_v35 = vadd.f32 %v8439_v23, %v986_v51  ;;  %v1135_v57 = vadd.f32 %v8435_v21, %v981_v0 }
 0x5a1   : > { %v5032_v42 = vadd.f32 %v5016_v9, %v4967_v52  ;;  %v4968_v15 = vadd.f32 %v4952_v50, %v4903_v53  ;;  %5133 = vadd.xlane.f32.xlu0 %v8971_v58  ;;  %v6866_v2 = vunpack.c.l.bf16 %v6988_v4  ;;  %v6835_v34 = vunpack.c.h.bf16 %v6981_v46  ;;  %v6982_v53 = vld [vmem:[#allocation13 + $0x3a8] sm:$0xff]   ;;  %v996_v46 = vpop.permute.xlu1 %995 }
 0x5a2   : > { %v3932_v32 = vpop.f32.mrb[144].mxu1  ;;  %v6867_v54 = vunpack.c.h.bf16 %v6988_v4  ;;  %v6774_v23 = vunpack.c.l.bf16 %v6968_v44  ;;  %v6838_v4 = vunpack.c.l.bf16 %v6982_v53 }
 0x5a3   : > { %v5097_v19 = vadd.f32 %v5081_v33, %v5032_v42  ;;  %v5033_v39 = vadd.f32 %v5017_v7, %v4968_v15  ;;  %v4888_v59 = vmul.f32 %v6770_v12, %v3932_v32  ;;  %v4045_v60 = vpop.f32.mrb[160].mxu0  ;;  %v3934_v1 = vpop.f32.mrb[145].mxu1  ;;  %v6989_v33 = vld [vmem:[#allocation13 + $0x3e8] sm:$0xff]   ;;  %v6807_v32 = vunpack.c.h.bf16 %v6975_v20 }
 0x5a4   : > { %v4953_v43 = vmul.f32 %v6802_v48, %v3934_v1  ;;  %v4047_v17 = vpop.f32.mrb[161].mxu0  ;;  %v3936_v5 = vpop.f32.mrb[146].mxu1  ;;  %v5018_v12 = vmul.f32 %v6834_v16, %v4045_v60  ;;  %v6775_v48 = vunpack.c.h.bf16 %v6968_v44  ;;  %v1146_v1 = vadd.f32 %v8449_v27, %v996_v46 }
 0x5a5   : > { %v5098_v41 = vadd.f32 %v5082_v3, %v5033_v39  ;;  %v4904_v37 = vadd.f32 %v4888_v59, %v8921_v55  ;;  %v4889_v61 = vmul.f32 %v6771_v14, %v3936_v5  ;;  %v4049_v13 = vpop.f32.mrb[162].mxu0  ;;  %v3938_v38 = vpop.f32.mrb[147].mxu1  ;;  %v8978_v49 = vadd.f32 %v5097_v19, %v1135_v57  ;;  %v6969_v59 = vld [vmem:[#allocation13 + $0x330] sm:$0xff]  }
 0x5a6   : > { %v4954_v8 = vmul.f32 %v6803_v30, %v3938_v38  ;;  %v4051_v50 = vpop.f32.mrb[163].mxu0  ;;  %v6806_v55 = vunpack.c.l.bf16 %v6975_v20  ;;  %v5083_v51 = vmul.f32 %v6866_v2, %v4047_v17  ;;  %v5019_v0 = vmul.f32 %v6835_v34, %v4049_v13  ;;  %v991_v7 = vpop.permute.xlu0 %990  ;;  %v6976_v13 = vld [vmem:[#allocation13 + $0x370] sm:$0xff]  }
 0x5a7   : > { %v4969_v21 = vadd.f32 %v4953_v43, %v4904_v37  ;;  %v4905_v9 = vadd.f32 %v4889_v61, %v8923_v62  ;;  %v8981_v52 = vadd.f32 %v5098_v41, %v1138_v35  ;;  %5135 = vadd.xlane.f32.xlu1 %v8978_v49  ;;  %v5084_v30 = vmul.f32 %v6867_v54, %v4051_v50 }
 0x5a8   : > { %v1143_v60 = vadd.f32 %v8445_v25, %v991_v7  ;;  %v6870_v57 = vunpack.c.l.bf16 %v6989_v33  ;;  %v6839_v37 = vunpack.c.h.bf16 %v6982_v53  ;;  %v6871_v20 = vunpack.c.h.bf16 %v6989_v33 }
 0x5a9   : > { %v5034_v14 = vadd.f32 %v5018_v12, %v4969_v21  ;;  %v4970_v42 = vadd.f32 %v4954_v8, %v4905_v9  ;;  %5137 = vadd.xlane.f32.xlu0 %v8981_v52  ;;  %v6778_v25 = vunpack.c.l.bf16 %v6969_v59  ;;  %v6983_v12 = vld [vmem:[#allocation13 + $0x3b0] sm:$0xff]   ;;  %v6779_v21 = vunpack.c.h.bf16 %v6969_v59  ;;  %v1006_v9 = vpop.permute.xlu1 %1005 }
 0x5aa   : > { %v3942_v15 = vpop.f32.mrb[148].mxu1  ;;  %v1001_v53 = vpop.permute.xlu0 %1000  ;;  %v6811_v33 = vunpack.c.h.bf16 %v6976_v13 }
 0x5ab   : > { %v5099_v62 = vadd.f32 %v5083_v51, %v5034_v14  ;;  %v5035_v16 = vadd.f32 %v5019_v0, %v4970_v42  ;;  %v4890_v19 = vmul.f32 %v6774_v23, %v3942_v15  ;;  %v4055_v39 = vpop.f32.mrb[164].mxu0  ;;  %v3944_v3 = vpop.f32.mrb[149].mxu1  ;;  %v6990_v51 = vld [vmem:[#allocation13 + $0x3f0] sm:$0xff]   ;;  %v6842_v42 = vunpack.c.l.bf16 %v6983_v12 }
 0x5ac   : > { %v4955_v44 = vmul.f32 %v6806_v55, %v3944_v3  ;;  %v4057_v35 = vpop.f32.mrb[165].mxu0  ;;  %v3946_v43 = vpop.f32.mrb[150].mxu1  ;;  %v5020_v50 = vmul.f32 %v6838_v4, %v4055_v39  ;;  %v6874_v59 = vunpack.c.l.bf16 %v6990_v51 }
 0x5ad   : > { %v5100_v17 = vadd.f32 %v5084_v30, %v5035_v16  ;;  %v4906_v2 = vadd.f32 %v4890_v19, %v8927_v45  ;;  %v4891_v5 = vmul.f32 %v6775_v48, %v3946_v43  ;;  %v4059_v41 = vpop.f32.mrb[166].mxu0  ;;  %v3948_v61 = vpop.f32.mrb[151].mxu1  ;;  %v8988_v8 = vadd.f32 %v5099_v62, %v1143_v60  ;;  %v6970_v16 = vld [vmem:[#allocation13 + $0x338] sm:$0xff]  }
 0x5ae   : > { %v4956_v34 = vmul.f32 %v6807_v32, %v3948_v61  ;;  %v4061_v38 = vpop.f32.mrb[167].mxu0  ;;  %v6810_v45 = vunpack.c.l.bf16 %v6976_v13  ;;  %v5085_v48 = vmul.f32 %v6870_v57, %v4057_v35  ;;  %v5021_v46 = vmul.f32 %v6839_v37, %v4059_v41 }
 0x5af   : > { %v4971_v27 = vadd.f32 %v4955_v44, %v4906_v2  ;;  %v4907_v54 = vadd.f32 %v4891_v5, %v8929_v18  ;;  %v8991_v23 = vadd.f32 %v5100_v17, %v1146_v1  ;;  %5139 = vadd.xlane.f32.xlu1 %v8988_v8  ;;  %v5086_v15 = vmul.f32 %v6871_v20, %v4061_v38  ;;  %v6977_v2 = vld [vmem:[#allocation13 + $0x378] sm:$0xff]  }
 0x5b0   : > { %v1154_v30 = vadd.f32 %v8447_v26, %v1006_v9  ;;  %v1151_v19 = vadd.f32 %v8443_v24, %v1001_v53  ;;  %v6843_v43 = vunpack.c.h.bf16 %v6983_v12  ;;  %v6875_v37 = vunpack.c.h.bf16 %v6990_v51  ;;  %v6984_v20 = vld [vmem:[#allocation13 + $0x3b8] sm:$0xff]   ;;  %v1011_v9 = vpop.permute.xlu0 %1010 }
 0x5b1   : > { %v5036_v55 = vadd.f32 %v5020_v50, %v4971_v27  ;;  %v4972_v14 = vadd.f32 %v4956_v34, %v4907_v54  ;;  %5141 = vadd.xlane.f32.xlu0 %v8991_v23  ;;  %v6782_v26 = vunpack.c.l.bf16 %v6970_v16  ;;  %v1016_v50 = vpop.permute.xlu1 %1015 }
 0x5b2   : > { %v3952_v0 = vpop.f32.mrb[152].mxu1 }
 0x5b3   : > { %v5101_v18 = vadd.f32 %v5085_v48, %v5036_v55  ;;  %v5037_v7 = vadd.f32 %v5021_v46, %v4972_v14  ;;  %v4892_v4 = vmul.f32 %v6778_v25, %v3952_v0  ;;  %v4065_v32 = vpop.f32.mrb[168].mxu0  ;;  %v3954_v62 = vpop.f32.mrb[153].mxu1  ;;  %v6783_v25 = vunpack.c.h.bf16 %v6970_v16 }
 0x5b4   : > { %v4957_v39 = vmul.f32 %v6810_v45, %v3954_v62  ;;  %v4067_v3 = vpop.f32.mrb[169].mxu0  ;;  %v3956_v60 = vpop.f32.mrb[154].mxu1  ;;  %v5022_v13 = vmul.f32 %v6842_v42, %v4065_v32  ;;  %v6846_v55 = vunpack.c.l.bf16 %v6984_v20  ;;  %v6815_v48 = vunpack.c.h.bf16 %v6977_v2 }
 0x5b5   : > { %v5102_v1 = vadd.f32 %v5086_v15, %v5037_v7  ;;  %v4908_v44 = vadd.f32 %v4892_v4, %v8933_v56  ;;  %v4893_v35 = vmul.f32 %v6779_v21, %v3956_v60  ;;  %v4069_v57 = vpop.f32.mrb[170].mxu0  ;;  %v3958_v17 = vpop.f32.mrb[155].mxu1  ;;  %v8998_v61 = vadd.f32 %v5101_v18, %v1151_v19  ;;  %v6991_v21 = vld [vmem:[#allocation13 + $0x3f8] sm:$0xff]  }
 0x5b6   : > { %v4958_v5 = vmul.f32 %v6811_v33, %v3958_v17  ;;  %v4071_v41 = vpop.f32.mrb[171].mxu0  ;;  %v6814_v56 = vunpack.c.l.bf16 %v6977_v2  ;;  %v5087_v54 = vmul.f32 %v6874_v59, %v4067_v3  ;;  %v5023_v12 = vmul.f32 %v6843_v43, %v4069_v57  ;;  %v1021_v43 = vpop.permute.xlu0 %1020 }
 0x5b7   : > { %v4973_v24 = vadd.f32 %v4957_v39, %v4908_v44  ;;  %v4909_v34 = vadd.f32 %v4893_v35, %v8935_v11  ;;  %v9001_v38 = vadd.f32 %v5102_v1, %v1154_v30  ;;  %5143 = vadd.xlane.f32.xlu1 %v8998_v61  ;;  %v5088_v14 = vmul.f32 %v6875_v37, %v4071_v41  ;;  %v1026_v41 = vpop.permute.xlu1 %1025 }
 0x5b8   : > { %v1159_v33 = vadd.f32 %v8453_v29, %v1011_v9  ;;  %v1162_v18 = vadd.f32 %v8457_v31, %v1016_v50  ;;  %v6878_v4 = vunpack.c.l.bf16 %v6991_v21  ;;  %v6847_v39 = vunpack.c.h.bf16 %v6984_v20 }
 0x5b9   : > { %v5038_v27 = vadd.f32 %v5022_v13, %v4973_v24  ;;  %v4974_v45 = vadd.f32 %v4958_v5, %v4909_v34  ;;  %5145 = vadd.xlane.f32.xlu0 %v9001_v38  ;;  %v6879_v1 = vunpack.c.h.bf16 %v6991_v21  ;;  %v1167_v37 = vadd.f32 %v8451_v28, %v1021_v43  ;;  %v9287_v34 = vld [vmem:[#allocation24_spill] sm:$0xff] }
 0x5ba   : > { %v3962_v53 = vpop.f32.mrb[156].mxu1  ;;  %v1170_v20 = vadd.f32 %v9287_v34, %v1026_v41  ;;  %v5155_v50 = vmul.f32 %v8948_v6, %v8948_v6  ;;  %v5156_v28 = vmul.f32 %v8951_v47, %v8951_v47  ;;  %v5161_v21 = vmul.f32 %v8978_v49, %v8978_v49  ;;  %v9060_v34 = vld [vmem:[#allocation14 + $0x10] sm:$0xff] }
 0x5bb   : > { %v5103_v11 = vadd.f32 %v5087_v54, %v5038_v27  ;;  %v5039_v46 = vadd.f32 %v5023_v12, %v4974_v45  ;;  %v4894_v51 = vmul.f32 %v6782_v26, %v3962_v53  ;;  %v4075_v0 = vpop.f32.mrb[172].mxu0  ;;  %v3964_v42 = vpop.f32.mrb[157].mxu1  ;;  %v5157_v27 = vmul.f32 %v8958_v36, %v8958_v36 }
 0x5bc   : > { %v4959_v7 = vmul.f32 %v6814_v56, %v3964_v42  ;;  %v4077_v15 = vpop.f32.mrb[173].mxu0  ;;  %v3966_v32 = vpop.f32.mrb[158].mxu1  ;;  %v5024_v35 = vmul.f32 %v6846_v55, %v4075_v0  ;;  %v5158_v54 = vmul.f32 %v8961_v63, %v8961_v63  ;;  %v5159_v12 = vmul.f32 %v8968_v22, %v8968_v22 }
 0x5bd   : > { %v5104_v62 = vadd.f32 %v5088_v14, %v5039_v46  ;;  %v4910_v16 = vadd.f32 %v4894_v51, %v8939_v40  ;;  %v4895_v30 = vmul.f32 %v6783_v25, %v3966_v32  ;;  %v4079_v19 = vpop.f32.mrb[174].mxu0  ;;  %v3968_v3 = vpop.f32.mrb[159].mxu1  ;;  %v9008_v44 = vadd.f32 %v5103_v11, %v1159_v33 }
 0x5be   : > { %v4960_v59 = vmul.f32 %v6815_v48, %v3968_v3  ;;  %v4081_v60 = vpop.f32.mrb[175].mxu0  ;;  %v5089_v40 = vmul.f32 %v6878_v4, %v4077_v15  ;;  %v5025_v2 = vmul.f32 %v6847_v39, %v4079_v19  ;;  %v5160_v45 = vmul.f32 %v8971_v58, %v8971_v58  ;;  %v9043_v48 = vld [vmem:[#allocation14] sm:$0xff] }
 0x5bf   : > { %v4975_v29 = vadd.f32 %v4959_v7, %v4910_v16  ;;  %v4911_v31 = vadd.f32 %v4895_v30, %v8941_v10  ;;  %v9011_v57 = vadd.f32 %v5104_v62, %v1162_v18  ;;  %5147 = vadd.xlane.f32.xlu1 %v9008_v44  ;;  %v5090_v24 = vmul.f32 %v6879_v1, %v4081_v60 }
 0x5c0   : > { %v5162_v9 = vmul.f32 %v8981_v52, %v8981_v52  ;;  %v5163_v53 = vmul.f32 %v8988_v8, %v8988_v8  ;;  %v5164_v55 = vmul.f32 %v8991_v23, %v8991_v23  ;;  %7172 = vmatprep.mubr.f32.mxu1 %v9043_v48  ;;  %v5165_v11 = vmul.f32 %v8998_v61, %v8998_v61 }
 0x5c1   : > { %v5040_v17 = vadd.f32 %v5024_v35, %v4975_v29  ;;  %v4976_v5 = vadd.f32 %v4960_v59, %v4911_v31  ;;  %5149 = vadd.xlane.f32.xlu0 %v9011_v57  ;;  %v5166_v46 = vmul.f32 %v9001_v38, %v9001_v38  ;;  %v5167_v14 = vmul.f32 %v9008_v44, %v9008_v44 }
 0x5c2   : > { %v5168_v51 = vmul.f32 %v9011_v57, %v9011_v57 }
 0x5c3   : > { %v5105_v26 = vadd.f32 %v5089_v40, %v5040_v17  ;;  %v5041_v13 = vadd.f32 %v5025_v2, %v4976_v5 }
 0x5c5   : > { %v5106_v10 = vadd.f32 %v5090_v24, %v5041_v13  ;;  %v9017_v56 = vadd.f32 %v5105_v26, %v1167_v37  ;;  %v9058_v13 = vld [vmem:[#allocation14 + $0x8] sm:$0xff] }
 0x5c7   : > { %5151 = vadd.xlane.f32.xlu1 %v9017_v56  ;;  %v9020_v25 = vadd.f32 %v5106_v10, %v1170_v20  ;;  %v5169_v0 = vmul.f32 %v9017_v56, %v9017_v56 }
 0x5c9   : > { %5153 = vadd.xlane.f32.xlu0 %v9020_v25  ;;  %v5170_v42 = vmul.f32 %v9020_v25, %v9020_v25 }
 0x5cb   : > { %5171 = vadd.xlane.f32.xlu1 %v5155_v50  ;;  %v5206_v50 = vld [vmem:[#allocation14 + $0x18] sm:$0xff] }
 0x5cd   : > { %5173 = vadd.xlane.f32.xlu0 %v5156_v28 }
 0x5cf   : > { %5175 = vadd.xlane.f32.xlu1 %v5157_v27  ;;  %v5207_v27 = vld [vmem:[#allocation14 + $0x20] sm:$0xff] }
 0x5d1   : > { %5177 = vadd.xlane.f32.xlu0 %v5158_v54 }
 0x5d3   : > { %5179 = vadd.xlane.f32.xlu1 %v5159_v12 }
 0x5d5   : > { %5181 = vadd.xlane.f32.xlu0 %v5160_v45  ;;  %v5208_v45 = vld [vmem:[#allocation14 + $0x28] sm:$0xff] }
 0x5d7   : > { %5183 = vadd.xlane.f32.xlu1 %v5161_v21 }
 0x5d9   : > { %5185 = vadd.xlane.f32.xlu0 %v5162_v9  ;;  %v5209_v9 = vld [vmem:[#allocation14 + $0x30] sm:$0xff] }
 0x5db   : > { %5187 = vadd.xlane.f32.xlu1 %v5163_v53 }
 0x5dd   : > { %5189 = vadd.xlane.f32.xlu0 %v5164_v55 }
 0x5df   : > { %5191 = vadd.xlane.f32.xlu1 %v5165_v11  ;;  %v5210_v11 = vld [vmem:[#allocation14 + $0x38] sm:$0xff] }
 0x5e1   : > { %5193 = vadd.xlane.f32.xlu0 %v5166_v46 }
 0x5e3   : > { %5195 = vadd.xlane.f32.xlu1 %v5167_v14  ;;  %v5211_v14 = vld [vmem:[#allocation14 + $0x40] sm:$0xff] }
 0x5e5   : > { %5197 = vadd.xlane.f32.xlu0 %v5168_v51 }
 0x5e7   : > { %5199 = vadd.xlane.f32.xlu1 %v5169_v0 }
 0x5e9   : > { %5201 = vadd.xlane.f32.xlu0 %v5170_v42  ;;  %v5212_v42 = vld [vmem:[#allocation14 + $0x48] sm:$0xff] }
 0x61c   : > { %v5124_v33 = vpop.xlane.xlu0 %5123 }
 0x61e   : > { %v5126_v18 = vpop.xlane.xlu1 %5125 }
 0x61f   : > { %v7272_v7 = vpack.c.bf16 %v5126_v18, %v5124_v33  ;;  %v5213_v18 = vld [vmem:[#allocation14 + $0x50] sm:$0xff] }
 0x621   : > { %7273 = vmatprep.subr.bf16.mxu1 %v7272_v7 }
 0x622   : > { %7275 = vmatpush3.bf16.msra.mxu1 %v7272_v7 }
 0x624   : > { %v5128_v15 = vpop.xlane.xlu0 %5127 }
 0x628   : > { %v5130_v4 = vpop.xlane.xlu0 %5129 }
 0x629   : > { %v7276_v32 = vpack.c.bf16 %v5130_v4, %v5128_v15  ;;  %v5214_v4 = vld [vmem:[#allocation14 + $0x58] sm:$0xff] }
 0x62b   : > { %7277 = vmatprep.subr.bf16.mxu1 %v7276_v32 }
 0x62c   : > { %7279 = vmatpush3.bf16.msra.mxu1 %v7276_v32  ;;  %v5132_v62 = vpop.xlane.xlu1 %5131 }
 0x62e   : > { %v5134_v16 = vpop.xlane.xlu0 %5133 }
 0x62f   : > { %v7280_v30 = vpack.c.bf16 %v5134_v16, %v5132_v62  ;;  %v5215_v62 = vld [vmem:[#allocation14 + $0x60] sm:$0xff] }
 0x631   : > { %7281 = vmatprep.subr.bf16.mxu1 %v7280_v30 }
 0x632   : > { %7283 = vmatpush3.bf16.msra.mxu1 %v7280_v30 }
 0x634   : > { %v5136_v19 = vpop.xlane.xlu1 %5135 }
 0x636   : > { %v5138_v39 = vpop.xlane.xlu0 %5137 }
 0x637   : > { %v7284_v3 = vpack.c.bf16 %v5138_v39, %v5136_v19  ;;  %v5216_v19 = vld [vmem:[#allocation14 + $0x68] sm:$0xff] }
 0x639   : > { %7285 = vmatprep.subr.bf16.mxu1 %v7284_v3 }
 0x63a   : > { %7287 = vmatpush3.bf16.msra.mxu1 %v7284_v3  ;;  %v5217_v3 = vld [vmem:[#allocation14 + $0x70] sm:$0xff] }
 0x63c   : > { %v5140_v59 = vpop.xlane.xlu1 %5139 }
 0x63e   : > { %v5142_v60 = vpop.xlane.xlu0 %5141 }
 0x63f   : > { %v7288_v1 = vpack.c.bf16 %v5142_v60, %v5140_v59 }
 0x641   : > { %7289 = vmatprep.subr.bf16.mxu1 %v7288_v1 }
 0x642   : > { %7291 = vmatpush3.bf16.msra.mxu1 %v7288_v1  ;;  %v5218_v1 = vld [vmem:[#allocation14 + $0x78] sm:$0xff] }
 0x644   : > { %v5144_v35 = vpop.xlane.xlu1 %5143 }
 0x646   : > { %v5146_v29 = vpop.xlane.xlu0 %5145 }
 0x647   : > { %v7292_v31 = vpack.c.bf16 %v5146_v29, %v5144_v35 }
 0x649   : > { %7293 = vmatprep.subr.bf16.mxu1 %v7292_v31 }
 0x64a   : > { %7295 = vmatpush3.bf16.msra.mxu1 %v7292_v31 }
 0x64c   : > { %v5148_v43 = vpop.xlane.xlu1 %5147 }
 0x64e   : > { %v5150_v17 = vpop.xlane.xlu0 %5149 }
 0x64f   : > { %v7296_v40 = vpack.c.bf16 %v5150_v17, %v5148_v43 }
 0x651   : > { %7297 = vmatprep.subr.bf16.mxu1 %v7296_v40 }
 0x652   : > { %7299 = vmatpush3.bf16.msra.mxu1 %v7296_v40 }
 0x654   : > { %v5152_v2 = vpop.xlane.xlu1 %5151 }
 0x656   : > { %v5154_v5 = vpop.xlane.xlu0 %5153 }
 0x657   : > { %v7300_v41 = vpack.c.bf16 %v5154_v5, %v5152_v2 }
 0x658   : > { %v5172_v37 = vpop.xlane.xlu1 %5171 }
 0x659   : > { %7301 = vmatprep.subr.bf16.mxu1 %v7300_v41 }
 0x65a   : > { %7303 = vmatpush3.bf16.msra.mxu1 %v7300_v41  ;;  %v5174_v26 = vpop.xlane.xlu0 %5173 }
 0x65b   : > { %v7304_v24 = vpack.c.bf16 %v5174_v26, %v5172_v37 }
 0x65c   : > { %v5176_v20 = vpop.xlane.xlu1 %5175 }
 0x65d   : > { %7173 = vmatmul.mubr.f32.vlgmr.msra.gmra.mrb[160].mxu1 %v9058_v13  ;;  %7305 = vmatprep.subr.bf16.mxu1 %v7304_v24 }
 0x65e   : > { %v5178_v10 = vpop.xlane.xlu0 %5177  ;;  %7307 = vmatpush3.bf16.msra.mxu1 %v7304_v24  ;;  %7175 = vmatprep.mubr.f32.mxu1 %v9060_v34 }
 0x65f   : > { %v7308_v28 = vpack.c.bf16 %v5178_v10, %v5176_v20 }
 0x660   : > { %v5180_v54 = vpop.xlane.xlu1 %5179 }
 0x661   : > { %7176 = vmatmul.mubr.f32.gmra.mrb[162].mxu1 %v5206_v50  ;;  %7309 = vmatprep.subr.bf16.mxu1 %v7308_v28 }
 0x662   : > { %v5182_v12 = vpop.xlane.xlu0 %5181  ;;  %7311 = vmatpush3.bf16.msra.mxu1 %v7308_v28  ;;  %7178 = vmatprep.mubr.f32.mxu1 %v5207_v27 }
 0x663   : > { %v7312_v21 = vpack.c.bf16 %v5182_v12, %v5180_v54 }
 0x664   : > { %v5184_v53 = vpop.xlane.xlu1 %5183 }
 0x665   : > { %7179 = vmatmul.mubr.f32.gmra.mrb[164].mxu1 %v5208_v45  ;;  %7313 = vmatprep.subr.bf16.mxu1 %v7312_v21 }
 0x666   : > { %v5186_v55 = vpop.xlane.xlu0 %5185  ;;  %7315 = vmatpush3.bf16.msra.mxu1 %v7312_v21  ;;  %7181 = vmatprep.mubr.f32.mxu1 %v5209_v9 }
 0x667   : > { %v7316_v46 = vpack.c.bf16 %v5186_v55, %v5184_v53 }
 0x668   : > { %v5188_v51 = vpop.xlane.xlu1 %5187 }
 0x669   : > { %7182 = vmatmul.mubr.f32.gmra.mrb[166].mxu1 %v5210_v11  ;;  %7317 = vmatprep.subr.bf16.mxu1 %v7316_v46 }
 0x66a   : > { %v5190_v0 = vpop.xlane.xlu0 %5189  ;;  %7319 = vmatpush3.bf16.msra.mxu1 %v7316_v46  ;;  %7184 = vmatprep.mubr.f32.mxu1 %v5211_v14 }
 0x66b   : > { %v7320_v33 = vpack.c.bf16 %v5190_v0, %v5188_v51 }
 0x66c   : > { %v5192_v7 = vpop.xlane.xlu1 %5191 }
 0x66d   : > { %7185 = vmatmul.mubr.f32.gmra.mrb[168].mxu1 %v5212_v42  ;;  %7321 = vmatprep.subr.bf16.mxu1 %v7320_v33 }
 0x66e   : > { %v5194_v15 = vpop.xlane.xlu0 %5193  ;;  %7323 = vmatpush3.bf16.msra.mxu1 %v7320_v33  ;;  %7187 = vmatprep.mubr.f32.mxu1 %v5213_v18 }
 0x66f   : > { %v7324_v32 = vpack.c.bf16 %v5194_v15, %v5192_v7 }
 0x670   : > { %v5196_v16 = vpop.xlane.xlu1 %5195 }
 0x671   : > { %7188 = vmatmul.mubr.f32.gmra.mrb[170].mxu1 %v5214_v4  ;;  %7325 = vmatprep.subr.bf16.mxu1 %v7324_v32 }
 0x672   : > { %v5198_v30 = vpop.xlane.xlu0 %5197  ;;  %7327 = vmatpush3.bf16.msra.mxu1 %v7324_v32  ;;  %7190 = vmatprep.mubr.f32.mxu1 %v5215_v62 }
 0x673   : > { %v7328_v39 = vpack.c.bf16 %v5198_v30, %v5196_v16 }
 0x674   : > { %v5200_v59 = vpop.xlane.xlu1 %5199 }
 0x675   : > { %7191 = vmatmul.mubr.f32.gmra.mrb[172].mxu1 %v5216_v19  ;;  %7329 = vmatprep.subr.bf16.mxu1 %v7328_v39 }
 0x676   : > { %v5202_v60 = vpop.xlane.xlu0 %5201  ;;  %7331 = vmatpush3.bf16.msra.mxu1 %v7328_v39  ;;  %7193 = vmatprep.mubr.f32.mxu1 %v5217_v3 }
 0x677   : > { %v7332_v35 = vpack.c.bf16 %v5202_v60, %v5200_v59 }
 0x679   : > { %7194 = vmatmul.mubr.f32.gmra.mrb[174].mxu1 %v5218_v1  ;;  %7333 = vmatprep.subr.bf16.mxu1 %v7332_v35 }
 0x67a   : > { %7335 = vmatpush3.bf16.msra.mxu1 %v7332_v35  ;;  %7228 = vmatprep.mubr.f32.mxu1 %v9043_v48 }
 0x67d   : > { %7229 = vmatmul.mubr.f32.vlgmr.msra.gmra.mrb[176].mxu1 %v9058_v13 }
 0x67e   : > { %7231 = vmatprep.mubr.f32.mxu1 %v9060_v34 }
 0x681   : > { %7232 = vmatmul.mubr.f32.gmra.mrb[178].mxu1 %v5206_v50 }
 0x682   : > { %7234 = vmatprep.mubr.f32.mxu1 %v5207_v27 }
 0x685   : > { %7235 = vmatmul.mubr.f32.gmra.mrb[180].mxu1 %v5208_v45 }
 0x686   : > { %7237 = vmatprep.mubr.f32.mxu1 %v5209_v9 }
 0x689   : > { %7238 = vmatmul.mubr.f32.gmra.mrb[182].mxu1 %v5210_v11 }
 0x68a   : > { %7240 = vmatprep.mubr.f32.mxu1 %v5211_v14 }
 0x68d   : > { %7241 = vmatmul.mubr.f32.gmra.mrb[184].mxu1 %v5212_v42 }
 0x68e   : > { %7243 = vmatprep.mubr.f32.mxu1 %v5213_v18 }
 0x691   : > { %7244 = vmatmul.mubr.f32.gmra.mrb[186].mxu1 %v5214_v4 }
 0x692   : > { %7246 = vmatprep.mubr.f32.mxu1 %v5215_v62 }
 0x695   : > { %7247 = vmatmul.mubr.f32.gmra.mrb[188].mxu1 %v5216_v19 }
 0x696   : > { %7249 = vmatprep.mubr.f32.mxu1 %v5217_v3 }
 0x699   : > { %7250 = vmatmul.mubr.f32.gmra.mrb[190].mxu1 %v5218_v1 }
 0x730   : > { %v7174_v29 = vpop.f32.mrb[160].mxu1 }
 0x731   : > { %v5365_v31 = vmul.f32 0.0009765625, %v7174_v29  ;;  %v5285_v48 = vpop.f32.mrb[161].mxu1 }
 0x732   : > { %v5364_v43 = vmul.f32 0.0009765625, %v5285_v48 }
 0x733   : > { %5580 = vperm.xlu0 %7464, %v5365_v31   ;;  %v5542_v33 = vmul.f32 %v5365_v31, %v5365_v31 }
 0x734   : > { %5575 = vperm.xlu1 %7465, %v5364_v43   ;;  %v7177_v17 = vpop.f32.mrb[162].mxu1  ;;  %v5541_v15 = vmul.f32 %v5364_v43, %v5364_v43 }
 0x735   : > { %v5367_v40 = vmul.f32 0.0009765625, %v7177_v17  ;;  %v5295_v2 = vpop.f32.mrb[163].mxu1 }
 0x736   : > { %v5366_v37 = vmul.f32 0.0009765625, %v5295_v2 }
 0x737   : > { %v5544_v19 = vmul.f32 %v5367_v40, %v5367_v40 }
 0x738   : > { %v7180_v5 = vpop.f32.mrb[164].mxu1  ;;  %5590 = vperm.xlu1 %7465, %v5367_v40   ;;  %v5543_v60 = vmul.f32 %v5366_v37, %v5366_v37 }
 0x739   : > { %v5305_v41 = vpop.f32.mrb[165].mxu1  ;;  %v5369_v34 = vmul.f32 0.0009765625, %v7180_v5 }
 0x73a   : > { %v5368_v26 = vmul.f32 0.0009765625, %v5305_v41 }
 0x73b   : > { %v5546_v43 = vmul.f32 %v5369_v34, %v5369_v34 }
 0x73c   : > { %5595 = vperm.xlu0 %7464, %v5368_v26   ;;  %v7183_v13 = vpop.f32.mrb[166].mxu1  ;;  %5585 = vperm.xlu1 %7465, %v5366_v37   ;;  %v5545_v41 = vmul.f32 %v5368_v26, %v5368_v26 }
 0x73d   : > { %v5315_v24 = vpop.f32.mrb[167].mxu1  ;;  %v5371_v28 = vmul.f32 0.0009765625, %v7183_v13 }
 0x73e   : > { %v9067_v20 = vmul.f32 0.0009765625, %v5315_v24 }
 0x73f   : > { %v5548_v37 = vmul.f32 %v5371_v28, %v5371_v28 }
 0x740   : > { %5605 = vperm.xlu0 %7464, %v9067_v20   ;;  %v7186_v10 = vpop.f32.mrb[168].mxu1  ;;  %5600 = vperm.xlu1 %7465, %v5369_v34  }
 0x741   : > { %v5325_v50 = vpop.f32.mrb[169].mxu1  ;;  %v9073_v45 = vmul.f32 0.0009765625, %v7186_v10 }
 0x742   : > { %v9070_v27 = vmul.f32 0.0009765625, %v5325_v50 }
 0x744   : > { %5615 = vperm.xlu0 %7464, %v9070_v27   ;;  %v7189_v54 = vpop.f32.mrb[170].mxu1  ;;  %5610 = vperm.xlu1 %7465, %v5371_v28  }
 0x745   : > { %v5335_v12 = vpop.f32.mrb[171].mxu1  ;;  %v9079_v55 = vmul.f32 0.0009765625, %v7189_v54 }
 0x746   : > { %v9075_v21 = vmul.f32 0.0009765625, %v5335_v12 }
 0x748   : > { %5625 = vperm.xlu0 %7464, %v9075_v21   ;;  %v7192_v9 = vpop.f32.mrb[172].mxu1  ;;  %5620 = vperm.xlu1 %7465, %v9073_v45  }
 0x749   : > { %v5345_v53 = vpop.f32.mrb[173].mxu1  ;;  %v9085_v51 = vmul.f32 0.0009765625, %v7192_v9 }
 0x74a   : > { %v9081_v11 = vmul.f32 0.0009765625, %v5345_v53  ;;  %v5547_v53 = vmul.f32 %v9067_v20, %v9067_v20 }
 0x74c   : > { %5635 = vperm.xlu0 %7464, %v9081_v11   ;;  %v7195_v46 = vpop.f32.mrb[174].mxu1  ;;  %5630 = vperm.xlu1 %7465, %v9079_v55  }
 0x74d   : > { %v5355_v14 = vpop.f32.mrb[175].mxu1  ;;  %v9091_v4 = vmul.f32 0.0009765625, %v7195_v46 }
 0x74e   : > { %v9087_v0 = vmul.f32 0.0009765625, %v5355_v14 }
 0x750   : > { %5645 = vperm.xlu0 %7464, %v9087_v0   ;;  %5640 = vperm.xlu1 %7465, %v9085_v51   ;;  %v7230_v42 = vpop.f32.mrb[176].mxu1 }
 0x751   : > { %v5526_v18 = vmul.f32 0.0009765625, %v7230_v42  ;;  %v5446_v7 = vpop.f32.mrb[177].mxu1 }
 0x752   : > { %v5525_v32 = vmul.f32 0.0009765625, %v5446_v7 }
 0x753   : > { %v5558_v62 = vsub.f32 %v5526_v18, %v5542_v33  ;;  %v5550_v18 = vmul.f32 %v9073_v45, %v9073_v45  ;;  %v5552_v45 = vmul.f32 %v9079_v55, %v9079_v55  ;;  %v5554_v55 = vmul.f32 %v9085_v51, %v9085_v51 }
 0x754   : > { %v5557_v16 = vsub.f32 %v5525_v32, %v5541_v15  ;;  %5650 = vperm.xlu1 %7465, %v9091_v4   ;;  %v7233_v30 = vpop.f32.mrb[178].mxu1  ;;  %v5556_v51 = vmul.f32 %v9091_v4, %v9091_v4 }
 0x755   : > { %v5670_v39 = vadd.f32 1e-05, %v5558_v62  ;;  %v5528_v3 = vmul.f32 0.0009765625, %v7233_v30  ;;  %v5456_v59 = vpop.f32.mrb[179].mxu1  ;;  %v5549_v62 = vmul.f32 %v9070_v27, %v9070_v27  ;;  %v5551_v27 = vmul.f32 %v9075_v21, %v9075_v21 }
 0x756   : > { %v5669_v1 = vadd.f32 1e-05, %v5557_v16  ;;  %v5527_v35 = vmul.f32 0.0009765625, %v5456_v59  ;;  %v5553_v21 = vmul.f32 %v9081_v11, %v9081_v11  ;;  %v5555_v11 = vmul.f32 %v9087_v0, %v9087_v0 }
 0x757   : > { %7509 = vrsqrt.f32 %v5670_v39  ;;  %v5560_v29 = vsub.f32 %v5528_v3, %v5544_v19 }
 0x758   : > { %7511 = vrsqrt.f32 %v5669_v1  ;;  %v5559_v31 = vsub.f32 %v5527_v35, %v5543_v60  ;;  %v7236_v48 = vpop.f32.mrb[180].mxu1 }
 0x759   : > { %v5672_v17 = vadd.f32 1e-05, %v5560_v29  ;;  %v5530_v2 = vmul.f32 0.0009765625, %v7236_v48  ;;  %v5466_v5 = vpop.f32.mrb[181].mxu1 }
 0x75a   : > { %v5671_v13 = vadd.f32 1e-05, %v5559_v31  ;;  %v5529_v24 = vmul.f32 0.0009765625, %v5466_v5 }
 0x75b   : > { %7513 = vrsqrt.f32 %v5672_v17  ;;  %v5562_v40 = vsub.f32 %v5530_v2, %v5546_v43 }
 0x75c   : > { %7515 = vrsqrt.f32 %v5671_v13  ;;  %v5561_v10 = vsub.f32 %v5529_v24, %v5545_v41  ;;  %v7239_v50 = vpop.f32.mrb[182].mxu1 }
 0x75d   : > { %v5674_v54 = vadd.f32 1e-05, %v5562_v40  ;;  %v5532_v12 = vmul.f32 0.0009765625, %v7239_v50  ;;  %v5476_v9 = vpop.f32.mrb[183].mxu1 }
 0x75e   : > { %v5673_v46 = vadd.f32 1e-05, %v5561_v10  ;;  %v5531_v34 = vmul.f32 0.0009765625, %v5476_v9 }
 0x75f   : > { %7517 = vrsqrt.f32 %v5674_v54  ;;  %v5564_v14 = vsub.f32 %v5532_v12, %v5548_v37 }
 0x760   : > { %7519 = vrsqrt.f32 %v5673_v46  ;;  %v5563_v26 = vsub.f32 %v5531_v34, %v5547_v53  ;;  %v7242_v42 = vpop.f32.mrb[184].mxu1 }
 0x761   : > { %v7510_v33 = vpop.eup %7509  ;;  %v5676_v7 = vadd.f32 1e-05, %v5564_v14  ;;  %v5534_v15 = vmul.f32 0.0009765625, %v7242_v42  ;;  %v5486_v28 = vpop.f32.mrb[185].mxu1 }
 0x762   : > { %v7512_v32 = vpop.eup %7511  ;;  %v5675_v16 = vadd.f32 1e-05, %v5563_v26  ;;  %v5533_v20 = vmul.f32 0.0009765625, %v5486_v28  ;;  %5708 = vperm.xlu1 %7465, %v7510_v33  }
 0x763   : > { %7521 = vrsqrt.f32 %v5676_v7  ;;  %v5566_v30 = vsub.f32 %v5534_v15, %v5550_v18  ;;  %5703 = vperm.xlu0 %7464, %v7512_v32  }
 0x764   : > { %7523 = vrsqrt.f32 %v5675_v16  ;;  %v5565_v19 = vsub.f32 %v5533_v20, %v5549_v62  ;;  %v7245_v39 = vpop.f32.mrb[186].mxu1 }
 0x765   : > { %v7514_v3 = vpop.eup %7513  ;;  %v5678_v59 = vadd.f32 1e-05, %v5566_v30  ;;  %v5536_v60 = vmul.f32 0.0009765625, %v7245_v39  ;;  %v5496_v1 = vpop.f32.mrb[187].mxu1 }
 0x766   : > { %v7516_v35 = vpop.eup %7515  ;;  %v5677_v29 = vadd.f32 1e-05, %v5565_v19  ;;  %v5535_v31 = vmul.f32 0.0009765625, %v5496_v1  ;;  %5718 = vperm.xlu1 %7465, %v7514_v3  }
 0x767   : > { %7525 = vrsqrt.f32 %v5678_v59  ;;  %v5568_v48 = vsub.f32 %v5536_v60, %v5552_v45  ;;  %5713 = vperm.xlu0 %7464, %v7516_v35  }
 0x768   : > { %7527 = vrsqrt.f32 %v5677_v29  ;;  %v5567_v43 = vsub.f32 %v5535_v31, %v5551_v27  ;;  %v7248_v17 = vpop.f32.mrb[188].mxu1 }
 0x769   : > { %v7518_v2 = vpop.eup %7517  ;;  %v5680_v5 = vadd.f32 1e-05, %v5568_v48  ;;  %v5538_v41 = vmul.f32 0.0009765625, %v7248_v17  ;;  %v5506_v13 = vpop.f32.mrb[189].mxu1 }
 0x76a   : > { %v7520_v24 = vpop.eup %7519  ;;  %v5679_v40 = vadd.f32 1e-05, %v5567_v43  ;;  %v5537_v10 = vmul.f32 0.0009765625, %v5506_v13  ;;  %5728 = vperm.xlu1 %7465, %v7518_v2  }
 0x76b   : > { %7529 = vrsqrt.f32 %v5680_v5  ;;  %v5570_v50 = vsub.f32 %v5538_v41, %v5554_v55  ;;  %5723 = vperm.xlu0 %7464, %v7520_v24  }
 0x76c   : > { %7531 = vrsqrt.f32 %v5679_v40  ;;  %v5569_v37 = vsub.f32 %v5537_v10, %v5553_v21  ;;  %v7251_v54 = vpop.f32.mrb[190].mxu1 }
 0x76d   : > { %v7522_v12 = vpop.eup %7521  ;;  %v5682_v9 = vadd.f32 1e-05, %v5570_v50  ;;  %v5540_v53 = vmul.f32 0.0009765625, %v7251_v54  ;;  %v5516_v46 = vpop.f32.mrb[191].mxu1 }
 0x76e   : > { %v7524_v34 = vpop.eup %7523  ;;  %v5681_v14 = vadd.f32 1e-05, %v5569_v37  ;;  %v5539_v26 = vmul.f32 0.0009765625, %v5516_v46  ;;  %5738 = vperm.xlu1 %7465, %v7522_v12  }
 0x76f   : > { %7533 = vrsqrt.f32 %v5682_v9  ;;  %v5572_v42 = vsub.f32 %v5540_v53, %v5556_v51  ;;  %5733 = vperm.xlu0 %7464, %v7524_v34  }
 0x770   : > { %7535 = vrsqrt.f32 %v5681_v14  ;;  %v5571_v33 = vsub.f32 %v5539_v26, %v5555_v11 }
 0x771   : > { %v7526_v18 = vpop.eup %7525  ;;  %v5684_v7 = vadd.f32 1e-05, %v5572_v42 }
 0x772   : > { %v7528_v15 = vpop.eup %7527  ;;  %v5683_v28 = vadd.f32 1e-05, %v5571_v33  ;;  %5748 = vperm.xlu1 %7465, %v7526_v18  }
 0x773   : > { %7537 = vrsqrt.f32 %v5684_v7  ;;  %5743 = vperm.xlu0 %7464, %v7528_v15  }
 0x774   : > { %7539 = vrsqrt.f32 %v5683_v28 }
 0x775   : > { %v7530_v4 = vpop.eup %7529 }
 0x776   : > { %v7532_v32 = vpop.eup %7531  ;;  %5758 = vperm.xlu1 %7465, %v7530_v4  }
 0x777   : > { %5753 = vperm.xlu0 %7464, %v7532_v32  }
 0x779   : > { %v7534_v0 = vpop.eup %7533 }
 0x77a   : > { %v7536_v62 = vpop.eup %7535  ;;  %5768 = vperm.xlu1 %7465, %v7534_v0  }
 0x77b   : > { %5763 = vperm.xlu0 %7464, %v7536_v62  }
 0x77d   : > { %v7538_v16 = vpop.eup %7537 }
 0x77e   : > { %v7540_v20 = vpop.eup %7539  ;;  %5778 = vperm.xlu1 %7465, %v7538_v16  }
 0x77f   : > { %5773 = vperm.xlu0 %7464, %v7540_v20  }
 0x7b2   : > { %v5581_v3 = vpop.permute.xlu0 %5580 }
 0x7b3   : > { %v5576_v30 = vpop.permute.xlu1 %5575  ;;  %v5654_v55 = vsub.f32 %v8951_v47, %v5581_v3 }
 0x7b4   : > { %v5653_v5 = vsub.f32 %v8948_v6, %v5576_v30 }
 0x7b7   : > { %v5591_v19 = vpop.permute.xlu1 %5590 }
 0x7b8   : > { %v5656_v40 = vsub.f32 %v8961_v63, %v5591_v19 }
 0x7bb   : > { %v5586_v39 = vpop.permute.xlu1 %5585  ;;  %v5596_v59 = vpop.permute.xlu0 %5595 }
 0x7bc   : > { %v5655_v50 = vsub.f32 %v8958_v36, %v5586_v39  ;;  %v5657_v36 = vsub.f32 %v8968_v22, %v5596_v59 }
 0x7bf   : > { %v5601_v45 = vpop.permute.xlu1 %5600  ;;  %v5606_v1 = vpop.permute.xlu0 %5605 }
 0x7c0   : > { %v5658_v63 = vsub.f32 %v8971_v58, %v5601_v45  ;;  %v5659_v22 = vsub.f32 %v8978_v49, %v5606_v1 }
 0x7c3   : > { %v5611_v60 = vpop.permute.xlu1 %5610  ;;  %v5616_v27 = vpop.permute.xlu0 %5615 }
 0x7c4   : > { %v5660_v58 = vsub.f32 %v8981_v52, %v5611_v60  ;;  %v5661_v49 = vsub.f32 %v8988_v8, %v5616_v27 }
 0x7c7   : > { %v5621_v35 = vpop.permute.xlu1 %5620  ;;  %v5626_v31 = vpop.permute.xlu0 %5625 }
 0x7c8   : > { %v5662_v52 = vsub.f32 %v8991_v23, %v5621_v35  ;;  %v5663_v30 = vsub.f32 %v8998_v61, %v5626_v31 }
 0x7cb   : > { %v5631_v29 = vpop.permute.xlu1 %5630  ;;  %v9114_v43 = vpop.permute.xlu0 %5635 }
 0x7cc   : > { %v5664_v16 = vsub.f32 %v9001_v38, %v5631_v29  ;;  %v5665_v60 = vsub.f32 %v9008_v44, %v9114_v43 }
 0x7cf   : > { %v9112_v48 = vpop.permute.xlu1 %5640  ;;  %v9118_v2 = vpop.permute.xlu0 %5645 }
 0x7d0   : > { %v5666_v45 = vsub.f32 %v9011_v57, %v9112_v48 }
 0x7d3   : > { %v9116_v17 = vpop.permute.xlu1 %5650 }
 0x7d4   : > { %v5668_v29 = vsub.f32 %v9020_v25, %v9116_v17 }
 0x7e1   : > { %v5709_v41 = vpop.permute.xlu1 %5708 }
 0x7e2   : > { %v9122_v13 = vmul.f32 %v5709_v41, %v5654_v55  ;;  %v5704_v24 = vpop.permute.xlu0 %5703  ;;  %v5667_v55 = vsub.f32 %v9017_v56, %v9118_v2  ;;  %v7837_v56 = vmov (!%p6362_p1), 0.0   ;;  %v5842_v2 = vld [vmem:[%s9288_s22] sm:$0xff] (!%p6362_p1) }
 0x7e3   : > { %v9124_v21 = vmul.f32 %v5704_v24, %v5653_v5  ;;  %7252 = vmatprep.subr.bf16.mxu0 (!%p6362_p1), %v7837_v56  ;;  %7268 = vmatprep.mubr.msk.bf16.mxu0 (!%p6362_p1), %vm7838_vm2, %v7837_v56 }
 0x7e4   : > { %v5798_v10 = vmax.f32 %v9122_v13, 0.0 }
 0x7e5   : > { %v5797_v37 = vmax.f32 %v9124_v21, 0.0  ;;  %v5719_v54 = vpop.permute.xlu1 %5718 }
 0x7e6   : > { %5814 = vst [vmem:[#allocation2 + $0x8] sm:$0xff] %v5798_v10  ;;  %v9132_v47 = vmul.f32 %v5719_v54, %v5656_v40  ;;  %v5714_v6 = vpop.permute.xlu0 %5713  ;;  %v7839_v40 = vmov (!%p6362_p1), 0  }
 0x7e7   : > { %5813 = vst [vmem:[#allocation2] sm:$0xff] %v5797_v37  ;;  %v9136_v12 = vmul.f32 %v5714_v6, %v5655_v50  ;;  %v5834_v25 = vpack.c.bf16 (!%p6362_p1), %v5798_v10, %v5797_v37  ;;  %7541 = vset.pattern.permute.xlu0 (!%p6362_p1), %v7839_v40 }
 0x7e8   : > { %v5800_v51 = vmax.f32 %v9132_v47, 0.0  ;;  %5845 = vperm.xlu0 (!%p6362_p1), %7541, %v5842_v2   ;;  %v5833_v47 = vld [vmem:[#allocation3] sm:$0xf] (!%p6362_p1) }
 0x7e9   : > { %v5799_v9 = vmax.f32 %v9136_v12, 0.0  ;;  %v5729_v53 = vpop.permute.xlu1 %5728  ;;  %7253 = vmatpush3.bf16.msra.mxu0 (!%p6362_p1), %v5834_v25 }
 0x7ea   : > { %5816 = vst [vmem:[#allocation2 + $0x18] sm:$0xff] %v5800_v51  ;;  %v9144_v46 = vmul.f32 %v5729_v53, %v5658_v63  ;;  %v5724_v34 = vpop.permute.xlu0 %5723  ;;  %7254 = vmatprep.subr.bf16.mxu0 (!%p6362_p1), %v7837_v56 }
 0x7eb   : > { %5815 = vst [vmem:[#allocation2 + $0x10] sm:$0xff] %v5799_v9  ;;  %v9148_v11 = vmul.f32 %v5724_v34, %v5657_v36  ;;  %v5835_v17 = vpack.c.bf16 (!%p6362_p1), %v5800_v51, %v5799_v9 }
 0x7ec   : > { %v5802_v14 = vmax.f32 %v9144_v46, 0.0 }
 0x7ed   : > { %v5801_v26 = vmax.f32 %v9148_v11, 0.0  ;;  %v5739_v42 = vpop.permute.xlu1 %5738  ;;  %7255 = vmatpush3.bf16.msra.mxu0 (!%p6362_p1), %v5835_v17 }
 0x7ee   : > { %5818 = vst [vmem:[#allocation2 + $0x28] sm:$0xff] %v5802_v14  ;;  %v9156_v33 = vmul.f32 %v5739_v42, %v5660_v58  ;;  %v5734_v18 = vpop.permute.xlu0 %5733  ;;  %7256 = vmatprep.subr.bf16.mxu0 (!%p6362_p1), %v7837_v56 }
 0x7ef   : > { %5817 = vst [vmem:[#allocation2 + $0x20] sm:$0xff] %v5801_v26  ;;  %v9160_v7 = vmul.f32 %v5734_v18, %v5659_v22  ;;  %v5836_v13 = vpack.c.bf16 (!%p6362_p1), %v5802_v14, %v5801_v26 }
 0x7f0   : > { %v5804_v15 = vmax.f32 %v9156_v33, 0.0 }
 0x7f1   : > { %v5803_v28 = vmax.f32 %v9160_v7, 0.0  ;;  %v5749_v4 = vpop.permute.xlu1 %5748  ;;  %7257 = vmatpush3.bf16.msra.mxu0 (!%p6362_p1), %v5836_v13 }
 0x7f2   : > { %5820 = vst [vmem:[#allocation2 + $0x38] sm:$0xff] %v5804_v15  ;;  %v5790_v32 = vmul.f32 %v5749_v4, %v5662_v52  ;;  %v5744_v0 = vpop.permute.xlu0 %5743  ;;  %7258 = vmatprep.subr.bf16.mxu0 (!%p6362_p1), %v7837_v56 }
 0x7f3   : > { %5819 = vst [vmem:[#allocation2 + $0x30] sm:$0xff] %v5803_v28  ;;  %v5789_v62 = vmul.f32 %v5744_v0, %v5661_v49  ;;  %v5837_v21 = vpack.c.bf16 (!%p6362_p1), %v5804_v15, %v5803_v28 }
 0x7f4   : > { %v5806_v20 = vmax.f32 %v5790_v32, 0.0 }
 0x7f5   : > { %v5805_v19 = vmax.f32 %v5789_v62, 0.0  ;;  %v5759_v39 = vpop.permute.xlu1 %5758  ;;  %7259 = vmatpush3.bf16.msra.mxu0 (!%p6362_p1), %v5837_v21 }
 0x7f6   : > { %5822 = vst [vmem:[#allocation2 + $0x48] sm:$0xff] %v5806_v20  ;;  %v5792_v23 = vmul.f32 %v5759_v39, %v5664_v16  ;;  %v5754_v3 = vpop.permute.xlu0 %5753  ;;  %7260 = vmatprep.subr.bf16.mxu0 (!%p6362_p1), %v7837_v56 }
 0x7f7   : > { %5821 = vst [vmem:[#allocation2 + $0x40] sm:$0xff] %v5805_v19  ;;  %v5791_v8 = vmul.f32 %v5754_v3, %v5663_v30  ;;  %v5838_v10 = vpack.c.bf16 (!%p6362_p1), %v5806_v20, %v5805_v19 }
 0x7f8   : > { %v5808_v59 = vmax.f32 %v5792_v23, 0.0 }
 0x7f9   : > { %v5807_v1 = vmax.f32 %v5791_v8, 0.0  ;;  %v5769_v35 = vpop.permute.xlu1 %5768  ;;  %7261 = vmatpush3.bf16.msra.mxu0 (!%p6362_p1), %v5838_v10 }
 0x7fa   : > { %5824 = vst [vmem:[#allocation2 + $0x58] sm:$0xff] %v5808_v59  ;;  %v5794_v38 = vmul.f32 %v5769_v35, %v5666_v45  ;;  %v5764_v27 = vpop.permute.xlu0 %5763  ;;  %7262 = vmatprep.subr.bf16.mxu0 (!%p6362_p1), %v7837_v56 }
 0x7fb   : > { %5823 = vst [vmem:[#allocation2 + $0x50] sm:$0xff] %v5807_v1  ;;  %v5793_v61 = vmul.f32 %v5764_v27, %v5665_v60  ;;  %v5839_v50 = vpack.c.bf16 (!%p6362_p1), %v5808_v59, %v5807_v1 }
 0x7fc   : > { %v5810_v31 = vmax.f32 %v5794_v38, 0.0 }
 0x7fd   : > { %v5809_v5 = vmax.f32 %v5793_v61, 0.0  ;;  %v5779_v57 = vpop.permute.xlu1 %5778  ;;  %5832 = sbr.rel (%p6362_p1) target bundleno = 2271 (0x8df), region = 112  ;;  %7263 = vmatpush3.bf16.msra.mxu0 (!%p6362_p1), %v5839_v50 }
 0x7fe   : > { %5826 = vst [vmem:[#allocation2 + $0x68] sm:$0xff] %v5810_v31  ;;  %v5796_v48 = vmul.f32 %v5779_v57, %v5668_v29  ;;  %v5774_v41 = vpop.permute.xlu0 %5773  ;;  %7264 = vmatprep.subr.bf16.mxu0 (!%p6362_p1), %v7837_v56 }
 0x7ff   : > { %5825 = vst [vmem:[#allocation2 + $0x60] sm:$0xff] %v5809_v5  ;;  %v5795_v44 = vmul.f32 %v5774_v41, %v5667_v55  ;;  %v5840_v37 = vpack.c.bf16 (!%p6362_p1), %v5810_v31, %v5809_v5 }
 0x800   : > { %v5812_v43 = vmax.f32 %v5796_v48, 0.0 }
 0x801   : > { %v5811_v24 = vmax.f32 %v5795_v44, 0.0  ;;  %7265 = vmatpush3.bf16.msra.mxu0 (!%p6362_p1), %v5840_v37 }
 0x802   : > { %5828 = vst [vmem:[#allocation2 + $0x78] sm:$0xff] %v5812_v43  ;;  %7266 = vmatprep.subr.bf16.mxu0 (!%p6362_p1), %v7837_v56 }
 0x803   : > { %5827 = vst [vmem:[#allocation2 + $0x70] sm:$0xff] %v5811_v24  ;;  %v5841_v54 = vpack.c.bf16 (!%p6362_p1), %v5812_v43, %v5811_v24 }
 0x805   : > { %7267 = vmatpush3.bf16.msra.mxu0 %v5841_v54 }
 0x808   : > { %7269 = vmatmul.mubr.bf16.vlgmr.msra.gmra.mrb[0].mxu0 %v5833_v47 }
 0x867   : > { %v5846_v6 = vpop.permute.xlu0 %5845 }
 0x8db   : > { %v5882_v12 = vpop.f32.mrb[0].mxu0 }
 0x8dc   : > { %v5883_v63 = vadd.f32 %v5882_v12, %v5846_v6  ;;  %v7270_v51 = vpop.f32.mrb[1].mxu0 }
 0x8dd   : > { %v5885_v36 = vpop.f32.mrb[2].mxu0 }
 0x8de   : > { %5888 = vst [vmem:[%s9289_s28] sm:$0xff] %v5883_v63  ;;  %v7271_v9 = vpop.f32.mrb[3].mxu0 }
 0x8df PF: > { %s9290_s28 = sld [smem:[#allocation22_spill]]  ;;  %s9291_s8 = sld [smem:[#allocation21_spill]] }
 0x8e0   : > { %s9292_s27 = sld [smem:[#allocation23_spill]]  ;;  %s9293_s25 = smov %s7812_s26 }
 0x8e5   : > { %p27_p10 = scmp.ge.s32.totalorder %s9290_s28, 4   ;;  %s9294_s26 = smov %s9291_s8 }
 0x8e7   :  { %29 = sbr.rel (!%p27_p10) target bundleno = 17 (0x11), region = 170 }
 0x8ee   :  { %5900 = vsyncpa [#allocation4], 1 }
 0x8ef   :  { %5902 = vsyncpa [#allocation4 + $0x1], 1 }
 0x8f0   :  { %5903 = vsyncpa [#allocation6], 1 }
 0x8f1   :  { %5905 = vsyncpa [#allocation6 + $0x1], 1 }
 0x8f2   :  { %5906 = vsyncpa [#allocation9], 1 }
 0x8f3   :  { %5907 = vsyncpa [#allocation12], 1 }
 0x8f4   :  { %5908 = vsyncpa [#allocation15], 1 }

</bundles_post_ra>
